<compile_context>
chip_gen: v6e
topology: v6e:2x2x1
jax: 0.10.0
libtpu: 0.0.40
codegen_flags: <defaults>
</compile_context>

<pallas_src>
import math
import functools

import jax
import jax.numpy as jnp
from jax import lax
from jax.experimental import pallas as pl
from jax.experimental.pallas import tpu as pltpu  # noqa: F401  (imported for TPU pallas backend)

# ---------------- model hyper-parameters (small, synthetic) -----------------
HIDDEN = 32
N_HARMONIC = 16
N_BANDS = 8
MFCC_BINS = 4
SAMPLING_RATE = 128      # Reverb length == sampling_rate, must be <= T*block_size
BLOCK_SIZE = 16
B = 2
T = 8

LN_EPS = 1e-5
NEG_SLOPE = 0.01
LOG10 = math.log(10.0)


# ============================ Pallas kernels ================================

def _dense_ln_lrelu(x, W, b, g, beta):
    """Linear -> LayerNorm -> LeakyReLU(0.01) on a row slab (values stay in vregs)."""
    y = jnp.dot(x, W, preferred_element_type=jnp.float32) + b
    mu = jnp.mean(y, axis=-1, keepdims=True)
    var = jnp.mean((y - mu) ** 2, axis=-1, keepdims=True)
    yn = (y - mu) * lax.rsqrt(var + LN_EPS)
    yn = yn * g + beta
    return jnp.where(yn >= 0.0, yn, NEG_SLOPE * yn)


def _mlp3_kernel(x_ref, *refs):
    """Fused 3-layer MLP on the full (M, Din) slab. refs = 12 param refs + out ref."""
    o_ref = refs[-1]
    h = x_ref[...]
    for i in range(3):
        w, b, g, beta = (r[...] for r in refs[4 * i:4 * i + 4])
        h = _dense_ln_lrelu(h, w, b, g, beta)
    o_ref[...] = h


def _mlp3_proj_scale_kernel(x_ref, *refs, split):
    """Fused 3-layer out_mlp + concatenated projections + scale_function.

    refs = 12 mlp param refs, proj_w (H, 25), proj_b (1, 25), out ref (M, 25).
    Columns >= `split` get the noise-branch "-5" shift before the sigmoid.
    """
    o_ref = refs[-1]
    pw_ref, pb_ref = refs[12], refs[13]
    h = x_ref[...]
    for i in range(3):
        w, b, g, beta = (r[...] for r in refs[4 * i:4 * i + 4])
        h = _dense_ln_lrelu(h, w, b, g, beta)
    y = jnp.dot(h, pw_ref[...], preferred_element_type=jnp.float32) + pb_ref[...]
    col = lax.broadcasted_iota(jnp.int32, y.shape, 1)
    y = y - jnp.where(col < split, 0.0, 5.0)
    sig = jax.nn.sigmoid(y)
    o_ref[...] = 2.0 * jnp.power(sig, LOG10) + 1e-7          # scale_function


def _gru_kernel(x_ref, wi_ref, wh_ref, bi_ref, bh_ref, o_ref, *, T, Bb, H):
    """Single-call GRU, PyTorch gate equations, h0 = 0.

    x_ref: (T*Bb, I) time-major rows.  Gate packing along the 3H axis is r | z | n.
    The input-gate matmul is hoisted out of the recurrence (one MXU op for all T);
    the short recurrence (T steps) is fully unrolled with static slices only.
    """
    ig = jnp.dot(x_ref[...], wi_ref[...], preferred_element_type=jnp.float32) + bi_ref[...]
    wh = wh_ref[...]
    bh = bh_ref[...]
    h = jnp.zeros((Bb, H), jnp.float32)
    for t in range(T):                                   # short fixed trip-count -> unroll
        g = ig[t * Bb:(t + 1) * Bb, :]                   # (Bb, 3H), static slice
        hg = jnp.dot(h, wh, preferred_element_type=jnp.float32) + bh
        r = jax.nn.sigmoid(g[:, :H] + hg[:, :H])
        z = jax.nn.sigmoid(g[:, H:2 * H] + hg[:, H:2 * H])
        n = jnp.tanh(g[:, 2 * H:] + r * hg[:, 2 * H:])
        h = (1.0 - z) * n + z * h
        o_ref[t * Bb:(t + 1) * Bb, :] = h


def _harm_kernel(om_ref, amp_ref, k_ref, o_ref):
    """signal[b, n] = sum_k sin(omega[b, n] * k) * amp[b, k, n]  (lane-dense over n)."""
    om = om_ref[...]                # (B, 1, N)   N on lanes
    amp = amp_ref[...]              # (B, K, N)   harmonics on sublanes
    k = k_ref[...]                  # (1, K, 1)   harmonic indices 1..K
    o_ref[...] = jnp.sum(jnp.sin(om * k) * amp, axis=1)   # (B, N) -> unmasked 128-wide stores


# ============================ kernel wrappers ================================

def mlp3_forward(x, layers):
    """x: (M, Din) -> (M, H) through one fused 3-layer MLP pallas_call."""
    M = x.shape[0]
    Dout = layers[-1][0].shape[1]
    args = [p for layer in layers for p in layer]
    return pl.pallas_call(
        _mlp3_kernel,
        out_shape=jax.ShapeDtypeStruct((M, Dout), jnp.float32),
    )(x, *args)


def mlp3_proj_scale_forward(x, layers, proj_w, proj_b, split):
    """x: (M, Din) -> scale_function of both projection heads, (M, 25)."""
    M = x.shape[0]
    Dout = proj_w.shape[1]
    args = [p for layer in layers for p in layer] + [proj_w, proj_b]
    kernel = functools.partial(_mlp3_proj_scale_kernel, split=int(split))
    return pl.pallas_call(
        kernel,
        out_shape=jax.ShapeDtypeStruct((M, Dout), jnp.float32),
    )(x, *args)


def gru_forward(x, Wi, Wh, bi, bh):
    """x: (B, T, I) -> (B, T, H).  PyTorch GRU equations, h0 = 0, single pallas_call."""
    Bb, Tt, I = x.shape
    H = Wh.shape[0]
    xt = jnp.transpose(x, (1, 0, 2)).reshape(Tt * Bb, I)      # time-major rows
    kernel = functools.partial(_gru_kernel, T=Tt, Bb=Bb, H=H)
    out = pl.pallas_call(
        kernel,
        out_shape=jax.ShapeDtypeStruct((Tt * Bb, H), jnp.float32),
    )(xt, Wi, Wh, bi, bh)
    return jnp.transpose(out.reshape(Tt, Bb, H), (1, 0, 2))


def harmonic_synth(pitch_up, amplitudes_up, sampling_rate):
    """pitch_up: (B, N, 1), amplitudes_up: (B, N, n_harm) -> (B, N, 1)."""
    Bb, N, K = amplitudes_up.shape
    omega = jnp.cumsum(2.0 * math.pi * pitch_up / sampling_rate, axis=1)   # (B, N, 1)
    om = jnp.transpose(omega, (0, 2, 1))                                   # (B, 1, N)
    am = jnp.transpose(amplitudes_up, (0, 2, 1))                           # (B, K, N)
    k = jnp.arange(1, K + 1, dtype=jnp.float32).reshape(1, K, 1)
    sig = pl.pallas_call(
        _harm_kernel,
        out_shape=jax.ShapeDtypeStruct((Bb, N), jnp.float32),
    )(om, am, k)
    return sig[..., None]


# ============================ plain-JAX glue =================================

def remove_above_nyquist(amplitudes, pitch, sampling_rate):
    n_harm = amplitudes.shape[-1]
    pitches = pitch * jnp.arange(1, n_harm + 1, dtype=jnp.float32)
    aa = (pitches < sampling_rate / 2).astype(jnp.float32) + 1e-4
    return amplitudes * aa


def upsample(signal, factor):
    # F.interpolate(mode='nearest') over time == repeat each frame `factor` times.
    return jnp.repeat(signal, factor, axis=1)


def amp_to_impulse_response(amp, target_size):
    # TODO(synk): irfft has no Pallas TPU primitive; implemented with jnp.fft.
    ir = jnp.fft.irfft(amp.astype(jnp.complex64), axis=-1)
    filter_size = ir.shape[-1]
    ir = jnp.roll(ir, filter_size // 2, axis=-1)
    n = jnp.arange(filter_size, dtype=jnp.float32)
    win = 0.5 - 0.5 * jnp.cos(2.0 * math.pi * n / filter_size)  # torch.hann_window (periodic)
    ir = ir * win
    ir = jnp.pad(ir, [(0, 0)] * (ir.ndim - 1) + [(0, int(target_size) - int(filter_size))])
    ir = jnp.roll(ir, -filter_size // 2, axis=-1)
    return ir


def fft_convolve(signal, kernel):
    # TODO(synk): rfft/irfft have no Pallas TPU primitive; implemented with jnp.fft.
    signal = jnp.pad(signal, [(0, 0)] * (signal.ndim - 1) + [(0, signal.shape[-1])])
    kernel = jnp.pad(kernel, [(0, 0)] * (kernel.ndim - 1) + [(kernel.shape[-1], 0)])
    out = jnp.fft.irfft(jnp.fft.rfft(signal) * jnp.fft.rfft(kernel))
    return out[..., out.shape[-1] // 2:]


def reverb_forward(x, rev):
    # x: (B, lenx, 1), Reverb(length=sampling_rate, sampling_rate)
    noise, decay, wet, t = rev["noise"], rev["decay"], rev["wet"], rev["t"]
    dec = jnp.exp(-jax.nn.softplus(-decay) * t * 500.0)      # (1, L, 1)
    impulse = noise * dec * jax.nn.sigmoid(wet)              # (1, L, 1)
    impulse = impulse.at[:, 0, :].set(1.0)
    lenx = x.shape[1]
    length = impulse.shape[1]
    impulse = jnp.pad(impulse, ((0, 0), (0, lenx - length), (0, 0)))
    out = fft_convolve(x[..., 0], impulse[..., 0])[..., None]
    return out


# ============================ parameter init =================================

def _linear_init(key, din, dout):
    k1, k2 = jax.random.split(key)
    lim = 1.0 / math.sqrt(din)
    W = jax.random.uniform(k1, (din, dout), minval=-lim, maxval=lim, dtype=jnp.float32)
    b = jax.random.uniform(k2, (1, dout), minval=-lim, maxval=lim, dtype=jnp.float32)
    return W, b


def _mlp_init(key, din, hidden, n_layers=3):
    dims = [din] + [hidden] * n_layers
    layers = []
    keys = jax.random.split(key, n_layers)
    for i in range(n_layers):
        W, b = _linear_init(keys[i], dims[i], dims[i + 1])
        g = jnp.ones((1, dims[i + 1]), jnp.float32)          # LayerNorm gamma
        beta = jnp.zeros((1, dims[i + 1]), jnp.float32)      # LayerNorm beta
        layers.append((W, b, g, beta))
    return layers


def init_params(key):
    keys = jax.random.split(key, 8)
    gru_in = (MFCC_BINS + 2) * HIDDEN
    lim = 1.0 / math.sqrt(HIDDEN)
    p = {
        # all in_mlps share the SAME parameters (list-replication in the torch code)
        "in_mlp": _mlp_init(keys[0], 1, HIDDEN),
        "out_mlp": _mlp_init(keys[1], HIDDEN + MFCC_BINS + 2, HIDDEN),
        # GRU weights stored gate-concatenated (r | z | n) along the 3H axis.
        # (If loading real torch weights: weight_ih/weight_hh are stored transposed
        #  and packed along dim 0 in the same r|z|n order.)
        "gru_wi": jax.random.uniform(keys[2], (gru_in, 3 * HIDDEN), minval=-lim, maxval=lim, dtype=jnp.float32),
        "gru_wh": jax.random.uniform(keys[3], (HIDDEN, 3 * HIDDEN), minval=-lim, maxval=lim, dtype=jnp.float32),
        "gru_bi": jax.random.uniform(keys[4], (1, 3 * HIDDEN), minval=-lim, maxval=lim, dtype=jnp.float32),
        "gru_bh": jax.random.uniform(keys[5], (1, 3 * HIDDEN), minval=-lim, maxval=lim, dtype=jnp.float32),
    }
    # Two projection heads, concatenated into one (H, n_harmonic+1 + n_bands) matrix.
    w0, b0 = _linear_init(keys[6], HIDDEN, N_HARMONIC + 1)
    w1, b1 = _linear_init(keys[7], HIDDEN, N_BANDS)
    p["proj_w"] = jnp.concatenate([w0, w1], axis=-1)
    p["proj_b"] = jnp.concatenate([b0, b1], axis=-1)
    # Reverb(length=sampling_rate, sampling_rate, initial_wet=0, initial_decay=5)
    rk = jax.random.fold_in(key, 123)
    p["reverb"] = {
        "noise": jax.random.uniform(rk, (SAMPLING_RATE, 1), minval=-1.0, maxval=1.0, dtype=jnp.float32),
        "decay": jnp.float32(5.0),
        "wet": jnp.float32(0.0),
        "t": (jnp.arange(SAMPLING_RATE, dtype=jnp.float32) / SAMPLING_RATE).reshape(1, -1, 1),
    }
    return p


# ============================ full forward ===================================

def mfcc_decoder_forward(params, pitch, loudness, mfccs, noise_key):
    p = params
    Bb, Tt, _ = pitch.shape

    # 1) shared in_mlp applied to all 6 control channels as ONE stacked slab.
    #    Feature concat order matches torch: [mlp(pitch), mlp(loud), mlp(m0)..mlp(m3)].
    ctrl = jnp.concatenate([pitch, loudness, mfccs], axis=-1)          # (B, T, 6)
    x = jnp.moveaxis(ctrl, -1, 0).reshape(6 * Bb * Tt, 1)              # (6*B*T, 1)
    h6 = mlp3_forward(x, p["in_mlp"])                                  # (6*B*T, H)
    hidden = jnp.moveaxis(h6.reshape(6, Bb, Tt, HIDDEN), 0, 2).reshape(Bb, Tt, 6 * HIDDEN)

    # 2) GRU (h0 = 0) + concat raw controls
    gru_out = gru_forward(hidden, p["gru_wi"], p["gru_wh"], p["gru_bi"], p["gru_bh"])
    h2 = jnp.concatenate([gru_out, pitch, loudness, mfccs], axis=-1).reshape(Bb * Tt, -1)

    # 3) out_mlp + both projection heads + scale_function, fused in one kernel
    param = mlp3_proj_scale_forward(h2, p["out_mlp"], p["proj_w"], p["proj_b"],
                                    split=N_HARMONIC + 1).reshape(Bb, Tt, -1)
    param0 = param[..., :N_HARMONIC + 1]      # == scale_function(proj0(hidden))
    param1 = param[..., N_HARMONIC + 1:]      # == scale_function(proj1(hidden) - 5)

    # 4) harmonic branch
    total_amp = param0[..., :1]
    amplitudes = param0[..., 1:]
    amplitudes = remove_above_nyquist(amplitudes, pitch, SAMPLING_RATE)
    amplitudes = amplitudes / jnp.sum(amplitudes, axis=-1, keepdims=True)
    amplitudes = amplitudes * total_amp
    amplitudes_up = upsample(amplitudes, BLOCK_SIZE)          # (B, T*bs, n_harm)
    pitch_up = upsample(pitch, BLOCK_SIZE)                    # (B, T*bs, 1)
    harmonic = harmonic_synth(pitch_up, amplitudes_up, SAMPLING_RATE)   # (B, T*bs, 1)

    # 5) filtered-noise branch
    impulse = amp_to_impulse_response(param1, BLOCK_SIZE)     # (B, T, block_size)
    noise = jax.random.uniform(noise_key, (Bb, Tt, BLOCK_SIZE), dtype=jnp.float32) * 2.0 - 1.0
    noise = fft_convolve(noise, impulse).reshape(Bb, -1, 1)

    # 6) mix + reverb
    signal = harmonic + noise
    signal = reverb_forward(signal, p["reverb"])
    return signal


# ================================= main ======================================

if __name__ == "__main__":
    key = jax.random.PRNGKey(0)
    pkey, ikey, nkey = jax.random.split(key, 3)

    params = init_params(pkey)

    k1, k2, k3 = jax.random.split(ikey, 3)
    pitch = jax.random.uniform(k1, (B, T, 1), minval=20.0, maxval=60.0, dtype=jnp.float32)
    loudness = jax.random.normal(k2, (B, T, 1), dtype=jnp.float32)
    mfccs = jax.random.normal(k3, (B, T, MFCC_BINS), dtype=jnp.float32)

    fwd = jax.jit(mfcc_decoder_forward)
    out = jax.block_until_ready(fwd(params, pitch, loudness, mfccs, nkey))

    assert out.shape == (B, T * BLOCK_SIZE, 1), out.shape
    assert bool(jnp.all(jnp.isfinite(out)))
    print("KERNEL_OK")
</pallas_src>

<mosaic_0001>
module attributes {stable_mosaic.version = 11 : i64} {
  func.func @_mlp3_kernel(%arg0: memref<96x1xf32, #tpu.memory_space<vmem>>, %arg1: memref<1x32xf32, #tpu.memory_space<vmem>>, %arg2: memref<1x32xf32, #tpu.memory_space<vmem>>, %arg3: memref<1x32xf32, #tpu.memory_space<vmem>>, %arg4: memref<1x32xf32, #tpu.memory_space<vmem>>, %arg5: memref<32x32xf32, #tpu.memory_space<vmem>>, %arg6: memref<1x32xf32, #tpu.memory_space<vmem>>, %arg7: memref<1x32xf32, #tpu.memory_space<vmem>>, %arg8: memref<1x32xf32, #tpu.memory_space<vmem>>, %arg9: memref<32x32xf32, #tpu.memory_space<vmem>>, %arg10: memref<1x32xf32, #tpu.memory_space<vmem>>, %arg11: memref<1x32xf32, #tpu.memory_space<vmem>>, %arg12: memref<1x32xf32, #tpu.memory_space<vmem>>, %arg13: memref<96x32xf32, #tpu.memory_space<vmem>>) attributes {dimension_semantics = [], scalar_prefetch = 0 : i64, scratch_operands = 0 : i64, tpu.core_type = #tpu.core_type<tc>} {
    %c0 = arith.constant 0 : index
    %c0_0 = arith.constant 0 : index
    %0 = vector.load %arg0[%c0, %c0_0] : memref<96x1xf32, #tpu.memory_space<vmem>>, vector<96x1xf32>
    %c0_1 = arith.constant 0 : index
    %c0_2 = arith.constant 0 : index
    %1 = vector.load %arg1[%c0_1, %c0_2] : memref<1x32xf32, #tpu.memory_space<vmem>>, vector<1x32xf32>
    %c0_3 = arith.constant 0 : index
    %c0_4 = arith.constant 0 : index
    %2 = vector.load %arg2[%c0_3, %c0_4] : memref<1x32xf32, #tpu.memory_space<vmem>>, vector<1x32xf32>
    %c0_5 = arith.constant 0 : index
    %c0_6 = arith.constant 0 : index
    %3 = vector.load %arg3[%c0_5, %c0_6] : memref<1x32xf32, #tpu.memory_space<vmem>>, vector<1x32xf32>
    %c0_7 = arith.constant 0 : index
    %c0_8 = arith.constant 0 : index
    %4 = vector.load %arg4[%c0_7, %c0_8] : memref<1x32xf32, #tpu.memory_space<vmem>>, vector<1x32xf32>
    %cst = arith.constant dense<0.000000e+00> : vector<96x32xf32>
    %5 = tpu.matmul %0, %1, %cst {dimension_numbers = #tpu.dot_dimension_numbers<[1], [0], [0], [1], [0, 0, 1, 1], [], []>} : vector<96x1xf32>, vector<1x32xf32>, vector<96x32xf32> -> vector<96x32xf32>
    %6 = vector.broadcast %2 : vector<1x32xf32> to vector<96x32xf32>
    %7 = arith.addf %5, %6 : vector<96x32xf32>
    %cst_9 = arith.constant dense<0.000000e+00> : vector<96xf32>
    %8 = vector.multi_reduction <add>, %7, %cst_9 [1] : vector<96x32xf32> to vector<96xf32>
    %9 = vector.shape_cast %8 : vector<96xf32> to vector<96x1xf32>
    %cst_10 = arith.constant 3.200000e+01 : f32
    %10 = vector.broadcast %cst_10 : f32 to vector<96x1xf32>
    %11 = arith.divf %9, %10 : vector<96x1xf32>
    %12 = vector.broadcast %11 : vector<96x1xf32> to vector<96x32xf32>
    %13 = arith.subf %7, %12 : vector<96x32xf32>
    %14 = arith.mulf %13, %13 : vector<96x32xf32>
    %cst_11 = arith.constant dense<0.000000e+00> : vector<96xf32>
    %15 = vector.multi_reduction <add>, %14, %cst_11 [1] : vector<96x32xf32> to vector<96xf32>
    %16 = vector.shape_cast %15 : vector<96xf32> to vector<96x1xf32>
    %cst_12 = arith.constant 3.200000e+01 : f32
    %17 = vector.broadcast %cst_12 : f32 to vector<96x1xf32>
    %18 = arith.divf %16, %17 : vector<96x1xf32>
    %19 = vector.broadcast %11 : vector<96x1xf32> to vector<96x32xf32>
    %20 = arith.subf %7, %19 : vector<96x32xf32>
    %cst_13 = arith.constant 9.99999974E-6 : f32
    %21 = vector.broadcast %cst_13 : f32 to vector<96x1xf32>
    %22 = arith.addf %18, %21 : vector<96x1xf32>
    %23 = math.rsqrt %22 : vector<96x1xf32>
    %24 = vector.broadcast %23 : vector<96x1xf32> to vector<96x32xf32>
    %25 = arith.mulf %20, %24 : vector<96x32xf32>
    %26 = vector.broadcast %3 : vector<1x32xf32> to vector<96x32xf32>
    %27 = arith.mulf %25, %26 : vector<96x32xf32>
    %28 = vector.broadcast %4 : vector<1x32xf32> to vector<96x32xf32>
    %29 = arith.addf %27, %28 : vector<96x32xf32>
    %cst_14 = arith.constant 0.000000e+00 : f32
    %30 = vector.broadcast %cst_14 : f32 to vector<96x32xf32>
    %31 = arith.cmpf oge, %29, %30 : vector<96x32xf32>
    %cst_15 = arith.constant 0.00999999977 : f32
    %32 = vector.broadcast %cst_15 : f32 to vector<96x32xf32>
    %33 = arith.mulf %32, %29 : vector<96x32xf32>
    %34 = arith.select %31, %29, %33 : vector<96x32xi1>, vector<96x32xf32>
    %c0_16 = arith.constant 0 : index
    %c0_17 = arith.constant 0 : index
    %35 = vector.load %arg5[%c0_16, %c0_17] : memref<32x32xf32, #tpu.memory_space<vmem>>, vector<32x32xf32>
    %c0_18 = arith.constant 0 : index
    %c0_19 = arith.constant 0 : index
    %36 = vector.load %arg6[%c0_18, %c0_19] : memref<1x32xf32, #tpu.memory_space<vmem>>, vector<1x32xf32>
    %c0_20 = arith.constant 0 : index
    %c0_21 = arith.constant 0 : index
    %37 = vector.load %arg7[%c0_20, %c0_21] : memref<1x32xf32, #tpu.memory_space<vmem>>, vector<1x32xf32>
    %c0_22 = arith.constant 0 : index
    %c0_23 = arith.constant 0 : index
    %38 = vector.load %arg8[%c0_22, %c0_23] : memref<1x32xf32, #tpu.memory_space<vmem>>, vector<1x32xf32>
    %cst_24 = arith.constant dense<0.000000e+00> : vector<96x32xf32>
    %39 = tpu.matmul %34, %35, %cst_24 {dimension_numbers = #tpu.dot_dimension_numbers<[1], [0], [0], [1], [0, 0, 1, 1], [], []>} : vector<96x32xf32>, vector<32x32xf32>, vector<96x32xf32> -> vector<96x32xf32>
    %40 = vector.broadcast %36 : vector<1x32xf32> to vector<96x32xf32>
    %41 = arith.addf %39, %40 : vector<96x32xf32>
    %cst_25 = arith.constant dense<0.000000e+00> : vector<96xf32>
    %42 = vector.multi_reduction <add>, %41, %cst_25 [1] : vector<96x32xf32> to vector<96xf32>
    %43 = vector.shape_cast %42 : vector<96xf32> to vector<96x1xf32>
    %cst_26 = arith.constant 3.200000e+01 : f32
    %44 = vector.broadcast %cst_26 : f32 to vector<96x1xf32>
    %45 = arith.divf %43, %44 : vector<96x1xf32>
    %46 = vector.broadcast %45 : vector<96x1xf32> to vector<96x32xf32>
    %47 = arith.subf %41, %46 : vector<96x32xf32>
    %48 = arith.mulf %47, %47 : vector<96x32xf32>
    %cst_27 = arith.constant dense<0.000000e+00> : vector<96xf32>
    %49 = vector.multi_reduction <add>, %48, %cst_27 [1] : vector<96x32xf32> to vector<96xf32>
    %50 = vector.shape_cast %49 : vector<96xf32> to vector<96x1xf32>
    %cst_28 = arith.constant 3.200000e+01 : f32
    %51 = vector.broadcast %cst_28 : f32 to vector<96x1xf32>
    %52 = arith.divf %50, %51 : vector<96x1xf32>
    %53 = vector.broadcast %45 : vector<96x1xf32> to vector<96x32xf32>
    %54 = arith.subf %41, %53 : vector<96x32xf32>
    %cst_29 = arith.constant 9.99999974E-6 : f32
    %55 = vector.broadcast %cst_29 : f32 to vector<96x1xf32>
    %56 = arith.addf %52, %55 : vector<96x1xf32>
    %57 = math.rsqrt %56 : vector<96x1xf32>
    %58 = vector.broadcast %57 : vector<96x1xf32> to vector<96x32xf32>
    %59 = arith.mulf %54, %58 : vector<96x32xf32>
    %60 = vector.broadcast %37 : vector<1x32xf32> to vector<96x32xf32>
    %61 = arith.mulf %59, %60 : vector<96x32xf32>
    %62 = vector.broadcast %38 : vector<1x32xf32> to vector<96x32xf32>
    %63 = arith.addf %61, %62 : vector<96x32xf32>
    %cst_30 = arith.constant 0.000000e+00 : f32
    %64 = vector.broadcast %cst_30 : f32 to vector<96x32xf32>
    %65 = arith.cmpf oge, %63, %64 : vector<96x32xf32>
    %cst_31 = arith.constant 0.00999999977 : f32
    %66 = vector.broadcast %cst_31 : f32 to vector<96x32xf32>
    %67 = arith.mulf %66, %63 : vector<96x32xf32>
    %68 = arith.select %65, %63, %67 : vector<96x32xi1>, vector<96x32xf32>
    %c0_32 = arith.constant 0 : index
    %c0_33 = arith.constant 0 : index
    %69 = vector.load %arg9[%c0_32, %c0_33] : memref<32x32xf32, #tpu.memory_space<vmem>>, vector<32x32xf32>
    %c0_34 = arith.constant 0 : index
    %c0_35 = arith.constant 0 : index
    %70 = vector.load %arg10[%c0_34, %c0_35] : memref<1x32xf32, #tpu.memory_space<vmem>>, vector<1x32xf32>
    %c0_36 = arith.constant 0 : index
    %c0_37 = arith.constant 0 : index
    %71 = vector.load %arg11[%c0_36, %c0_37] : memref<1x32xf32, #tpu.memory_space<vmem>>, vector<1x32xf32>
    %c0_38 = arith.constant 0 : index
    %c0_39 = arith.constant 0 : index
    %72 = vector.load %arg12[%c0_38, %c0_39] : memref<1x32xf32, #tpu.memory_space<vmem>>, vector<1x32xf32>
    %cst_40 = arith.constant dense<0.000000e+00> : vector<96x32xf32>
    %73 = tpu.matmul %68, %69, %cst_40 {dimension_numbers = #tpu.dot_dimension_numbers<[1], [0], [0], [1], [0, 0, 1, 1], [], []>} : vector<96x32xf32>, vector<32x32xf32>, vector<96x32xf32> -> vector<96x32xf32>
    %74 = vector.broadcast %70 : vector<1x32xf32> to vector<96x32xf32>
    %75 = arith.addf %73, %74 : vector<96x32xf32>
    %cst_41 = arith.constant dense<0.000000e+00> : vector<96xf32>
    %76 = vector.multi_reduction <add>, %75, %cst_41 [1] : vector<96x32xf32> to vector<96xf32>
    %77 = vector.shape_cast %76 : vector<96xf32> to vector<96x1xf32>
    %cst_42 = arith.constant 3.200000e+01 : f32
    %78 = vector.broadcast %cst_42 : f32 to vector<96x1xf32>
    %79 = arith.divf %77, %78 : vector<96x1xf32>
    %80 = vector.broadcast %79 : vector<96x1xf32> to vector<96x32xf32>
    %81 = arith.subf %75, %80 : vector<96x32xf32>
    %82 = arith.mulf %81, %81 : vector<96x32xf32>
    %cst_43 = arith.constant dense<0.000000e+00> : vector<96xf32>
    %83 = vector.multi_reduction <add>, %82, %cst_43 [1] : vector<96x32xf32> to vector<96xf32>
    %84 = vector.shape_cast %83 : vector<96xf32> to vector<96x1xf32>
    %cst_44 = arith.constant 3.200000e+01 : f32
    %85 = vector.broadcast %cst_44 : f32 to vector<96x1xf32>
    %86 = arith.divf %84, %85 : vector<96x1xf32>
    %87 = vector.broadcast %79 : vector<96x1xf32> to vector<96x32xf32>
    %88 = arith.subf %75, %87 : vector<96x32xf32>
    %cst_45 = arith.constant 9.99999974E-6 : f32
    %89 = vector.broadcast %cst_45 : f32 to vector<96x1xf32>
    %90 = arith.addf %86, %89 : vector<96x1xf32>
    %91 = math.rsqrt %90 : vector<96x1xf32>
    %92 = vector.broadcast %91 : vector<96x1xf32> to vector<96x32xf32>
    %93 = arith.mulf %88, %92 : vector<96x32xf32>
    %94 = vector.broadcast %71 : vector<1x32xf32> to vector<96x32xf32>
    %95 = arith.mulf %93, %94 : vector<96x32xf32>
    %96 = vector.broadcast %72 : vector<1x32xf32> to vector<96x32xf32>
    %97 = arith.addf %95, %96 : vector<96x32xf32>
    %cst_46 = arith.constant 0.000000e+00 : f32
    %98 = vector.broadcast %cst_46 : f32 to vector<96x32xf32>
    %99 = arith.cmpf oge, %97, %98 : vector<96x32xf32>
    %cst_47 = arith.constant 0.00999999977 : f32
    %100 = vector.broadcast %cst_47 : f32 to vector<96x32xf32>
    %101 = arith.mulf %100, %97 : vector<96x32xf32>
    %102 = arith.select %99, %97, %101 : vector<96x32xi1>, vector<96x32xf32>
    %c0_48 = arith.constant 0 : index
    %c0_49 = arith.constant 0 : index
    %103 = vector.load %arg13[%c0_48, %c0_49] : memref<96x32xf32, #tpu.memory_space<vmem>>, vector<96x32xf32>
    tpu.vector_store %arg13[%c0_48, %c0_49], %102 {strides = array<i32>} : memref<96x32xf32, #tpu.memory_space<vmem>>, vector<96x32xf32>,
    return
  }
}

module attributes {stable_mosaic.version = 11 : i64} {
  func.func @_gru_kernel(%arg0: memref<16x192xf32, #tpu.memory_space<vmem>>, %arg1: memref<192x96xf32, #tpu.memory_space<vmem>>, %arg2: memref<32x96xf32, #tpu.memory_space<vmem>>, %arg3: memref<1x96xf32, #tpu.memory_space<vmem>>, %arg4: memref<1x96xf32, #tpu.memory_space<vmem>>, %arg5: memref<16x32xf32, #tpu.memory_space<vmem>>) attributes {dimension_semantics = [], scalar_prefetch = 0 : i64, scratch_operands = 0 : i64, tpu.core_type = #tpu.core_type<tc>} {
    %c0 = arith.constant 0 : index
    %c0_0 = arith.constant 0 : index
    %0 = vector.load %arg0[%c0, %c0_0] : memref<16x192xf32, #tpu.memory_space<vmem>>, vector<16x192xf32>
    %c0_1 = arith.constant 0 : index
    %c0_2 = arith.constant 0 : index
    %1 = vector.load %arg1[%c0_1, %c0_2] : memref<192x96xf32, #tpu.memory_space<vmem>>, vector<192x96xf32>
    %cst = arith.constant dense<0.000000e+00> : vector<16x96xf32>
    %2 = tpu.matmul %0, %1, %cst {dimension_numbers = #tpu.dot_dimension_numbers<[1], [0], [0], [1], [0, 0, 1, 1], [], []>} : vector<16x192xf32>, vector<192x96xf32>, vector<16x96xf32> -> vector<16x96xf32>
    %c0_3 = arith.constant 0 : index
    %c0_4 = arith.constant 0 : index
    %3 = vector.load %arg3[%c0_3, %c0_4] : memref<1x96xf32, #tpu.memory_space<vmem>>, vector<1x96xf32>
    %4 = vector.broadcast %3 : vector<1x96xf32> to vector<16x96xf32>
    %5 = arith.addf %2, %4 : vector<16x96xf32>
    %c0_5 = arith.constant 0 : index
    %c0_6 = arith.constant 0 : index
    %6 = vector.load %arg2[%c0_5, %c0_6] : memref<32x96xf32, #tpu.memory_space<vmem>>, vector<32x96xf32>
    %c0_7 = arith.constant 0 : index
    %c0_8 = arith.constant 0 : index
    %7 = vector.load %arg4[%c0_7, %c0_8] : memref<1x96xf32, #tpu.memory_space<vmem>>, vector<1x96xf32>
    %cst_9 = arith.constant 0.000000e+00 : f32
    %8 = vector.broadcast %cst_9 : f32 to vector<2x32xf32>
    %9 = vector.extract_strided_slice %5 {offsets = [0, 0], sizes = [2, 96], strides = [1, 1]} : vector<16x96xf32> to vector<2x96xf32>
    %cst_10 = arith.constant dense<0.000000e+00> : vector<2x96xf32>
    %10 = tpu.matmul %8, %6, %cst_10 {dimension_numbers = #tpu.dot_dimension_numbers<[1], [0], [0], [1], [0, 0, 1, 1], [], []>} : vector<2x32xf32>, vector<32x96xf32>, vector<2x96xf32> -> vector<2x96xf32>
    %11 = vector.broadcast %7 : vector<1x96xf32> to vector<2x96xf32>
    %12 = arith.addf %10, %11 : vector<2x96xf32>
    %13 = vector.extract_strided_slice %9 {offsets = [0, 0], sizes = [2, 32], strides = [1, 1]} : vector<2x96xf32> to vector<2x32xf32>
    %14 = vector.extract_strided_slice %12 {offsets = [0, 0], sizes = [2, 32], strides = [1, 1]} : vector<2x96xf32> to vector<2x32xf32>
    %15 = arith.addf %13, %14 : vector<2x32xf32>
    %16 = arith.negf %15 : vector<2x32xf32>
    %17 = math.exp %16 : vector<2x32xf32>
    %cst_11 = arith.constant 1.000000e+00 : f32
    %18 = vector.broadcast %cst_11 : f32 to vector<2x32xf32>
    %19 = arith.addf %18, %17 : vector<2x32xf32>
    %20 = arith.divf %18, %19 : vector<2x32xf32>
    %21 = vector.extract_strided_slice %9 {offsets = [0, 32], sizes = [2, 32], strides = [1, 1]} : vector<2x96xf32> to vector<2x32xf32>
    %22 = vector.extract_strided_slice %12 {offsets = [0, 32], sizes = [2, 32], strides = [1, 1]} : vector<2x96xf32> to vector<2x32xf32>
    %23 = arith.addf %21, %22 : vector<2x32xf32>
    %24 = arith.negf %23 : vector<2x32xf32>
    %25 = math.exp %24 : vector<2x32xf32>
    %cst_12 = arith.constant 1.000000e+00 : f32
    %26 = vector.broadcast %cst_12 : f32 to vector<2x32xf32>
    %27 = arith.addf %26, %25 : vector<2x32xf32>
    %28 = arith.divf %26, %27 : vector<2x32xf32>
    %29 = vector.extract_strided_slice %9 {offsets = [0, 64], sizes = [2, 32], strides = [1, 1]} : vector<2x96xf32> to vector<2x32xf32>
    %30 = vector.extract_strided_slice %12 {offsets = [0, 64], sizes = [2, 32], strides = [1, 1]} : vector<2x96xf32> to vector<2x32xf32>
    %31 = arith.mulf %20, %30 : vector<2x32xf32>
    %32 = arith.addf %29, %31 : vector<2x32xf32>
    %33 = math.tanh %32 : vector<2x32xf32>
    %cst_13 = arith.constant 1.000000e+00 : f32
    %34 = vector.broadcast %cst_13 : f32 to vector<2x32xf32>
    %35 = arith.subf %34, %28 : vector<2x32xf32>
    %36 = arith.mulf %35, %33 : vector<2x32xf32>
    %37 = arith.mulf %28, %8 : vector<2x32xf32>
    %38 = arith.addf %36, %37 : vector<2x32xf32>
    %c0_14 = arith.constant 0 : index
    %c0_15 = arith.constant 0 : index
    %39 = vector.load %arg5[%c0_14, %c0_15] : memref<16x32xf32, #tpu.memory_space<vmem>>, vector<2x32xf32>
    tpu.vector_store %arg5[%c0_14, %c0_15], %38 {strides = array<i32>} : memref<16x32xf32, #tpu.memory_space<vmem>>, vector<2x32xf32>,
    %40 = vector.extract_strided_slice %5 {offsets = [2, 0], sizes = [2, 96], strides = [1, 1]} : vector<16x96xf32> to vector<2x96xf32>
    %cst_16 = arith.constant dense<0.000000e+00> : vector<2x96xf32>
    %41 = tpu.matmul %38, %6, %cst_16 {dimension_numbers = #tpu.dot_dimension_numbers<[1], [0], [0], [1], [0, 0, 1, 1], [], []>} : vector<2x32xf32>, vector<32x96xf32>, vector<2x96xf32> -> vector<2x96xf32>
    %42 = vector.broadcast %7 : vector<1x96xf32> to vector<2x96xf32>
    %43 = arith.addf %41, %42 : vector<2x96xf32>
    %44 = vector.extract_strided_slice %40 {offsets = [0, 0], sizes = [2, 32], strides = [1, 1]} : vector<2x96xf32> to vector<2x32xf32>
    %45 = vector.extract_strided_slice %43 {offsets = [0, 0], sizes = [2, 32], strides = [1, 1]} : vector<2x96xf32> to vector<2x32xf32>
    %46 = arith.addf %44, %45 : vector<2x32xf32>
    %47 = arith.negf %46 : vector<2x32xf32>
    %48 = math.exp %47 : vector<2x32xf32>
    %cst_17 = arith.constant 1.000000e+00 : f32
    %49 = vector.broadcast %cst_17 : f32 to vector<2x32xf32>
    %50 = arith.addf %49, %48 : vector<2x32xf32>
    %51 = arith.divf %49, %50 : vector<2x32xf32>
    %52 = vector.extract_strided_slice %40 {offsets = [0, 32], sizes = [2, 32], strides = [1, 1]} : vector<2x96xf32> to vector<2x32xf32>
    %53 = vector.extract_strided_slice %43 {offsets = [0, 32], sizes = [2, 32], strides = [1, 1]} : vector<2x96xf32> to vector<2x32xf32>
    %54 = arith.addf %52, %53 : vector<2x32xf32>
    %55 = arith.negf %54 : vector<2x32xf32>
    %56 = math.exp %55 : vector<2x32xf32>
    %cst_18 = arith.constant 1.000000e+00 : f32
    %57 = vector.broadcast %cst_18 : f32 to vector<2x32xf32>
    %58 = arith.addf %57, %56 : vector<2x32xf32>
    %59 = arith.divf %57, %58 : vector<2x32xf32>
    %60 = vector.extract_strided_slice %40 {offsets = [0, 64], sizes = [2, 32], strides = [1, 1]} : vector<2x96xf32> to vector<2x32xf32>
    %61 = vector.extract_strided_slice %43 {offsets = [0, 64], sizes = [2, 32], strides = [1, 1]} : vector<2x96xf32> to vector<2x32xf32>
    %62 = arith.mulf %51, %61 : vector<2x32xf32>
    %63 = arith.addf %60, %62 : vector<2x32xf32>
    %64 = math.tanh %63 : vector<2x32xf32>
    %cst_19 = arith.constant 1.000000e+00 : f32
    %65 = vector.broadcast %cst_19 : f32 to vector<2x32xf32>
    %66 = arith.subf %65, %59 : vector<2x32xf32>
    %67 = arith.mulf %66, %64 : vector<2x32xf32>
    %68 = arith.mulf %59, %38 : vector<2x32xf32>
    %69 = arith.addf %67, %68 : vector<2x32xf32>
    %c2 = arith.constant 2 : index
    %c0_20 = arith.constant 0 : index
    %70 = vector.load %arg5[%c2, %c0_20] : memref<16x32xf32, #tpu.memory_space<vmem>>, vector<2x32xf32>
    tpu.vector_store %arg5[%c2, %c0_20], %69 {strides = array<i32>} : memref<16x32xf32, #tpu.memory_space<vmem>>, vector<2x32xf32>,
    %71 = vector.extract_strided_slice %5 {offsets = [4, 0], sizes = [2, 96], strides = [1, 1]} : vector<16x96xf32> to vector<2x96xf32>
    %cst_21 = arith.constant dense<0.000000e+00> : vector<2x96xf32>
    %72 = tpu.matmul %69, %6, %cst_21 {dimension_numbers = #tpu.dot_dimension_numbers<[1], [0], [0], [1], [0, 0, 1, 1], [], []>} : vector<2x32xf32>, vector<32x96xf32>, vector<2x96xf32> -> vector<2x96xf32>
    %73 = vector.broadcast %7 : vector<1x96xf32> to vector<2x96xf32>
    %74 = arith.addf %72, %73 : vector<2x96xf32>
    %75 = vector.extract_strided_slice %71 {offsets = [0, 0], sizes = [2, 32], strides = [1, 1]} : vector<2x96xf32> to vector<2x32xf32>
    %76 = vector.extract_strided_slice %74 {offsets = [0, 0], sizes = [2, 32], strides = [1, 1]} : vector<2x96xf32> to vector<2x32xf32>
    %77 = arith.addf %75, %76 : vector<2x32xf32>
    %78 = arith.negf %77 : vector<2x32xf32>
    %79 = math.exp %78 : vector<2x32xf32>
    %cst_22 = arith.constant 1.000000e+00 : f32
    %80 = vector.broadcast %cst_22 : f32 to vector<2x32xf32>
    %81 = arith.addf %80, %79 : vector<2x32xf32>
    %82 = arith.divf %80, %81 : vector<2x32xf32>
    %83 = vector.extract_strided_slice %71 {offsets = [0, 32], sizes = [2, 32], strides = [1, 1]} : vector<2x96xf32> to vector<2x32xf32>
    %84 = vector.extract_strided_slice %74 {offsets = [0, 32], sizes = [2, 32], strides = [1, 1]} : vector<2x96xf32> to vector<2x32xf32>
    %85 = arith.addf %83, %84 : vector<2x32xf32>
    %86 = arith.negf %85 : vector<2x32xf32>
    %87 = math.exp %86 : vector<2x32xf32>
    %cst_23 = arith.constant 1.000000e+00 : f32
    %88 = vector.broadcast %cst_23 : f32 to vector<2x32xf32>
    %89 = arith.addf %88, %87 : vector<2x32xf32>
    %90 = arith.divf %88, %89 : vector<2x32xf32>
    %91 = vector.extract_strided_slice %71 {offsets = [0, 64], sizes = [2, 32], strides = [1, 1]} : vector<2x96xf32> to vector<2x32xf32>
    %92 = vector.extract_strided_slice %74 {offsets = [0, 64], sizes = [2, 32], strides = [1, 1]} : vector<2x96xf32> to vector<2x32xf32>
    %93 = arith.mulf %82, %92 : vector<2x32xf32>
    %94 = arith.addf %91, %93 : vector<2x32xf32>
    %95 = math.tanh %94 : vector<2x32xf32>
    %cst_24 = arith.constant 1.000000e+00 : f32
    %96 = vector.broadcast %cst_24 : f32 to vector<2x32xf32>
    %97 = arith.subf %96, %90 : vector<2x32xf32>
    %98 = arith.mulf %97, %95 : vector<2x32xf32>
    %99 = arith.mulf %90, %69 : vector<2x32xf32>
    %100 = arith.addf %98, %99 : vector<2x32xf32>
    %c4 = arith.constant 4 : index
    %c0_25 = arith.constant 0 : index
    %101 = vector.load %arg5[%c4, %c0_25] : memref<16x32xf32, #tpu.memory_space<vmem>>, vector<2x32xf32>
    tpu.vector_store %arg5[%c4, %c0_25], %100 {strides = array<i32>} : memref<16x32xf32, #tpu.memory_space<vmem>>, vector<2x32xf32>,
    %102 = vector.extract_strided_slice %5 {offsets = [6, 0], sizes = [2, 96], strides = [1, 1]} : vector<16x96xf32> to vector<2x96xf32>
    %cst_26 = arith.constant dense<0.000000e+00> : vector<2x96xf32>
    %103 = tpu.matmul %100, %6, %cst_26 {dimension_numbers = #tpu.dot_dimension_numbers<[1], [0], [0], [1], [0, 0, 1, 1], [], []>} : vector<2x32xf32>, vector<32x96xf32>, vector<2x96xf32> -> vector<2x96xf32>
    %104 = vector.broadcast %7 : vector<1x96xf32> to vector<2x96xf32>
    %105 = arith.addf %103, %104 : vector<2x96xf32>
    %106 = vector.extract_strided_slice %102 {offsets = [0, 0], sizes = [2, 32], strides = [1, 1]} : vector<2x96xf32> to vector<2x32xf32>
    %107 = vector.extract_strided_slice %105 {offsets = [0, 0], sizes = [2, 32], strides = [1, 1]} : vector<2x96xf32> to vector<2x32xf32>
    %108 = arith.addf %106, %107 : vector<2x32xf32>
    %109 = arith.negf %108 : vector<2x32xf32>
    %110 = math.exp %109 : vector<2x32xf32>
    %cst_27 = arith.constant 1.000000e+00 : f32
    %111 = vector.broadcast %cst_27 : f32 to vector<2x32xf32>
    %112 = arith.addf %111, %110 : vector<2x32xf32>
    %113 = arith.divf %111, %112 : vector<2x32xf32>
    %114 = vector.extract_strided_slice %102 {offsets = [0, 32], sizes = [2, 32], strides = [1, 1]} : vector<2x96xf32> to vector<2x32xf32>
    %115 = vector.extract_strided_slice %105 {offsets = [0, 32], sizes = [2, 32], strides = [1, 1]} : vector<2x96xf32> to vector<2x32xf32>
    %116 = arith.addf %114, %115 : vector<2x32xf32>
    %117 = arith.negf %116 : vector<2x32xf32>
    %118 = math.exp %117 : vector<2x32xf32>
    %cst_28 = arith.constant 1.000000e+00 : f32
    %119 = vector.broadcast %cst_28 : f32 to vector<2x32xf32>
    %120 = arith.addf %119, %118 : vector<2x32xf32>
    %121 = arith.divf %119, %120 : vector<2x32xf32>
    %122 = vector.extract_strided_slice %102 {offsets = [0, 64], sizes = [2, 32], strides = [1, 1]} : vector<2x96xf32> to vector<2x32xf32>
    %123 = vector.extract_strided_slice %105 {offsets = [0, 64], sizes = [2, 32], strides = [1, 1]} : vector<2x96xf32> to vector<2x32xf32>
    %124 = arith.mulf %113, %123 : vector<2x32xf32>
    %125 = arith.addf %122, %124 : vector<2x32xf32>
    %126 = math.tanh %125 : vector<2x32xf32>
    %cst_29 = arith.constant 1.000000e+00 : f32
    %127 = vector.broadcast %cst_29 : f32 to vector<2x32xf32>
    %128 = arith.subf %127, %121 : vector<2x32xf32>
    %129 = arith.mulf %128, %126 : vector<2x32xf32>
    %130 = arith.mulf %121, %100 : vector<2x32xf32>
    %131 = arith.addf %129, %130 : vector<2x32xf32>
    %c6 = arith.constant 6 : index
    %c0_30 = arith.constant 0 : index
    %132 = vector.load %arg5[%c6, %c0_30] : memref<16x32xf32, #tpu.memory_space<vmem>>, vector<2x32xf32>
    tpu.vector_store %arg5[%c6, %c0_30], %131 {strides = array<i32>} : memref<16x32xf32, #tpu.memory_space<vmem>>, vector<2x32xf32>,
    %133 = vector.extract_strided_slice %5 {offsets = [8, 0], sizes = [2, 96], strides = [1, 1]} : vector<16x96xf32> to vector<2x96xf32>
    %cst_31 = arith.constant dense<0.000000e+00> : vector<2x96xf32>
    %134 = tpu.matmul %131, %6, %cst_31 {dimension_numbers = #tpu.dot_dimension_numbers<[1], [0], [0], [1], [0, 0, 1, 1], [], []>} : vector<2x32xf32>, vector<32x96xf32>, vector<2x96xf32> -> vector<2x96xf32>
    %135 = vector.broadcast %7 : vector<1x96xf32> to vector<2x96xf32>
    %136 = arith.addf %134, %135 : vector<2x96xf32>
    %137 = vector.extract_strided_slice %133 {offsets = [0, 0], sizes = [2, 32], strides = [1, 1]} : vector<2x96xf32> to vector<2x32xf32>
    %138 = vector.extract_strided_slice %136 {offsets = [0, 0], sizes = [2, 32], strides = [1, 1]} : vector<2x96xf32> to vector<2x32xf32>
    %139 = arith.addf %137, %138 : vector<2x32xf32>
    %140 = arith.negf %139 : vector<2x32xf32>
    %141 = math.exp %140 : vector<2x32xf32>
    %cst_32 = arith.constant 1.000000e+00 : f32
    %142 = vector.broadcast %cst_32 : f32 to vector<2x32xf32>
    %143 = arith.addf %142, %141 : vector<2x32xf32>
    %144 = arith.divf %142, %143 : vector<2x32xf32>
    %145 = vector.extract_strided_slice %133 {offsets = [0, 32], sizes = [2, 32], strides = [1, 1]} : vector<2x96xf32> to vector<2x32xf32>
    %146 = vector.extract_strided_slice %136 {offsets = [0, 32], sizes = [2, 32], strides = [1, 1]} : vector<2x96xf32> to vector<2x32xf32>
    %147 = arith.addf %145, %146 : vector<2x32xf32>
    %148 = arith.negf %147 : vector<2x32xf32>
    %149 = math.exp %148 : vector<2x32xf32>
    %cst_33 = arith.constant 1.000000e+00 : f32
    %150 = vector.broadcast %cst_33 : f32 to vector<2x32xf32>
    %151 = arith.addf %150, %149 : vector<2x32xf32>
    %152 = arith.divf %150, %151 : vector<2x32xf32>
    %153 = vector.extract_strided_slice %133 {offsets = [0, 64], sizes = [2, 32], strides = [1, 1]} : vector<2x96xf32> to vector<2x32xf32>
    %154 = vector.extract_strided_slice %136 {offsets = [0, 64], sizes = [2, 32], strides = [1, 1]} : vector<2x96xf32> to vector<2x32xf32>
    %155 = arith.mulf %144, %154 : vector<2x32xf32>
    %156 = arith.addf %153, %155 : vector<2x32xf32>
    %157 = math.tanh %156 : vector<2x32xf32>
    %cst_34 = arith.constant 1.000000e+00 : f32
    %158 = vector.broadcast %cst_34 : f32 to vector<2x32xf32>
    %159 = arith.subf %158, %152 : vector<2x32xf32>
    %160 = arith.mulf %159, %157 : vector<2x32xf32>
    %161 = arith.mulf %152, %131 : vector<2x32xf32>
    %162 = arith.addf %160, %161 : vector<2x32xf32>
    %c8 = arith.constant 8 : index
    %c0_35 = arith.constant 0 : index
    %163 = vector.load %arg5[%c8, %c0_35] : memref<16x32xf32, #tpu.memory_space<vmem>>, vector<2x32xf32>
    tpu.vector_store %arg5[%c8, %c0_35], %162 {strides = array<i32>} : memref<16x32xf32, #tpu.memory_space<vmem>>, vector<2x32xf32>,
    %164 = vector.extract_strided_slice %5 {offsets = [10, 0], sizes = [2, 96], strides = [1, 1]} : vector<16x96xf32> to vector<2x96xf32>
    %cst_36 = arith.constant dense<0.000000e+00> : vector<2x96xf32>
    %165 = tpu.matmul %162, %6, %cst_36 {dimension_numbers = #tpu.dot_dimension_numbers<[1], [0], [0], [1], [0, 0, 1, 1], [], []>} : vector<2x32xf32>, vector<32x96xf32>, vector<2x96xf32> -> vector<2x96xf32>
    %166 = vector.broadcast %7 : vector<1x96xf32> to vector<2x96xf32>
    %167 = arith.addf %165, %166 : vector<2x96xf32>
    %168 = vector.extract_strided_slice %164 {offsets = [0, 0], sizes = [2, 32], strides = [1, 1]} : vector<2x96xf32> to vector<2x32xf32>
    %169 = vector.extract_strided_slice %167 {offsets = [0, 0], sizes = [2, 32], strides = [1, 1]} : vector<2x96xf32> to vector<2x32xf32>
    %170 = arith.addf %168, %169 : vector<2x32xf32>
    %171 = arith.negf %170 : vector<2x32xf32>
    %172 = math.exp %171 : vector<2x32xf32>
    %cst_37 = arith.constant 1.000000e+00 : f32
    %173 = vector.broadcast %cst_37 : f32 to vector<2x32xf32>
    %174 = arith.addf %173, %172 : vector<2x32xf32>
    %175 = arith.divf %173, %174 : vector<2x32xf32>
    %176 = vector.extract_strided_slice %164 {offsets = [0, 32], sizes = [2, 32], strides = [1, 1]} : vector<2x96xf32> to vector<2x32xf32>
    %177 = vector.extract_strided_slice %167 {offsets = [0, 32], sizes = [2, 32], strides = [1, 1]} : vector<2x96xf32> to vector<2x32xf32>
    %178 = arith.addf %176, %177 : vector<2x32xf32>
    %179 = arith.negf %178 : vector<2x32xf32>
    %180 = math.exp %179 : vector<2x32xf32>
    %cst_38 = arith.constant 1.000000e+00 : f32
    %181 = vector.broadcast %cst_38 : f32 to vector<2x32xf32>
    %182 = arith.addf %181, %180 : vector<2x32xf32>
    %183 = arith.divf %181, %182 : vector<2x32xf32>
    %184 = vector.extract_strided_slice %164 {offsets = [0, 64], sizes = [2, 32], strides = [1, 1]} : vector<2x96xf32> to vector<2x32xf32>
    %185 = vector.extract_strided_slice %167 {offsets = [0, 64], sizes = [2, 32], strides = [1, 1]} : vector<2x96xf32> to vector<2x32xf32>
    %186 = arith.mulf %175, %185 : vector<2x32xf32>
    %187 = arith.addf %184, %186 : vector<2x32xf32>
    %188 = math.tanh %187 : vector<2x32xf32>
    %cst_39 = arith.constant 1.000000e+00 : f32
    %189 = vector.broadcast %cst_39 : f32 to vector<2x32xf32>
    %190 = arith.subf %189, %183 : vector<2x32xf32>
    %191 = arith.mulf %190, %188 : vector<2x32xf32>
    %192 = arith.mulf %183, %162 : vector<2x32xf32>
    %193 = arith.addf %191, %192 : vector<2x32xf32>
    %c10 = arith.constant 10 : index
    %c0_40 = arith.constant 0 : index
    %194 = vector.load %arg5[%c10, %c0_40] : memref<16x32xf32, #tpu.memory_space<vmem>>, vector<2x32xf32>
    tpu.vector_store %arg5[%c10, %c0_40], %193 {strides = array<i32>} : memref<16x32xf32, #tpu.memory_space<vmem>>, vector<2x32xf32>,
    %195 = vector.extract_strided_slice %5 {offsets = [12, 0], sizes = [2, 96], strides = [1, 1]} : vector<16x96xf32> to vector<2x96xf32>
    %cst_41 = arith.constant dense<0.000000e+00> : vector<2x96xf32>
    %196 = tpu.matmul %193, %6, %cst_41 {dimension_numbers = #tpu.dot_dimension_numbers<[1], [0], [0], [1], [0, 0, 1, 1], [], []>} : vector<2x32xf32>, vector<32x96xf32>, vector<2x96xf32> -> vector<2x96xf32>
    %197 = vector.broadcast %7 : vector<1x96xf32> to vector<2x96xf32>
    %198 = arith.addf %196, %197 : vector<2x96xf32>
    %199 = vector.extract_strided_slice %195 {offsets = [0, 0], sizes = [2, 32], strides = [1, 1]} : vector<2x96xf32> to vector<2x32xf32>
    %200 = vector.extract_strided_slice %198 {offsets = [0, 0], sizes = [2, 32], strides = [1, 1]} : vector<2x96xf32> to vector<2x32xf32>
    %201 = arith.addf %199, %200 : vector<2x32xf32>
    %202 = arith.negf %201 : vector<2x32xf32>
    %203 = math.exp %202 : vector<2x32xf32>
    %cst_42 = arith.constant 1.000000e+00 : f32
    %204 = vector.broadcast %cst_42 : f32 to vector<2x32xf32>
    %205 = arith.addf %204, %203 : vector<2x32xf32>
    %206 = arith.divf %204, %205 : vector<2x32xf32>
    %207 = vector.extract_strided_slice %195 {offsets = [0, 32], sizes = [2, 32], strides = [1, 1]} : vector<2x96xf32> to vector<2x32xf32>
    %208 = vector.extract_strided_slice %198 {offsets = [0, 32], sizes = [2, 32], strides = [1, 1]} : vector<2x96xf32> to vector<2x32xf32>
    %209 = arith.addf %207, %208 : vector<2x32xf32>
    %210 = arith.negf %209 : vector<2x32xf32>
    %211 = math.exp %210 : vector<2x32xf32>
    %cst_43 = arith.constant 1.000000e+00 : f32
    %212 = vector.broadcast %cst_43 : f32 to vector<2x32xf32>
    %213 = arith.addf %212, %211 : vector<2x32xf32>
    %214 = arith.divf %212, %213 : vector<2x32xf32>
    %215 = vector.extract_strided_slice %195 {offsets = [0, 64], sizes = [2, 32], strides = [1, 1]} : vector<2x96xf32> to vector<2x32xf32>
    %216 = vector.extract_strided_slice %198 {offsets = [0, 64], sizes = [2, 32], strides = [1, 1]} : vector<2x96xf32> to vector<2x32xf32>
    %217 = arith.mulf %206, %216 : vector<2x32xf32>
    %218 = arith.addf %215, %217 : vector<2x32xf32>
    %219 = math.tanh %218 : vector<2x32xf32>
    %cst_44 = arith.constant 1.000000e+00 : f32
    %220 = vector.broadcast %cst_44 : f32 to vector<2x32xf32>
    %221 = arith.subf %220, %214 : vector<2x32xf32>
    %222 = arith.mulf %221, %219 : vector<2x32xf32>
    %223 = arith.mulf %214, %193 : vector<2x32xf32>
    %224 = arith.addf %222, %223 : vector<2x32xf32>
    %c12 = arith.constant 12 : index
    %c0_45 = arith.constant 0 : index
    %225 = vector.load %arg5[%c12, %c0_45] : memref<16x32xf32, #tpu.memory_space<vmem>>, vector<2x32xf32>
    tpu.vector_store %arg5[%c12, %c0_45], %224 {strides = array<i32>} : memref<16x32xf32, #tpu.memory_space<vmem>>, vector<2x32xf32>,
    %226 = vector.extract_strided_slice %5 {offsets = [14, 0], sizes = [2, 96], strides = [1, 1]} : vector<16x96xf32> to vector<2x96xf32>
    %cst_46 = arith.constant dense<0.000000e+00> : vector<2x96xf32>
    %227 = tpu.matmul %224, %6, %cst_46 {dimension_numbers = #tpu.dot_dimension_numbers<[1], [0], [0], [1], [0, 0, 1, 1], [], []>} : vector<2x32xf32>, vector<32x96xf32>, vector<2x96xf32> -> vector<2x96xf32>
    %228 = vector.broadcast %7 : vector<1x96xf32> to vector<2x96xf32>
    %229 = arith.addf %227, %228 : vector<2x96xf32>
    %230 = vector.extract_strided_slice %226 {offsets = [0, 0], sizes = [2, 32], strides = [1, 1]} : vector<2x96xf32> to vector<2x32xf32>
    %231 = vector.extract_strided_slice %229 {offsets = [0, 0], sizes = [2, 32], strides = [1, 1]} : vector<2x96xf32> to vector<2x32xf32>
    %232 = arith.addf %230, %231 : vector<2x32xf32>
    %233 = arith.negf %232 : vector<2x32xf32>
    %234 = math.exp %233 : vector<2x32xf32>
    %cst_47 = arith.constant 1.000000e+00 : f32
    %235 = vector.broadcast %cst_47 : f32 to vector<2x32xf32>
    %236 = arith.addf %235, %234 : vector<2x32xf32>
    %237 = arith.divf %235, %236 : vector<2x32xf32>
    %238 = vector.extract_strided_slice %226 {offsets = [0, 32], sizes = [2, 32], strides = [1, 1]} : vector<2x96xf32> to vector<2x32xf32>
    %239 = vector.extract_strided_slice %229 {offsets = [0, 32], sizes = [2, 32], strides = [1, 1]} : vector<2x96xf32> to vector<2x32xf32>
    %240 = arith.addf %238, %239 : vector<2x32xf32>
    %241 = arith.negf %240 : vector<2x32xf32>
    %242 = math.exp %241 : vector<2x32xf32>
    %cst_48 = arith.constant 1.000000e+00 : f32
    %243 = vector.broadcast %cst_48 : f32 to vector<2x32xf32>
    %244 = arith.addf %243, %242 : vector<2x32xf32>
    %245 = arith.divf %243, %244 : vector<2x32xf32>
    %246 = vector.extract_strided_slice %226 {offsets = [0, 64], sizes = [2, 32], strides = [1, 1]} : vector<2x96xf32> to vector<2x32xf32>
    %247 = vector.extract_strided_slice %229 {offsets = [0, 64], sizes = [2, 32], strides = [1, 1]} : vector<2x96xf32> to vector<2x32xf32>
    %248 = arith.mulf %237, %247 : vector<2x32xf32>
    %249 = arith.addf %246, %248 : vector<2x32xf32>
    %250 = math.tanh %249 : vector<2x32xf32>
    %cst_49 = arith.constant 1.000000e+00 : f32
    %251 = vector.broadcast %cst_49 : f32 to vector<2x32xf32>
    %252 = arith.subf %251, %245 : vector<2x32xf32>
    %253 = arith.mulf %252, %250 : vector<2x32xf32>
    %254 = arith.mulf %245, %224 : vector<2x32xf32>
    %255 = arith.addf %253, %254 : vector<2x32xf32>
    %c14 = arith.constant 14 : index
    %c0_50 = arith.constant 0 : index
    %256 = vector.load %arg5[%c14, %c0_50] : memref<16x32xf32, #tpu.memory_space<vmem>>, vector<2x32xf32>
    tpu.vector_store %arg5[%c14, %c0_50], %255 {strides = array<i32>} : memref<16x32xf32, #tpu.memory_space<vmem>>, vector<2x32xf32>,
    return
  }
}

module attributes {stable_mosaic.version = 11 : i64} {
  func.func @_mlp3_proj_scale_kernel(%arg0: memref<16x38xf32, #tpu.memory_space<vmem>>, %arg1: memref<38x32xf32, #tpu.memory_space<vmem>>, %arg2: memref<1x32xf32, #tpu.memory_space<vmem>>, %arg3: memref<1x32xf32, #tpu.memory_space<vmem>>, %arg4: memref<1x32xf32, #tpu.memory_space<vmem>>, %arg5: memref<32x32xf32, #tpu.memory_space<vmem>>, %arg6: memref<1x32xf32, #tpu.memory_space<vmem>>, %arg7: memref<1x32xf32, #tpu.memory_space<vmem>>, %arg8: memref<1x32xf32, #tpu.memory_space<vmem>>, %arg9: memref<32x32xf32, #tpu.memory_space<vmem>>, %arg10: memref<1x32xf32, #tpu.memory_space<vmem>>, %arg11: memref<1x32xf32, #tpu.memory_space<vmem>>, %arg12: memref<1x32xf32, #tpu.memory_space<vmem>>, %arg13: memref<32x25xf32, #tpu.memory_space<vmem>>, %arg14: memref<1x25xf32, #tpu.memory_space<vmem>>, %arg15: memref<16x25xf32, #tpu.memory_space<vmem>>) attributes {dimension_semantics = [], scalar_prefetch = 0 : i64, scratch_operands = 0 : i64, tpu.core_type = #tpu.core_type<tc>} {
    %c0 = arith.constant 0 : index
    %c0_0 = arith.constant 0 : index
    %0 = vector.load %arg0[%c0, %c0_0] : memref<16x38xf32, #tpu.memory_space<vmem>>, vector<16x38xf32>
    %c0_1 = arith.constant 0 : index
    %c0_2 = arith.constant 0 : index
    %1 = vector.load %arg1[%c0_1, %c0_2] : memref<38x32xf32, #tpu.memory_space<vmem>>, vector<38x32xf32>
    %c0_3 = arith.constant 0 : index
    %c0_4 = arith.constant 0 : index
    %2 = vector.load %arg2[%c0_3, %c0_4] : memref<1x32xf32, #tpu.memory_space<vmem>>, vector<1x32xf32>
    %c0_5 = arith.constant 0 : index
    %c0_6 = arith.constant 0 : index
    %3 = vector.load %arg3[%c0_5, %c0_6] : memref<1x32xf32, #tpu.memory_space<vmem>>, vector<1x32xf32>
    %c0_7 = arith.constant 0 : index
    %c0_8 = arith.constant 0 : index
    %4 = vector.load %arg4[%c0_7, %c0_8] : memref<1x32xf32, #tpu.memory_space<vmem>>, vector<1x32xf32>
    %cst = arith.constant dense<0.000000e+00> : vector<16x32xf32>
    %5 = tpu.matmul %0, %1, %cst {dimension_numbers = #tpu.dot_dimension_numbers<[1], [0], [0], [1], [0, 0, 1, 1], [], []>} : vector<16x38xf32>, vector<38x32xf32>, vector<16x32xf32> -> vector<16x32xf32>
    %6 = vector.broadcast %2 : vector<1x32xf32> to vector<16x32xf32>
    %7 = arith.addf %5, %6 : vector<16x32xf32>
    %cst_9 = arith.constant dense<0.000000e+00> : vector<16xf32>
    %8 = vector.multi_reduction <add>, %7, %cst_9 [1] : vector<16x32xf32> to vector<16xf32>
    %9 = vector.shape_cast %8 : vector<16xf32> to vector<16x1xf32>
    %cst_10 = arith.constant 3.200000e+01 : f32
    %10 = vector.broadcast %cst_10 : f32 to vector<16x1xf32>
    %11 = arith.divf %9, %10 : vector<16x1xf32>
    %12 = vector.broadcast %11 : vector<16x1xf32> to vector<16x32xf32>
    %13 = arith.subf %7, %12 : vector<16x32xf32>
    %14 = arith.mulf %13, %13 : vector<16x32xf32>
    %cst_11 = arith.constant dense<0.000000e+00> : vector<16xf32>
    %15 = vector.multi_reduction <add>, %14, %cst_11 [1] : vector<16x32xf32> to vector<16xf32>
    %16 = vector.shape_cast %15 : vector<16xf32> to vector<16x1xf32>
    %cst_12 = arith.constant 3.200000e+01 : f32
    %17 = vector.broadcast %cst_12 : f32 to vector<16x1xf32>
    %18 = arith.divf %16, %17 : vector<16x1xf32>
    %19 = vector.broadcast %11 : vector<16x1xf32> to vector<16x32xf32>
    %20 = arith.subf %7, %19 : vector<16x32xf32>
    %cst_13 = arith.constant 9.99999974E-6 : f32
    %21 = vector.broadcast %cst_13 : f32 to vector<16x1xf32>
    %22 = arith.addf %18, %21 : vector<16x1xf32>
    %23 = math.rsqrt %22 : vector<16x1xf32>
    %24 = vector.broadcast %23 : vector<16x1xf32> to vector<16x32xf32>
    %25 = arith.mulf %20, %24 : vector<16x32xf32>
    %26 = vector.broadcast %3 : vector<1x32xf32> to vector<16x32xf32>
    %27 = arith.mulf %25, %26 : vector<16x32xf32>
    %28 = vector.broadcast %4 : vector<1x32xf32> to vector<16x32xf32>
    %29 = arith.addf %27, %28 : vector<16x32xf32>
    %cst_14 = arith.constant 0.000000e+00 : f32
    %30 = vector.broadcast %cst_14 : f32 to vector<16x32xf32>
    %31 = arith.cmpf oge, %29, %30 : vector<16x32xf32>
    %cst_15 = arith.constant 0.00999999977 : f32
    %32 = vector.broadcast %cst_15 : f32 to vector<16x32xf32>
    %33 = arith.mulf %32, %29 : vector<16x32xf32>
    %34 = arith.select %31, %29, %33 : vector<16x32xi1>, vector<16x32xf32>
    %c0_16 = arith.constant 0 : index
    %c0_17 = arith.constant 0 : index
    %35 = vector.load %arg5[%c0_16, %c0_17] : memref<32x32xf32, #tpu.memory_space<vmem>>, vector<32x32xf32>
    %c0_18 = arith.constant 0 : index
    %c0_19 = arith.constant 0 : index
    %36 = vector.load %arg6[%c0_18, %c0_19] : memref<1x32xf32, #tpu.memory_space<vmem>>, vector<1x32xf32>
    %c0_20 = arith.constant 0 : index
    %c0_21 = arith.constant 0 : index
    %37 = vector.load %arg7[%c0_20, %c0_21] : memref<1x32xf32, #tpu.memory_space<vmem>>, vector<1x32xf32>
    %c0_22 = arith.constant 0 : index
    %c0_23 = arith.constant 0 : index
    %38 = vector.load %arg8[%c0_22, %c0_23] : memref<1x32xf32, #tpu.memory_space<vmem>>, vector<1x32xf32>
    %cst_24 = arith.constant dense<0.000000e+00> : vector<16x32xf32>
    %39 = tpu.matmul %34, %35, %cst_24 {dimension_numbers = #tpu.dot_dimension_numbers<[1], [0], [0], [1], [0, 0, 1, 1], [], []>} : vector<16x32xf32>, vector<32x32xf32>, vector<16x32xf32> -> vector<16x32xf32>
    %40 = vector.broadcast %36 : vector<1x32xf32> to vector<16x32xf32>
    %41 = arith.addf %39, %40 : vector<16x32xf32>
    %cst_25 = arith.constant dense<0.000000e+00> : vector<16xf32>
    %42 = vector.multi_reduction <add>, %41, %cst_25 [1] : vector<16x32xf32> to vector<16xf32>
    %43 = vector.shape_cast %42 : vector<16xf32> to vector<16x1xf32>
    %cst_26 = arith.constant 3.200000e+01 : f32
    %44 = vector.broadcast %cst_26 : f32 to vector<16x1xf32>
    %45 = arith.divf %43, %44 : vector<16x1xf32>
    %46 = vector.broadcast %45 : vector<16x1xf32> to vector<16x32xf32>
    %47 = arith.subf %41, %46 : vector<16x32xf32>
    %48 = arith.mulf %47, %47 : vector<16x32xf32>
    %cst_27 = arith.constant dense<0.000000e+00> : vector<16xf32>
    %49 = vector.multi_reduction <add>, %48, %cst_27 [1] : vector<16x32xf32> to vector<16xf32>
    %50 = vector.shape_cast %49 : vector<16xf32> to vector<16x1xf32>
    %cst_28 = arith.constant 3.200000e+01 : f32
    %51 = vector.broadcast %cst_28 : f32 to vector<16x1xf32>
    %52 = arith.divf %50, %51 : vector<16x1xf32>
    %53 = vector.broadcast %45 : vector<16x1xf32> to vector<16x32xf32>
    %54 = arith.subf %41, %53 : vector<16x32xf32>
    %cst_29 = arith.constant 9.99999974E-6 : f32
    %55 = vector.broadcast %cst_29 : f32 to vector<16x1xf32>
    %56 = arith.addf %52, %55 : vector<16x1xf32>
    %57 = math.rsqrt %56 : vector<16x1xf32>
    %58 = vector.broadcast %57 : vector<16x1xf32> to vector<16x32xf32>
    %59 = arith.mulf %54, %58 : vector<16x32xf32>
    %60 = vector.broadcast %37 : vector<1x32xf32> to vector<16x32xf32>
    %61 = arith.mulf %59, %60 : vector<16x32xf32>
    %62 = vector.broadcast %38 : vector<1x32xf32> to vector<16x32xf32>
    %63 = arith.addf %61, %62 : vector<16x32xf32>
    %cst_30 = arith.constant 0.000000e+00 : f32
    %64 = vector.broadcast %cst_30 : f32 to vector<16x32xf32>
    %65 = arith.cmpf oge, %63, %64 : vector<16x32xf32>
    %cst_31 = arith.constant 0.00999999977 : f32
    %66 = vector.broadcast %cst_31 : f32 to vector<16x32xf32>
    %67 = arith.mulf %66, %63 : vector<16x32xf32>
    %68 = arith.select %65, %63, %67 : vector<16x32xi1>, vector<16x32xf32>
    %c0_32 = arith.constant 0 : index
    %c0_33 = arith.constant 0 : index
    %69 = vector.load %arg9[%c0_32, %c0_33] : memref<32x32xf32, #tpu.memory_space<vmem>>, vector<32x32xf32>
    %c0_34 = arith.constant 0 : index
    %c0_35 = arith.constant 0 : index
    %70 = vector.load %arg10[%c0_34, %c0_35] : memref<1x32xf32, #tpu.memory_space<vmem>>, vector<1x32xf32>
    %c0_36 = arith.constant 0 : index
    %c0_37 = arith.constant 0 : index
    %71 = vector.load %arg11[%c0_36, %c0_37] : memref<1x32xf32, #tpu.memory_space<vmem>>, vector<1x32xf32>
    %c0_38 = arith.constant 0 : index
    %c0_39 = arith.constant 0 : index
    %72 = vector.load %arg12[%c0_38, %c0_39] : memref<1x32xf32, #tpu.memory_space<vmem>>, vector<1x32xf32>
    %cst_40 = arith.constant dense<0.000000e+00> : vector<16x32xf32>
    %73 = tpu.matmul %68, %69, %cst_40 {dimension_numbers = #tpu.dot_dimension_numbers<[1], [0], [0], [1], [0, 0, 1, 1], [], []>} : vector<16x32xf32>, vector<32x32xf32>, vector<16x32xf32> -> vector<16x32xf32>
    %74 = vector.broadcast %70 : vector<1x32xf32> to vector<16x32xf32>
    %75 = arith.addf %73, %74 : vector<16x32xf32>
    %cst_41 = arith.constant dense<0.000000e+00> : vector<16xf32>
    %76 = vector.multi_reduction <add>, %75, %cst_41 [1] : vector<16x32xf32> to vector<16xf32>
    %77 = vector.shape_cast %76 : vector<16xf32> to vector<16x1xf32>
    %cst_42 = arith.constant 3.200000e+01 : f32
    %78 = vector.broadcast %cst_42 : f32 to vector<16x1xf32>
    %79 = arith.divf %77, %78 : vector<16x1xf32>
    %80 = vector.broadcast %79 : vector<16x1xf32> to vector<16x32xf32>
    %81 = arith.subf %75, %80 : vector<16x32xf32>
    %82 = arith.mulf %81, %81 : vector<16x32xf32>
    %cst_43 = arith.constant dense<0.000000e+00> : vector<16xf32>
    %83 = vector.multi_reduction <add>, %82, %cst_43 [1] : vector<16x32xf32> to vector<16xf32>
    %84 = vector.shape_cast %83 : vector<16xf32> to vector<16x1xf32>
    %cst_44 = arith.constant 3.200000e+01 : f32
    %85 = vector.broadcast %cst_44 : f32 to vector<16x1xf32>
    %86 = arith.divf %84, %85 : vector<16x1xf32>
    %87 = vector.broadcast %79 : vector<16x1xf32> to vector<16x32xf32>
    %88 = arith.subf %75, %87 : vector<16x32xf32>
    %cst_45 = arith.constant 9.99999974E-6 : f32
    %89 = vector.broadcast %cst_45 : f32 to vector<16x1xf32>
    %90 = arith.addf %86, %89 : vector<16x1xf32>
    %91 = math.rsqrt %90 : vector<16x1xf32>
    %92 = vector.broadcast %91 : vector<16x1xf32> to vector<16x32xf32>
    %93 = arith.mulf %88, %92 : vector<16x32xf32>
    %94 = vector.broadcast %71 : vector<1x32xf32> to vector<16x32xf32>
    %95 = arith.mulf %93, %94 : vector<16x32xf32>
    %96 = vector.broadcast %72 : vector<1x32xf32> to vector<16x32xf32>
    %97 = arith.addf %95, %96 : vector<16x32xf32>
    %cst_46 = arith.constant 0.000000e+00 : f32
    %98 = vector.broadcast %cst_46 : f32 to vector<16x32xf32>
    %99 = arith.cmpf oge, %97, %98 : vector<16x32xf32>
    %cst_47 = arith.constant 0.00999999977 : f32
    %100 = vector.broadcast %cst_47 : f32 to vector<16x32xf32>
    %101 = arith.mulf %100, %97 : vector<16x32xf32>
    %102 = arith.select %99, %97, %101 : vector<16x32xi1>, vector<16x32xf32>
    %c0_48 = arith.constant 0 : index
    %c0_49 = arith.constant 0 : index
    %103 = vector.load %arg13[%c0_48, %c0_49] : memref<32x25xf32, #tpu.memory_space<vmem>>, vector<32x25xf32>
    %cst_50 = arith.constant dense<0.000000e+00> : vector<16x25xf32>
    %104 = tpu.matmul %102, %103, %cst_50 {dimension_numbers = #tpu.dot_dimension_numbers<[1], [0], [0], [1], [0, 0, 1, 1], [], []>} : vector<16x32xf32>, vector<32x25xf32>, vector<16x25xf32> -> vector<16x25xf32>
    %c0_51 = arith.constant 0 : index
    %c0_52 = arith.constant 0 : index
    %105 = vector.load %arg14[%c0_51, %c0_52] : memref<1x25xf32, #tpu.memory_space<vmem>>, vector<1x25xf32>
    %106 = vector.broadcast %105 : vector<1x25xf32> to vector<16x25xf32>
    %107 = arith.addf %104, %106 : vector<16x25xf32>
    %108 = tpu.iota {dimensions = array<i32: 1>} : vector<16x25xi32>
    %c17_i32 = arith.constant 17 : i32
    %109 = vector.broadcast %c17_i32 : i32 to vector<16x25xi32>
    %110 = arith.cmpi slt, %108, %109 : vector<16x25xi32>
    %cst_53 = arith.constant 0.000000e+00 : f32
    %cst_54 = arith.constant 5.000000e+00 : f32
    %111 = vector.broadcast %cst_53 : f32 to vector<16x25xf32>
    %112 = vector.broadcast %cst_54 : f32 to vector<16x25xf32>
    %113 = arith.select %110, %111, %112 : vector<16x25xi1>, vector<16x25xf32>
    %114 = arith.subf %107, %113 : vector<16x25xf32>
    %115 = arith.negf %114 : vector<16x25xf32>
    %116 = math.exp %115 : vector<16x25xf32>
    %cst_55 = arith.constant 1.000000e+00 : f32
    %117 = vector.broadcast %cst_55 : f32 to vector<16x25xf32>
    %118 = arith.addf %117, %116 : vector<16x25xf32>
    %119 = arith.divf %117, %118 : vector<16x25xf32>
    %cst_56 = arith.constant 2.30258512 : f32
    %120 = vector.broadcast %cst_56 : f32 to vector<16x25xf32>
    %121 = math.powf %119, %120 : vector<16x25xf32>
    %cst_57 = arith.constant 2.000000e+00 : f32
    %122 = vector.broadcast %cst_57 : f32 to vector<16x25xf32>
    %123 = arith.mulf %122, %121 : vector<16x25xf32>
    %cst_58 = arith.constant 1.000000e-07 : f32
    %124 = vector.broadcast %cst_58 : f32 to vector<16x25xf32>
    %125 = arith.addf %123, %124 : vector<16x25xf32>
    %c0_59 = arith.constant 0 : index
    %c0_60 = arith.constant 0 : index
    %126 = vector.load %arg15[%c0_59, %c0_60] : memref<16x25xf32, #tpu.memory_space<vmem>>, vector<16x25xf32>
    tpu.vector_store %arg15[%c0_59, %c0_60], %125 {strides = array<i32>} : memref<16x25xf32, #tpu.memory_space<vmem>>, vector<16x25xf32>,
    return
  }
}

module attributes {stable_mosaic.version = 11 : i64} {
  func.func @_harm_kernel(%arg0: memref<2x1x128xf32, #tpu.memory_space<vmem>>, %arg1: memref<2x16x128xf32, #tpu.memory_space<vmem>>, %arg2: memref<1x16x1xf32, #tpu.memory_space<vmem>>, %arg3: memref<2x128xf32, #tpu.memory_space<vmem>>) attributes {dimension_semantics = [], scalar_prefetch = 0 : i64, scratch_operands = 0 : i64, tpu.core_type = #tpu.core_type<tc>} {
    %c0 = arith.constant 0 : index
    %c0_0 = arith.constant 0 : index
    %c0_1 = arith.constant 0 : index
    %0 = vector.load %arg0[%c0, %c0_0, %c0_1] : memref<2x1x128xf32, #tpu.memory_space<vmem>>, vector<2x1x128xf32>
    %c0_2 = arith.constant 0 : index
    %c0_3 = arith.constant 0 : index
    %c0_4 = arith.constant 0 : index
    %1 = vector.load %arg1[%c0_2, %c0_3, %c0_4] : memref<2x16x128xf32, #tpu.memory_space<vmem>>, vector<2x16x128xf32>
    %c0_5 = arith.constant 0 : index
    %c0_6 = arith.constant 0 : index
    %c0_7 = arith.constant 0 : index
    %2 = vector.load %arg2[%c0_5, %c0_6, %c0_7] : memref<1x16x1xf32, #tpu.memory_space<vmem>>, vector<1x16x1xf32>
    %3 = vector.broadcast %0 : vector<2x1x128xf32> to vector<2x16x128xf32>
    %4 = vector.broadcast %2 : vector<1x16x1xf32> to vector<2x16x128xf32>
    %5 = arith.mulf %3, %4 : vector<2x16x128xf32>
    %6 = math.sin %5 : vector<2x16x128xf32>
    %7 = arith.mulf %6, %1 : vector<2x16x128xf32>
    %cst = arith.constant dense<0.000000e+00> : vector<2x128xf32>
    %8 = vector.multi_reduction <add>, %7, %cst [1] : vector<2x16x128xf32> to vector<2x128xf32>
    %c0_8 = arith.constant 0 : index
    %c0_9 = arith.constant 0 : index
    %9 = vector.load %arg3[%c0_8, %c0_9] : memref<2x128xf32, #tpu.memory_space<vmem>>, vector<2x128xf32>
    tpu.vector_store %arg3[%c0_8, %c0_9], %8 {strides = array<i32>} : memref<2x128xf32, #tpu.memory_space<vmem>>, vector<2x128xf32>,
    return
  }
}

</mosaic_0001>

<bundles_post_ra>
// kernel: reverse.3
= control target key start
LH: loop header
LB: loop body
LE: loop exit
PB: predicated region body
PF: predicated region fallthrough
CT: control target
= control target key end

     0   :  { %v2_v0 = vlaneseq  ;;  %s119_s0 = inlined_call_operand.vmem [shape: f32[2,8,6], index: 0, kind: input, shape index: {}]   ;;  %s120_s1 = inlined_call_operand.vmem [shape: f32[2,8,6], index: 1, kind: output, shape index: {}]  }
   0x1   :  { %v35_v2 = vld [vmem:[%s119_s0] sm:$0xff]  ;;  %v37_v3 = vld [vmem:[%s119_s0 + $0x8] sm:$0xff] }
   0x2   :  { %v3_v1 = vsub.s32 5, %v2_v0 }
   0x4   :  { %4 = vset.pattern.permute.xlu0 %v3_v1 }
   0x5   :  { %43 = vperm.xlu0 %4, %v35_v2  }
   0x9   :  { %49 = vperm.xlu0 %4, %v37_v3  }
  0x80   :  { %v44_v4 = vpop.permute.xlu0 %43 }
  0x81   :  { %83 = vst [vmem:[%s120_s1] sm:$0xff] %v44_v4 }
  0x84   :  { %v50_v5 = vpop.permute.xlu0 %49 }
  0x85   :  { %85 = vst [vmem:[%s120_s1 + $0x8] sm:$0xff] %v50_v5 }

// kernel: mfcc_decoder_forward.4
= control target key start
LH: loop header
LB: loop body
LE: loop exit
PB: predicated region body
PF: predicated region fallthrough
CT: control target
= control target key end

     0   :  { %vm103_vm0 = vcmask 1040384   ;;  %vm66_vm1 = vcmask 7168   ;;  %vm232_vm2 = vcmask 261120   ;;  %s2148_s1 = inlined_call_operand.vmem [shape: f32[1,32], index: 1, kind: input, shape index: {}]   ;;  %s2149_s0 = inlined_call_operand.vmem [shape: f32[96,1], index: 0, kind: input, shape index: {}]   ;;  %s2150_s2 = inlined_call_operand.vmem [shape: f32[1,32], index: 2, kind: input, shape index: {}]   ;;  %s2151_s5 = inlined_call_operand.vmem [shape: f32[32,32], index: 5, kind: input, shape index: {}]   ;;  %s2152_s3 = inlined_call_operand.vmem [shape: f32[1,32], index: 3, kind: input, shape index: {}]   ;;  %s2153_s4 = inlined_call_operand.vmem [shape: f32[1,32], index: 4, kind: input, shape index: {}]   ;;  %s2154_s6 = inlined_call_operand.vmem [shape: f32[1,32], index: 6, kind: input, shape index: {}]   ;;  %s2155_s9 = inlined_call_operand.vmem [shape: f32[32,32], index: 9, kind: input, shape index: {}]   ;;  %s2156_s7 = inlined_call_operand.vmem [shape: f32[1,32], index: 7, kind: input, shape index: {}]   ;;  %s2157_s8 = inlined_call_operand.vmem [shape: f32[1,32], index: 8, kind: input, shape index: {}]   ;;  %s2158_s10 = inlined_call_operand.vmem [shape: f32[1,32], index: 10, kind: input, shape index: {}]   ;;  %s2159_s11 = inlined_call_operand.vmem [shape: f32[1,32], index: 11, kind: input, shape index: {}]   ;;  %s2160_s12 = inlined_call_operand.vmem [shape: f32[1,32], index: 12, kind: input, shape index: {}]   ;;  %s2161_s13 = inlined_call_operand.vmem [shape: f32[96,32], index: 13, kind: output, shape index: {}]  }
   0x1   :  { %v56_v0 = vld [vmem:[%s2148_s1] sm:$0x1]  ;;  %v45_v2 = vld [vmem:[%s2149_s0 + $0x8] sm:$0xff]  ;;  %v46_v3 = vld [vmem:[%s2149_s0 + $0x10] sm:$0xff] }
   0x2   :  { %v44_v1 = vld [vmem:[%s2149_s0] sm:$0xff]  ;;  %1373 = vmatprep.subr.msk.mxu0 %vm103_vm0, %v56_v0  ;;  %1445 = vmatprep.subr.msk.mxu1 %vm103_vm0, %v56_v0  ;;  %v50_v4 = vld [vmem:[%s2149_s0 + $0x30] sm:$0xff]  ;;  %v51_v5 = vld [vmem:[%s2149_s0 + $0x38] sm:$0xff] }
   0x3   :  { %1375 = vmatprep.mubr.msk.f32.mxu0 %vm66_vm1, %v44_v1  ;;  %1374 = vmatpush3.msk.msra.mxu0 %vm103_vm0, %v56_v0  ;;  %v52_v6 = vld [vmem:[%s2149_s0 + $0x40] sm:$0xff]  ;;  %v47_v7 = vld [vmem:[%s2149_s0 + $0x18] sm:$0xff]  ;;  %v53_v9 = vld [vmem:[%s2149_s0 + $0x48] sm:$0xff] }
   0x4   :  { %1376 = vmatmul.mubr.msk.f32.vlgmr.msra.gmra.mxu0 %vm66_vm1, %v45_v2  ;;  %1446 = vmatpush3.msk.msra.mxu1 %vm103_vm0, %v56_v0  ;;  %v48_v8 = vld [vmem:[%s2149_s0 + $0x20] sm:$0xff]  ;;  %v54_v10 = vld [vmem:[%s2149_s0 + $0x50] sm:$0xff]  ;;  %v49_v11 = vld [vmem:[%s2149_s0 + $0x28] sm:$0xff] }
   0x5   :  { %1378 = vmatprep.mubr.msk.f32.mxu0 %vm66_vm1, %v46_v3  ;;  %1384 = vmatprep.mubr.msk.f32.mxu1 %vm66_vm1, %v50_v4  ;;  %v55_v12 = vld [vmem:[%s2149_s0 + $0x58] sm:$0xff]  ;;  %v1282_v14 = vld [vmem:[%s2150_s2] ss:$0 sm:$0xff] }
   0x6   :  { %1385 = vmatmul.mubr.msk.f32.vlgmr.msra.gmra.mxu1 %vm66_vm1, %v51_v5 }
   0x7   :  { %1387 = vmatprep.mubr.msk.f32.mxu1 %vm66_vm1, %v52_v6 }
   0x8   :  { %1379 = vmatmul.mubr.msk.f32.gmra.mxu0 %vm66_vm1, %v47_v7 }
   0x9   :  { %1381 = vmatprep.mubr.msk.f32.mxu0 %vm66_vm1, %v48_v8 }
   0xa   :  { %1388 = vmatmul.mubr.msk.f32.gmra.mxu1 %vm66_vm1, %v53_v9 }
   0xb   :  { %1390 = vmatprep.mubr.msk.f32.mxu1 %vm66_vm1, %v54_v10 }
   0xc   :  { %1382 = vmatmul.mubr.msk.f32.gmra.mxu0 %vm66_vm1, %v49_v11 }
   0xe   :  { %1391 = vmatmul.mubr.msk.f32.gmra.mxu1 %vm66_vm1, %v55_v12 }
  0xc4   :  { %v1377_v13 = vpop.f32.mrf.mxu0 }
  0xc5   :  { %v179_v20 = vadd.f32 %v1377_v13, %v1282_v14 }
  0xc6   :  { %v173_v15 = vpop.f32.mrf.mxu0  ;;  %v1386_v16 = vpop.f32.mrf.mxu1 }
  0xc7   :  { %v174_v17 = vadd.f32 %v1282_v14, %v173_v15  ;;  %v236_v29 = vsel %vm232_vm2, %v179_v20, 0.0  ;;  %v209_v40 = vadd.f32 %v1386_v16, %v1282_v14 }
  0xc8   :  { %v1380_v18 = vpop.f32.mrf.mxu0  ;;  %v203_v19 = vpop.f32.mrf.mxu1 }
  0xc9   :  { %v233_v21 = vsel %vm232_vm2, %v174_v17, 0.0  ;;  %v189_v27 = vadd.f32 %v1380_v18, %v1282_v14  ;;  %v204_v32 = vadd.f32 %v1282_v14, %v203_v19  ;;  %v254_v45 = vsel %vm232_vm2, %v209_v40, 0.0 }
  0xca   :  { %v183_v22 = vpop.f32.mrf.mxu0  ;;  %234 = vadd.xlane.f32.xlu0 %v233_v21  ;;  %v1389_v23 = vpop.f32.mrf.mxu1 }
  0xcb   :  { %v184_v24 = vadd.f32 %v1282_v14, %v183_v22  ;;  %v242_v35 = vsel %vm232_vm2, %v189_v27, 0.0  ;;  %v251_v38 = vsel %vm232_vm2, %v204_v32, 0.0  ;;  %v1656_v44 = vadd.f32 %v1389_v23, %v1282_v14 }
  0xcc   :  { %v1383_v25 = vpop.f32.mrf.mxu0  ;;  %v213_v26 = vpop.f32.mrf.mxu1 }
  0xcd   :  { %v239_v28 = vsel %vm232_vm2, %v184_v24, 0.0  ;;  %v199_v34 = vadd.f32 %v1383_v25, %v1282_v14  ;;  %v1648_v37 = vadd.f32 %v1282_v14, %v213_v26  ;;  %v260_v48 = vsel %vm232_vm2, %v1656_v44, 0.0 }
  0xce   :  { %v193_v30 = vpop.f32.mrf.mxu0  ;;  %240 = vadd.xlane.f32.xlu1 %v239_v28  ;;  %237 = vadd.xlane.f32.xlu0 %v236_v29  ;;  %v1392_v33 = vpop.f32.mrf.mxu1 }
  0xcf   :  { %v194_v31 = vadd.f32 %v1282_v14, %v193_v30  ;;  %v248_v41 = vsel %vm232_vm2, %v199_v34, 0.0  ;;  %v257_v43 = vsel %vm232_vm2, %v1648_v37, 0.0  ;;  %v1661_v47 = vadd.f32 %v1392_v33, %v1282_v14 }
  0xd0   :  { %v223_v39 = vpop.f32.mrf.mxu1 }
  0xd1   :  { %v245_v36 = vsel %vm232_vm2, %v194_v31, 0.0  ;;  %v1652_v42 = vadd.f32 %v1282_v14, %v223_v39  ;;  %v266_v49 = vsel %vm232_vm2, %v1661_v47, 0.0 }
  0xd2   :  { %243 = vadd.xlane.f32.xlu1 %v242_v35  ;;  %246 = vadd.xlane.f32.xlu0 %v245_v36 }
  0xd3   :  { %v263_v46 = vsel %vm232_vm2, %v1652_v42, 0.0 }
  0xd6   :  { %249 = vadd.xlane.f32.xlu1 %v248_v41  ;;  %252 = vadd.xlane.f32.xlu0 %v251_v38 }
  0xda   :  { %255 = vadd.xlane.f32.xlu1 %v254_v45  ;;  %258 = vadd.xlane.f32.xlu0 %v257_v43 }
  0xde   :  { %261 = vadd.xlane.f32.xlu1 %v260_v48  ;;  %264 = vadd.xlane.f32.xlu0 %v263_v46  ;;  %v465_v46 = vld [vmem:[%s2151_s5 + $0x18] sm:$0xff]  ;;  %v463_v48 = vld [vmem:[%s2151_s5 + $0x8] sm:$0xff] }
  0xdf   :  { %1393 = vmatprep.subr.mxu1 %v465_v46 }
  0xe0   :  { %1394 = vmatpush3.msra.mxu1 %v465_v46 }
  0xe2   :  { %267 = vadd.xlane.f32.xlu1 %v266_v49  ;;  %v462_v49 = vld [vmem:[%s2151_s5] sm:$0xff] }
 0x153   :  { %v235_v50 = vpop.xlane.xlu0 %234 }
 0x154   :  { %v270_v51 = vmul.f32 0.03125, %v235_v50 }
 0x156   :  { %v1667_v52 = vsub.f32 %v174_v17, %v270_v51 }
 0x157   :  { %v241_v53 = vpop.xlane.xlu1 %240  ;;  %v238_v54 = vpop.xlane.xlu0 %237 }
 0x158   :  { %v272_v55 = vmul.f32 0.03125, %v241_v53  ;;  %v271_v56 = vmul.f32 0.03125, %v238_v54  ;;  %v294_v57 = vmul.f32 %v1667_v52, %v1667_v52 }
 0x15a   :  { %v1671_v58 = vsub.f32 %v184_v24, %v272_v55  ;;  %v1673_v59 = vsub.f32 %v179_v20, %v271_v56  ;;  %v306_v60 = vsel %vm232_vm2, %v294_v57, 0.0 }
 0x15b   :  { %v244_v61 = vpop.xlane.xlu1 %243  ;;  %307 = vadd.xlane.f32.xlu0 %v306_v60  ;;  %v247_v62 = vpop.xlane.xlu0 %246 }
 0x15c   :  { %v273_v63 = vmul.f32 0.03125, %v244_v61  ;;  %v274_v0 = vmul.f32 0.03125, %v247_v62  ;;  %v296_v1 = vmul.f32 %v1671_v58, %v1671_v58  ;;  %v295_v2 = vmul.f32 %v1673_v59, %v1673_v59 }
 0x15e   :  { %v1680_v3 = vsub.f32 %v189_v27, %v273_v63  ;;  %v1682_v4 = vsub.f32 %v194_v31, %v274_v0  ;;  %v312_v5 = vsel %vm232_vm2, %v296_v1, 0.0  ;;  %v309_v6 = vsel %vm232_vm2, %v295_v2, 0.0 }
 0x15f   :  { %v250_v7 = vpop.xlane.xlu1 %249  ;;  %313 = vadd.xlane.f32.xlu0 %v312_v5  ;;  %310 = vadd.xlane.f32.xlu1 %v309_v6  ;;  %v253_v8 = vpop.xlane.xlu0 %252 }
 0x160   :  { %v275_v9 = vmul.f32 0.03125, %v250_v7  ;;  %v276_v10 = vmul.f32 0.03125, %v253_v8  ;;  %v297_v11 = vmul.f32 %v1680_v3, %v1680_v3  ;;  %v298_v12 = vmul.f32 %v1682_v4, %v1682_v4 }
 0x162   :  { %v1690_v13 = vsub.f32 %v199_v34, %v275_v9  ;;  %v1692_v14 = vsub.f32 %v204_v32, %v276_v10  ;;  %v315_v15 = vsel %vm232_vm2, %v297_v11, 0.0  ;;  %v318_v16 = vsel %vm232_vm2, %v298_v12, 0.0 }
 0x163   :  { %v256_v17 = vpop.xlane.xlu1 %255  ;;  %316 = vadd.xlane.f32.xlu1 %v315_v15  ;;  %319 = vadd.xlane.f32.xlu0 %v318_v16  ;;  %v259_v18 = vpop.xlane.xlu0 %258 }
 0x164   :  { %v277_v19 = vmul.f32 0.03125, %v256_v17  ;;  %v278_v20 = vmul.f32 0.03125, %v259_v18  ;;  %v299_v21 = vmul.f32 %v1690_v13, %v1690_v13  ;;  %v300_v22 = vmul.f32 %v1692_v14, %v1692_v14 }
 0x166   :  { %v1700_v23 = vsub.f32 %v209_v40, %v277_v19  ;;  %v1703_v24 = vsub.f32 %v1648_v37, %v278_v20  ;;  %v321_v25 = vsel %vm232_vm2, %v299_v21, 0.0  ;;  %v324_v26 = vsel %vm232_vm2, %v300_v22, 0.0  ;;  %v1746_v19 = vld [vmem:[%s2152_s3] ss:$0 sm:$0xff] }
 0x167   :  { %v262_v27 = vpop.xlane.xlu1 %261  ;;  %322 = vadd.xlane.f32.xlu1 %v321_v25  ;;  %325 = vadd.xlane.f32.xlu0 %v324_v26  ;;  %v265_v28 = vpop.xlane.xlu0 %264 }
 0x168   :  { %v279_v29 = vmul.f32 0.03125, %v262_v27  ;;  %v280_v30 = vmul.f32 0.03125, %v265_v28  ;;  %v301_v31 = vmul.f32 %v1700_v23, %v1700_v23  ;;  %v302_v32 = vmul.f32 %v1703_v24, %v1703_v24  ;;  %v1752_v27 = vld [vmem:[%s2153_s4] ss:$0 sm:$0xff] }
 0x16a   :  { %v1712_v33 = vsub.f32 %v1656_v44, %v279_v29  ;;  %v1715_v34 = vsub.f32 %v1652_v42, %v280_v30  ;;  %v327_v35 = vsel %vm232_vm2, %v301_v31, 0.0  ;;  %v330_v36 = vsel %vm232_vm2, %v302_v32, 0.0 }
 0x16b   :  { %v268_v37 = vpop.xlane.xlu1 %267  ;;  %328 = vadd.xlane.f32.xlu1 %v327_v35  ;;  %331 = vadd.xlane.f32.xlu0 %v330_v36 }
 0x16c   :  { %v281_v38 = vmul.f32 0.03125, %v268_v37  ;;  %v303_v39 = vmul.f32 %v1712_v33, %v1712_v33  ;;  %v304_v40 = vmul.f32 %v1715_v34, %v1715_v34 }
 0x16e   :  { %v1724_v41 = vsub.f32 %v1661_v47, %v281_v38  ;;  %v333_v42 = vsel %vm232_vm2, %v303_v39, 0.0  ;;  %v336_v43 = vsel %vm232_vm2, %v304_v40, 0.0  ;;  %v464_v47 = vld [vmem:[%s2151_s5 + $0x10] sm:$0xff] }
 0x16f   :  { %334 = vadd.xlane.f32.xlu1 %v333_v42  ;;  %337 = vadd.xlane.f32.xlu0 %v336_v43 }
 0x170   :  { %v305_v44 = vmul.f32 %v1724_v41, %v1724_v41  ;;  %1395 = vmatprep.subr.mxu1 %v464_v47 }
 0x171   :  { %1396 = vmatpush3.msra.mxu1 %v464_v47 }
 0x172   :  { %v339_v45 = vsel %vm232_vm2, %v305_v44, 0.0  ;;  %1397 = vmatprep.subr.mxu1 %v463_v48 }
 0x173   :  { %340 = vadd.xlane.f32.xlu1 %v339_v45  ;;  %1398 = vmatpush3.msra.mxu1 %v463_v48 }
 0x174   :  { %1399 = vmatprep.subr.mxu1 %v462_v49 }
 0x175   :  { %1400 = vmatpush3.msra.mxu1 %v462_v49 }
 0x1e4   :  { %v308_v50 = vpop.xlane.xlu0 %307 }
 0x1e5   :  { %v342_v51 = vmul.f32 0.03125, %v308_v50 }
 0x1e7   :  { %v354_v53 = vadd.f32 1e-05, %v342_v51 }
 0x1e8   :  { %v311_v54 = vpop.xlane.xlu1 %310  ;;  %v314_v55 = vpop.xlane.xlu0 %313 }
 0x1e9   :  { %1447 = vrsqrt.f32 %v354_v53  ;;  %v343_v56 = vmul.f32 0.03125, %v311_v54  ;;  %v344_v57 = vmul.f32 0.03125, %v314_v55 }
 0x1eb   :  { %v355_v60 = vadd.f32 1e-05, %v343_v56  ;;  %v356_v61 = vadd.f32 1e-05, %v344_v57 }
 0x1ec   :  { %v317_v62 = vpop.xlane.xlu1 %316  ;;  %v320_v63 = vpop.xlane.xlu0 %319 }
 0x1ed   :  { %1449 = vrsqrt.f32 %v355_v60  ;;  %v345_v0 = vmul.f32 0.03125, %v317_v62  ;;  %v346_v1 = vmul.f32 0.03125, %v320_v63 }
 0x1ee   :  { %1451 = vrsqrt.f32 %v356_v61 }
 0x1ef   :  { %v357_v2 = vadd.f32 1e-05, %v345_v0  ;;  %v358_v5 = vadd.f32 1e-05, %v346_v1 }
 0x1f0   :  { %v323_v6 = vpop.xlane.xlu1 %322  ;;  %v326_v7 = vpop.xlane.xlu0 %325 }
 0x1f1   :  { %1453 = vrsqrt.f32 %v357_v2  ;;  %v347_v8 = vmul.f32 0.03125, %v323_v6  ;;  %v348_v9 = vmul.f32 0.03125, %v326_v7 }
 0x1f2   :  { %1455 = vrsqrt.f32 %v358_v5 }
 0x1f3   :  { %v359_v10 = vadd.f32 1e-05, %v347_v8  ;;  %v360_v11 = vadd.f32 1e-05, %v348_v9 }
 0x1f4   :  { %v329_v12 = vpop.xlane.xlu1 %328  ;;  %v332_v15 = vpop.xlane.xlu0 %331 }
 0x1f5   :  { %1457 = vrsqrt.f32 %v359_v10  ;;  %v349_v16 = vmul.f32 0.03125, %v329_v12  ;;  %v350_v17 = vmul.f32 0.03125, %v332_v15 }
 0x1f6   :  { %v1448_v18 = vpop.eup %1447  ;;  %1459 = vrsqrt.f32 %v360_v11 }
 0x1f7   :  { %v361_v20 = vadd.f32 1e-05, %v349_v16  ;;  %v362_v21 = vadd.f32 1e-05, %v350_v17  ;;  %v378_v22 = vmul.f32 %v1448_v18, %v1667_v52 }
 0x1f8   :  { %v335_v25 = vpop.xlane.xlu1 %334  ;;  %v338_v26 = vpop.xlane.xlu0 %337 }
 0x1f9   :  { %1461 = vrsqrt.f32 %v361_v20  ;;  %v351_v28 = vmul.f32 0.03125, %v335_v25  ;;  %v352_v29 = vmul.f32 0.03125, %v338_v26  ;;  %v396_v30 = vmul.f32 %v1746_v19, %v378_v22 }
 0x1fa   :  { %v1450_v31 = vpop.eup %1449  ;;  %1463 = vrsqrt.f32 %v362_v21 }
 0x1fb   :  { %v1452_v32 = vpop.eup %1451  ;;  %v379_v35 = vmul.f32 %v1450_v31, %v1673_v59  ;;  %v363_v36 = vadd.f32 1e-05, %v351_v28  ;;  %v364_v37 = vadd.f32 1e-05, %v352_v29  ;;  %v414_v52 = vadd.f32 %v1752_v27, %v396_v30 }
 0x1fc   :  { %v341_v38 = vpop.xlane.xlu1 %340  ;;  %v380_v39 = vmul.f32 %v1452_v32, %v1671_v58 }
 0x1fd   :  { %1465 = vrsqrt.f32 %v363_v36  ;;  %v353_v40 = vmul.f32 0.03125, %v341_v38  ;;  %vm426_vm3 = vcmp.ge.f32.partialorder %v414_v52, 0.0  ;;  %v438_v42 = vmul.f32 0.01, %v414_v52 }
 0x1fe   :  { %v1454_v43 = vpop.eup %1453  ;;  %1467 = vrsqrt.f32 %v364_v37  ;;  %v397_v44 = vmul.f32 %v1746_v19, %v379_v35  ;;  %v398_v45 = vmul.f32 %v1746_v19, %v380_v39 }
 0x1ff   :  { %v1456_v46 = vpop.eup %1455  ;;  %v365_v47 = vadd.f32 1e-05, %v353_v40  ;;  %v450_v59 = vsel %vm426_vm3, %v414_v52, %v438_v42  ;;  %v381_v48 = vmul.f32 %v1454_v43, %v1680_v3 }
 0x200   :  { %1401 = vmatprep.mubr.msk.f32.mxu1 %vm232_vm2, %v450_v59  ;;  %v415_v49 = vadd.f32 %v1752_v27, %v397_v44  ;;  %v416_v58 = vadd.f32 %v1752_v27, %v398_v45  ;;  %v382_v50 = vmul.f32 %v1456_v46, %v1682_v4 }
 0x201   :  { %1469 = vrsqrt.f32 %v365_v47  ;;  %v399_v51 = vmul.f32 %v1746_v19, %v381_v48 }
 0x202   :  { %v1458_v53 = vpop.eup %1457  ;;  %vm427_vm4 = vcmp.ge.f32.partialorder %v415_v49, 0.0  ;;  %v439_v54 = vmul.f32 0.01, %v415_v49  ;;  %vm428_vm5 = vcmp.ge.f32.partialorder %v416_v58, 0.0  ;;  %v440_v55 = vmul.f32 0.01, %v416_v58 }
 0x203   :  { %v1460_v56 = vpop.eup %1459  ;;  %v417_v57 = vadd.f32 %v1752_v27, %v399_v51  ;;  %v400_v3 = vmul.f32 %v1746_v19, %v382_v50  ;;  %v383_v60 = vmul.f32 %v1458_v53, %v1690_v13 }
 0x204   :  { %v451_v61 = vsel %vm427_vm4, %v415_v49, %v439_v54  ;;  %v452_v62 = vsel %vm428_vm5, %v416_v58, %v440_v55  ;;  %v384_v63 = vmul.f32 %v1460_v56, %v1692_v14 }
 0x205   :  { %1402 = vmatmul.mubr.msk.f32.vlgmr.msra.gmra.mxu1 %vm232_vm2, %v451_v61  ;;  %vm429_vm6 = vcmp.ge.f32.partialorder %v417_v57, 0.0  ;;  %v441_v4 = vmul.f32 0.01, %v417_v57  ;;  %v418_v0 = vadd.f32 %v1752_v27, %v400_v3  ;;  %v401_v1 = vmul.f32 %v1746_v19, %v383_v60 }
 0x206   :  { %v1462_v2 = vpop.eup %1461  ;;  %1404 = vmatprep.mubr.msk.f32.mxu1 %vm232_vm2, %v452_v62  ;;  %v402_v5 = vmul.f32 %v1746_v19, %v384_v63 }
 0x207   :  { %v1464_v6 = vpop.eup %1463  ;;  %v453_v7 = vsel %vm429_vm6, %v417_v57, %v441_v4  ;;  %vm430_vm7 = vcmp.ge.f32.partialorder %v418_v0, 0.0  ;;  %v442_v13 = vmul.f32 0.01, %v418_v0  ;;  %v419_v8 = vadd.f32 %v1752_v27, %v401_v1 }
 0x208   :  { %v420_v14 = vadd.f32 %v1752_v27, %v402_v5  ;;  %v385_v9 = vmul.f32 %v1462_v2, %v1700_v23  ;;  %v386_v10 = vmul.f32 %v1464_v6, %v1703_v24 }
 0x209   :  { %1405 = vmatmul.mubr.msk.f32.gmra.mxu1 %vm232_vm2, %v453_v7  ;;  %v454_v11 = vsel %vm430_vm7, %v418_v0, %v442_v13  ;;  %vm431_vm8 = vcmp.ge.f32.partialorder %v419_v8, 0.0  ;;  %v443_v12 = vmul.f32 0.01, %v419_v8 }
 0x20a   :  { %v1466_v15 = vpop.eup %1465  ;;  %1407 = vmatprep.mubr.msk.f32.mxu1 %vm232_vm2, %v454_v11  ;;  %vm432_vm9 = vcmp.ge.f32.partialorder %v420_v14, 0.0  ;;  %v444_v16 = vmul.f32 0.01, %v420_v14  ;;  %v403_v17 = vmul.f32 %v1746_v19, %v385_v9  ;;  %v404_v18 = vmul.f32 %v1746_v19, %v386_v10 }
 0x20b   :  { %v1468_v20 = vpop.eup %1467  ;;  %v455_v21 = vsel %vm431_vm8, %v419_v8, %v443_v12  ;;  %v387_v23 = vmul.f32 %v1466_v15, %v1712_v33 }
 0x20c   :  { %v456_v22 = vsel %vm432_vm9, %v420_v14, %v444_v16  ;;  %v421_v24 = vadd.f32 %v1752_v27, %v403_v17  ;;  %v422_v25 = vadd.f32 %v1752_v27, %v404_v18  ;;  %v388_v26 = vmul.f32 %v1468_v20, %v1715_v34 }
 0x20d   :  { %1408 = vmatmul.mubr.msk.f32.gmra.mxu1 %vm232_vm2, %v455_v21  ;;  %v405_v28 = vmul.f32 %v1746_v19, %v387_v23 }
 0x20e   :  { %v1470_v29 = vpop.eup %1469  ;;  %1410 = vmatprep.mubr.msk.f32.mxu1 %vm232_vm2, %v456_v22  ;;  %vm433_vm10 = vcmp.ge.f32.partialorder %v421_v24, 0.0  ;;  %v445_v30 = vmul.f32 0.01, %v421_v24  ;;  %vm434_vm11 = vcmp.ge.f32.partialorder %v422_v25, 0.0  ;;  %v446_v31 = vmul.f32 0.01, %v422_v25 }
 0x20f   :  { %v423_v33 = vadd.f32 %v1752_v27, %v405_v28  ;;  %v406_v32 = vmul.f32 %v1746_v19, %v388_v26  ;;  %v389_v35 = vmul.f32 %v1470_v29, %v1724_v41 }
 0x210   :  { %v457_v36 = vsel %vm433_vm10, %v421_v24, %v445_v30  ;;  %v458_v37 = vsel %vm434_vm11, %v422_v25, %v446_v31 }
 0x211   :  { %1411 = vmatmul.mubr.msk.f32.gmra.mxu1 %vm232_vm2, %v457_v36  ;;  %vm435_vm12 = vcmp.ge.f32.partialorder %v423_v33, 0.0  ;;  %v447_v34 = vmul.f32 0.01, %v423_v33  ;;  %v424_v52 = vadd.f32 %v1752_v27, %v406_v32  ;;  %v407_v38 = vmul.f32 %v1746_v19, %v389_v35  ;;  %v1298_v19 = vld [vmem:[%s2154_s6] ss:$0 sm:$0xff] }
 0x212   :  { %1413 = vmatprep.mubr.msk.f32.mxu1 %vm232_vm2, %v458_v37 }
 0x213   :  { %v459_v39 = vsel %vm435_vm12, %v423_v33, %v447_v34  ;;  %vm436_vm13 = vcmp.ge.f32.partialorder %v424_v52, 0.0  ;;  %v448_v40 = vmul.f32 0.01, %v424_v52  ;;  %v425_v42 = vadd.f32 %v1752_v27, %v407_v38 }
 0x215   :  { %1414 = vmatmul.mubr.msk.f32.gmra.mxu1 %vm232_vm2, %v459_v39  ;;  %v460_v41 = vsel %vm436_vm13, %v424_v52, %v448_v40  ;;  %vm437_vm14 = vcmp.ge.f32.partialorder %v425_v42, 0.0  ;;  %v449_v43 = vmul.f32 0.01, %v425_v42 }
 0x216   :  { %1416 = vmatprep.mubr.msk.f32.mxu1 %vm232_vm2, %v460_v41 }
 0x217   :  { %v461_v44 = vsel %vm437_vm14, %v425_v42, %v449_v43 }
 0x219   :  { %1417 = vmatmul.mubr.msk.f32.gmra.mxu1 %vm232_vm2, %v461_v44 }
 0x2c5   :  { %v1403_v45 = vpop.f32.mrf.mxu1 }
 0x2c6   :  { %v583_v46 = vadd.f32 %v1403_v45, %v1298_v19 }
 0x2c7   :  { %v577_v47 = vpop.f32.mrf.mxu1 }
 0x2c8   :  { %v578_v59 = vadd.f32 %v1298_v19, %v577_v47  ;;  %v639_v27 = vsel %vm232_vm2, %v583_v46, 0.0 }
 0x2c9   :  { %640 = vadd.xlane.f32.xlu1 %v639_v27  ;;  %v1406_v48 = vpop.f32.mrf.mxu1 }
 0x2ca   :  { %v593_v49 = vadd.f32 %v1406_v48, %v1298_v19  ;;  %v636_v58 = vsel %vm232_vm2, %v578_v59, 0.0 }
 0x2cb   :  { %637 = vadd.xlane.f32.xlu0 %v636_v58  ;;  %v587_v50 = vpop.f32.mrf.mxu1 }
 0x2cc   :  { %v588_v51 = vadd.f32 %v1298_v19, %v587_v50  ;;  %v645_v53 = vsel %vm232_vm2, %v593_v49, 0.0 }
 0x2cd   :  { %646 = vadd.xlane.f32.xlu1 %v645_v53  ;;  %v1409_v54 = vpop.f32.mrf.mxu1 }
 0x2ce   :  { %v603_v55 = vadd.f32 %v1409_v54, %v1298_v19  ;;  %v642_v56 = vsel %vm232_vm2, %v588_v51, 0.0 }
 0x2cf   :  { %643 = vadd.xlane.f32.xlu0 %v642_v56  ;;  %v597_v57 = vpop.f32.mrf.mxu1 }
 0x2d0   :  { %v598_v3 = vadd.f32 %v1298_v19, %v597_v57  ;;  %v651_v60 = vsel %vm232_vm2, %v603_v55, 0.0 }
 0x2d1   :  { %652 = vadd.xlane.f32.xlu1 %v651_v60  ;;  %v1412_v61 = vpop.f32.mrf.mxu1 }
 0x2d2   :  { %v613_v62 = vadd.f32 %v1412_v61, %v1298_v19  ;;  %v648_v63 = vsel %vm232_vm2, %v598_v3, 0.0 }
 0x2d3   :  { %649 = vadd.xlane.f32.xlu0 %v648_v63  ;;  %v607_v4 = vpop.f32.mrf.mxu1 }
 0x2d4   :  { %v608_v0 = vadd.f32 %v1298_v19, %v607_v4  ;;  %v657_v1 = vsel %vm232_vm2, %v613_v62, 0.0 }
 0x2d5   :  { %658 = vadd.xlane.f32.xlu1 %v657_v1  ;;  %v1415_v2 = vpop.f32.mrf.mxu1 }
 0x2d6   :  { %v1811_v5 = vadd.f32 %v1415_v2, %v1298_v19  ;;  %v654_v6 = vsel %vm232_vm2, %v608_v0, 0.0 }
 0x2d7   :  { %655 = vadd.xlane.f32.xlu0 %v654_v6  ;;  %v617_v7 = vpop.f32.mrf.mxu1 }
 0x2d8   :  { %v1814_v13 = vadd.f32 %v1298_v19, %v617_v7  ;;  %v663_v8 = vsel %vm232_vm2, %v1811_v5, 0.0 }
 0x2d9   :  { %664 = vadd.xlane.f32.xlu1 %v663_v8  ;;  %v1418_v14 = vpop.f32.mrf.mxu1 }
 0x2da   :  { %v1818_v9 = vadd.f32 %v1418_v14, %v1298_v19  ;;  %v660_v10 = vsel %vm232_vm2, %v1814_v13, 0.0 }
 0x2db   :  { %661 = vadd.xlane.f32.xlu0 %v660_v10  ;;  %v627_v11 = vpop.f32.mrf.mxu1 }
 0x2dc   :  { %v1822_v12 = vadd.f32 %v1298_v19, %v627_v11  ;;  %v669_v15 = vsel %vm232_vm2, %v1818_v9, 0.0  ;;  %v867_v11 = vld [vmem:[%s2155_s9 + $0x18] sm:$0xff] }
 0x2dd   :  { %670 = vadd.xlane.f32.xlu1 %v669_v15  ;;  %1419 = vmatprep.subr.mxu0 %v867_v11  ;;  %v865_v15 = vld [vmem:[%s2155_s9 + $0x8] sm:$0xff] }
 0x2de   :  { %v666_v16 = vsel %vm232_vm2, %v1822_v12, 0.0  ;;  %1420 = vmatpush3.msra.mxu0 %v867_v11 }
 0x2df   :  { %667 = vadd.xlane.f32.xlu0 %v666_v16  ;;  %v864_v16 = vld [vmem:[%s2155_s9] sm:$0xff] }
 0x352   :  { %v641_v17 = vpop.xlane.xlu1 %640 }
 0x353   :  { %v673_v18 = vmul.f32 0.03125, %v641_v17 }
 0x354   :  { %v638_v20 = vpop.xlane.xlu0 %637 }
 0x355   :  { %v1828_v21 = vsub.f32 %v583_v46, %v673_v18  ;;  %v672_v23 = vmul.f32 0.03125, %v638_v20 }
 0x356   :  { %v647_v22 = vpop.xlane.xlu1 %646 }
 0x357   :  { %v1830_v24 = vsub.f32 %v578_v59, %v672_v23  ;;  %v675_v25 = vmul.f32 0.03125, %v647_v22  ;;  %v697_v26 = vmul.f32 %v1828_v21, %v1828_v21 }
 0x358   :  { %v644_v28 = vpop.xlane.xlu0 %643 }
 0x359   :  { %v1834_v29 = vsub.f32 %v593_v49, %v675_v25  ;;  %v674_v30 = vmul.f32 0.03125, %v644_v28  ;;  %v711_v31 = vsel %vm232_vm2, %v697_v26, 0.0  ;;  %v696_v33 = vmul.f32 %v1830_v24, %v1830_v24 }
 0x35a   :  { %v653_v32 = vpop.xlane.xlu1 %652  ;;  %712 = vadd.xlane.f32.xlu1 %v711_v31 }
 0x35b   :  { %v1839_v35 = vsub.f32 %v588_v51, %v674_v30  ;;  %v677_v36 = vmul.f32 0.03125, %v653_v32  ;;  %v708_v37 = vsel %vm232_vm2, %v696_v33, 0.0  ;;  %v699_v34 = vmul.f32 %v1834_v29, %v1834_v29 }
 0x35c   :  { %709 = vadd.xlane.f32.xlu0 %v708_v37  ;;  %v650_v52 = vpop.xlane.xlu0 %649 }
 0x35d   :  { %v1844_v38 = vsub.f32 %v603_v55, %v677_v36  ;;  %v676_v39 = vmul.f32 0.03125, %v650_v52  ;;  %v717_v40 = vsel %vm232_vm2, %v699_v34, 0.0  ;;  %v698_v42 = vmul.f32 %v1839_v35, %v1839_v35 }
 0x35e   :  { %v659_v41 = vpop.xlane.xlu1 %658  ;;  %718 = vadd.xlane.f32.xlu1 %v717_v40 }
 0x35f   :  { %v1849_v43 = vsub.f32 %v598_v3, %v676_v39  ;;  %v679_v44 = vmul.f32 0.03125, %v659_v41  ;;  %v714_v19 = vsel %vm232_vm2, %v698_v42, 0.0  ;;  %v701_v45 = vmul.f32 %v1844_v38, %v1844_v38 }
 0x360   :  { %715 = vadd.xlane.f32.xlu0 %v714_v19  ;;  %v656_v46 = vpop.xlane.xlu0 %655 }
 0x361   :  { %v1854_v47 = vsub.f32 %v613_v62, %v679_v44  ;;  %v678_v59 = vmul.f32 0.03125, %v656_v46  ;;  %v723_v27 = vsel %vm232_vm2, %v701_v45, 0.0  ;;  %v700_v48 = vmul.f32 %v1849_v43, %v1849_v43 }
 0x362   :  { %v665_v49 = vpop.xlane.xlu1 %664  ;;  %724 = vadd.xlane.f32.xlu1 %v723_v27 }
 0x363   :  { %v1859_v58 = vsub.f32 %v608_v0, %v678_v59  ;;  %v681_v50 = vmul.f32 0.03125, %v665_v49  ;;  %v720_v51 = vsel %vm232_vm2, %v700_v48, 0.0  ;;  %v703_v53 = vmul.f32 %v1854_v47, %v1854_v47 }
 0x364   :  { %721 = vadd.xlane.f32.xlu0 %v720_v51  ;;  %v662_v54 = vpop.xlane.xlu0 %661 }
 0x365   :  { %v1865_v55 = vsub.f32 %v1811_v5, %v681_v50  ;;  %v680_v56 = vmul.f32 0.03125, %v662_v54  ;;  %v729_v57 = vsel %vm232_vm2, %v703_v53, 0.0  ;;  %v702_v3 = vmul.f32 %v1859_v58, %v1859_v58  ;;  %v1908_v54 = vld [vmem:[%s2156_s7] ss:$0 sm:$0xff] }
 0x366   :  { %730 = vadd.xlane.f32.xlu1 %v729_v57  ;;  %v671_v60 = vpop.xlane.xlu1 %670 }
 0x367   :  { %v1871_v61 = vsub.f32 %v1814_v13, %v680_v56  ;;  %v683_v62 = vmul.f32 0.03125, %v671_v60  ;;  %v726_v63 = vsel %vm232_vm2, %v702_v3, 0.0  ;;  %v705_v4 = vmul.f32 %v1865_v55, %v1865_v55 }
 0x368   :  { %727 = vadd.xlane.f32.xlu0 %v726_v63  ;;  %v668_v0 = vpop.xlane.xlu0 %667 }
 0x369   :  { %v1877_v1 = vsub.f32 %v1818_v9, %v683_v62  ;;  %v682_v2 = vmul.f32 0.03125, %v668_v0  ;;  %v735_v5 = vsel %vm232_vm2, %v705_v4, 0.0  ;;  %v704_v6 = vmul.f32 %v1871_v61, %v1871_v61  ;;  %v1913_v62 = vld [vmem:[%s2157_s8] ss:$0 sm:$0xff] }
 0x36a   :  { %736 = vadd.xlane.f32.xlu1 %v735_v5 }
 0x36b   :  { %v1883_v7 = vsub.f32 %v1822_v12, %v682_v2  ;;  %v732_v13 = vsel %vm232_vm2, %v704_v6, 0.0  ;;  %v707_v8 = vmul.f32 %v1877_v1, %v1877_v1  ;;  %v866_v12 = vld [vmem:[%s2155_s9 + $0x10] sm:$0xff] }
 0x36c   :  { %733 = vadd.xlane.f32.xlu0 %v732_v13  ;;  %1421 = vmatprep.subr.mxu0 %v866_v12 }
 0x36d   :  { %v741_v14 = vsel %vm232_vm2, %v707_v8, 0.0  ;;  %v706_v9 = vmul.f32 %v1883_v7, %v1883_v7  ;;  %1422 = vmatpush3.msra.mxu0 %v866_v12 }
 0x36e   :  { %742 = vadd.xlane.f32.xlu1 %v741_v14  ;;  %1423 = vmatprep.subr.mxu0 %v865_v15 }
 0x36f   :  { %v738_v10 = vsel %vm232_vm2, %v706_v9, 0.0  ;;  %1424 = vmatpush3.msra.mxu0 %v865_v15 }
 0x370   :  { %739 = vadd.xlane.f32.xlu0 %v738_v10  ;;  %1425 = vmatprep.subr.mxu0 %v864_v16 }
 0x371   :  { %1426 = vmatpush3.msra.mxu0 %v864_v16 }
 0x3e3   :  { %v713_v17 = vpop.xlane.xlu1 %712 }
 0x3e4   :  { %v745_v18 = vmul.f32 0.03125, %v713_v17 }
 0x3e5   :  { %v710_v20 = vpop.xlane.xlu0 %709 }
 0x3e6   :  { %v757_v23 = vadd.f32 1e-05, %v745_v18  ;;  %v744_v22 = vmul.f32 0.03125, %v710_v20 }
 0x3e7   :  { %v719_v25 = vpop.xlane.xlu1 %718 }
 0x3e8   :  { %1471 = vrsqrt.f32 %v757_v23  ;;  %v756_v26 = vadd.f32 1e-05, %v744_v22  ;;  %v747_v28 = vmul.f32 0.03125, %v719_v25 }
 0x3e9   :  { %v716_v30 = vpop.xlane.xlu0 %715 }
 0x3ea   :  { %1473 = vrsqrt.f32 %v756_v26  ;;  %v759_v31 = vadd.f32 1e-05, %v747_v28  ;;  %v746_v33 = vmul.f32 0.03125, %v716_v30 }
 0x3eb   :  { %v725_v32 = vpop.xlane.xlu1 %724 }
 0x3ec   :  { %1475 = vrsqrt.f32 %v759_v31  ;;  %v758_v36 = vadd.f32 1e-05, %v746_v33  ;;  %v749_v37 = vmul.f32 0.03125, %v725_v32 }
 0x3ed   :  { %v722_v34 = vpop.xlane.xlu0 %721 }
 0x3ee   :  { %1477 = vrsqrt.f32 %v758_v36  ;;  %v761_v52 = vadd.f32 1e-05, %v749_v37  ;;  %v748_v39 = vmul.f32 0.03125, %v722_v34 }
 0x3ef   :  { %v731_v40 = vpop.xlane.xlu1 %730 }
 0x3f0   :  { %1479 = vrsqrt.f32 %v761_v52  ;;  %v760_v42 = vadd.f32 1e-05, %v748_v39  ;;  %v751_v41 = vmul.f32 0.03125, %v731_v40 }
 0x3f1   :  { %v728_v44 = vpop.xlane.xlu0 %727 }
 0x3f2   :  { %1481 = vrsqrt.f32 %v760_v42  ;;  %v763_v19 = vadd.f32 1e-05, %v751_v41  ;;  %v750_v45 = vmul.f32 0.03125, %v728_v44 }
 0x3f3   :  { %v737_v46 = vpop.xlane.xlu1 %736 }
 0x3f4   :  { %1483 = vrsqrt.f32 %v763_v19  ;;  %v762_v59 = vadd.f32 1e-05, %v750_v45  ;;  %v753_v27 = vmul.f32 0.03125, %v737_v46 }
 0x3f5   :  { %v1472_v48 = vpop.eup %1471  ;;  %v734_v49 = vpop.xlane.xlu0 %733 }
 0x3f6   :  { %v781_v50 = vmul.f32 %v1472_v48, %v1828_v21  ;;  %1485 = vrsqrt.f32 %v762_v59  ;;  %v765_v51 = vadd.f32 1e-05, %v753_v27  ;;  %v752_v53 = vmul.f32 0.03125, %v734_v49 }
 0x3f7   :  { %v1474_v56 = vpop.eup %1473  ;;  %v743_v57 = vpop.xlane.xlu1 %742 }
 0x3f8   :  { %1487 = vrsqrt.f32 %v765_v51  ;;  %v764_v3 = vadd.f32 1e-05, %v752_v53  ;;  %v755_v60 = vmul.f32 0.03125, %v743_v57  ;;  %v780_v21 = vmul.f32 %v1474_v56, %v1830_v24 }
 0x3f9   :  { %v1476_v63 = vpop.eup %1475  ;;  %v740_v4 = vpop.xlane.xlu0 %739  ;;  %v799_v0 = vmul.f32 %v1908_v54, %v781_v50 }
 0x3fa   :  { %1489 = vrsqrt.f32 %v764_v3  ;;  %v767_v2 = vadd.f32 1e-05, %v755_v60  ;;  %v754_v5 = vmul.f32 0.03125, %v740_v4  ;;  %v798_v6 = vmul.f32 %v1908_v54, %v780_v21 }
 0x3fb   :  { %v1478_v13 = vpop.eup %1477  ;;  %v817_v8 = vadd.f32 %v1913_v62, %v799_v0  ;;  %v783_v14 = vmul.f32 %v1476_v63, %v1834_v29 }
 0x3fc   :  { %1491 = vrsqrt.f32 %v767_v2  ;;  %v766_v9 = vadd.f32 1e-05, %v754_v5  ;;  %v816_v10 = vadd.f32 %v1913_v62, %v798_v6  ;;  %v782_v24 = vmul.f32 %v1478_v13, %v1839_v35 }
 0x3fd   :  { %v1480_v11 = vpop.eup %1479  ;;  %vm829_vm15 = vcmp.ge.f32.partialorder %v817_v8, 0.0  ;;  %v841_v12 = vmul.f32 0.01, %v817_v8  ;;  %v801_v15 = vmul.f32 %v1908_v54, %v783_v14 }
 0x3fe   :  { %1493 = vrsqrt.f32 %v766_v9  ;;  %vm828_vm0 = vcmp.ge.f32.partialorder %v816_v10, 0.0  ;;  %v840_v16 = vmul.f32 0.01, %v816_v10  ;;  %v800_v17 = vmul.f32 %v1908_v54, %v782_v24 }
 0x3ff   :  { %v1482_v18 = vpop.eup %1481  ;;  %v819_v20 = vadd.f32 %v1913_v62, %v801_v15  ;;  %v785_v29 = vmul.f32 %v1480_v11, %v1844_v38  ;;  %v853_v26 = vsel %vm829_vm15, %v817_v8, %v841_v12 }
 0x400   :  { %v852_v23 = vsel %vm828_vm0, %v816_v10, %v840_v16  ;;  %v818_v22 = vadd.f32 %v1913_v62, %v800_v17  ;;  %v784_v35 = vmul.f32 %v1482_v18, %v1849_v43 }
 0x401   :  { %v1484_v25 = vpop.eup %1483  ;;  %1427 = vmatprep.mubr.msk.f32.mxu0 %vm232_vm2, %v852_v23  ;;  %vm831_vm1 = vcmp.ge.f32.partialorder %v819_v20, 0.0  ;;  %v843_v28 = vmul.f32 0.01, %v819_v20  ;;  %v803_v30 = vmul.f32 %v1908_v54, %v785_v29 }
 0x402   :  { %1428 = vmatmul.mubr.msk.f32.vlgmr.msra.gmra.mxu0 %vm232_vm2, %v853_v26  ;;  %vm830_vm3 = vcmp.ge.f32.partialorder %v818_v22, 0.0  ;;  %v842_v31 = vmul.f32 0.01, %v818_v22  ;;  %v802_v33 = vmul.f32 %v1908_v54, %v784_v35  ;;  %v787_v38 = vmul.f32 %v1484_v25, %v1854_v47 }
 0x403   :  { %v1486_v32 = vpop.eup %1485  ;;  %v821_v36 = vadd.f32 %v1913_v62, %v803_v30  ;;  %v855_v40 = vsel %vm831_vm1, %v819_v20, %v843_v28 }
 0x404   :  { %v854_v43 = vsel %vm830_vm3, %v818_v22, %v842_v31  ;;  %v820_v37 = vadd.f32 %v1913_v62, %v802_v33  ;;  %v786_v34 = vmul.f32 %v1486_v32, %v1859_v58  ;;  %v805_v52 = vmul.f32 %v1908_v54, %v787_v38 }
 0x405   :  { %v1488_v39 = vpop.eup %1487  ;;  %1430 = vmatprep.mubr.msk.f32.mxu0 %vm232_vm2, %v854_v43  ;;  %vm833_vm4 = vcmp.ge.f32.partialorder %v821_v36, 0.0  ;;  %v845_v42 = vmul.f32 0.01, %v821_v36 }
 0x406   :  { %1431 = vmatmul.mubr.msk.f32.gmra.mxu0 %vm232_vm2, %v855_v40  ;;  %vm832_vm5 = vcmp.ge.f32.partialorder %v820_v37, 0.0  ;;  %v844_v47 = vmul.f32 0.01, %v820_v37  ;;  %v804_v41 = vmul.f32 %v1908_v54, %v786_v34  ;;  %v823_v44 = vadd.f32 %v1913_v62, %v805_v52 }
 0x407   :  { %v1490_v19 = vpop.eup %1489  ;;  %v789_v58 = vmul.f32 %v1488_v39, %v1865_v55  ;;  %v857_v27 = vsel %vm833_vm4, %v821_v36, %v845_v42 }
 0x408   :  { %v856_v45 = vsel %vm832_vm5, %v820_v37, %v844_v47  ;;  %v822_v46 = vadd.f32 %v1913_v62, %v804_v41  ;;  %v847_v48 = vmul.f32 0.01, %v823_v44  ;;  %v788_v49 = vmul.f32 %v1490_v19, %v1871_v61 }
 0x409   :  { %v1492_v59 = vpop.eup %1491  ;;  %1433 = vmatprep.mubr.msk.f32.mxu0 %vm232_vm2, %v856_v45  ;;  %v807_v50 = vmul.f32 %v1908_v54, %v789_v58  ;;  %vm835_vm7 = vcmp.ge.f32.partialorder %v823_v44, 0.0 }
 0x40a   :  { %1434 = vmatmul.mubr.msk.f32.gmra.mxu0 %vm232_vm2, %v857_v27  ;;  %vm834_vm6 = vcmp.ge.f32.partialorder %v822_v46, 0.0  ;;  %v846_v51 = vmul.f32 0.01, %v822_v46  ;;  %v791_v53 = vmul.f32 %v1492_v59, %v1877_v1  ;;  %v806_v56 = vmul.f32 %v1908_v54, %v788_v49 }
 0x40b   :  { %v1494_v55 = vpop.eup %1493  ;;  %v825_v57 = vadd.f32 %v1913_v62, %v807_v50  ;;  %v859_v61 = vsel %vm835_vm7, %v823_v44, %v847_v48 }
 0x40c   :  { %v858_v3 = vsel %vm834_vm6, %v822_v46, %v846_v51  ;;  %v790_v60 = vmul.f32 %v1494_v55, %v1883_v7  ;;  %v809_v21 = vmul.f32 %v1908_v54, %v791_v53  ;;  %v824_v63 = vadd.f32 %v1913_v62, %v806_v56 }
 0x40d   :  { %1436 = vmatprep.mubr.msk.f32.mxu0 %vm232_vm2, %v858_v3  ;;  %v849_v4 = vmul.f32 0.01, %v825_v57  ;;  %vm837_vm9 = vcmp.ge.f32.partialorder %v825_v57, 0.0 }
 0x40e   :  { %1437 = vmatmul.mubr.msk.f32.gmra.mxu0 %vm232_vm2, %v859_v61  ;;  %v808_v1 = vmul.f32 %v1908_v54, %v790_v60  ;;  %v827_v0 = vadd.f32 %v1913_v62, %v809_v21  ;;  %vm836_vm8 = vcmp.ge.f32.partialorder %v824_v63, 0.0  ;;  %v848_v2 = vmul.f32 0.01, %v824_v63 }
 0x40f   :  { %v861_v6 = vsel %vm837_vm9, %v825_v57, %v849_v4 }
 0x410   :  { %v826_v5 = vadd.f32 %v1913_v62, %v808_v1  ;;  %v860_v7 = vsel %vm836_vm8, %v824_v63, %v848_v2  ;;  %v851_v8 = vmul.f32 0.01, %v827_v0  ;;  %vm839_vm11 = vcmp.ge.f32.partialorder %v827_v0, 0.0  ;;  %v1313_v62 = vld [vmem:[%s2158_s10] ss:$0 sm:$0xff] }
 0x411   :  { %1439 = vmatprep.mubr.msk.f32.mxu0 %vm232_vm2, %v860_v7 }
 0x412   :  { %vm838_vm10 = vcmp.ge.f32.partialorder %v826_v5, 0.0  ;;  %v850_v13 = vmul.f32 0.01, %v826_v5  ;;  %1440 = vmatmul.mubr.msk.f32.gmra.mxu0 %vm232_vm2, %v861_v6  ;;  %v863_v54 = vsel %vm839_vm11, %v827_v0, %v851_v8 }
 0x414   :  { %v862_v14 = vsel %vm838_vm10, %v826_v5, %v850_v13 }
 0x415   :  { %1442 = vmatprep.mubr.msk.f32.mxu0 %vm232_vm2, %v862_v14 }
 0x416   :  { %1443 = vmatmul.mubr.msk.f32.gmra.mxu0 %vm232_vm2, %v863_v54 }
 0x4c2   :  { %v1429_v9 = vpop.f32.mrf.mxu0 }
 0x4c3   :  { %v985_v10 = vadd.f32 %v1429_v9, %v1313_v62 }
 0x4c4   :  { %v979_v24 = vpop.f32.mrf.mxu0 }
 0x4c5   :  { %v980_v11 = vadd.f32 %v1313_v62, %v979_v24  ;;  %v1041_v12 = vsel %vm232_vm2, %v985_v10, 0.0 }
 0x4c6   :  { %1042 = vadd.xlane.f32.xlu1 %v1041_v12  ;;  %v1432_v15 = vpop.f32.mrf.mxu0 }
 0x4c7   :  { %v995_v16 = vadd.f32 %v1432_v15, %v1313_v62  ;;  %v1038_v17 = vsel %vm232_vm2, %v980_v11, 0.0 }
 0x4c8   :  { %1039 = vadd.xlane.f32.xlu0 %v1038_v17  ;;  %v989_v18 = vpop.f32.mrf.mxu0 }
 0x4c9   :  { %v990_v20 = vadd.f32 %v1313_v62, %v989_v18  ;;  %v1047_v29 = vsel %vm232_vm2, %v995_v16, 0.0 }
 0x4ca   :  { %1048 = vadd.xlane.f32.xlu1 %v1047_v29  ;;  %v1435_v23 = vpop.f32.mrf.mxu0 }
 0x4cb   :  { %v1005_v22 = vadd.f32 %v1435_v23, %v1313_v62  ;;  %v1044_v35 = vsel %vm232_vm2, %v990_v20, 0.0 }
 0x4cc   :  { %1045 = vadd.xlane.f32.xlu0 %v1044_v35  ;;  %v999_v25 = vpop.f32.mrf.mxu0 }
 0x4cd   :  { %v1000_v26 = vadd.f32 %v1313_v62, %v999_v25  ;;  %v1053_v28 = vsel %vm232_vm2, %v1005_v22, 0.0 }
 0x4ce   :  { %1054 = vadd.xlane.f32.xlu1 %v1053_v28  ;;  %v1438_v30 = vpop.f32.mrf.mxu0 }
 0x4cf   :  { %v1015_v31 = vadd.f32 %v1438_v30, %v1313_v62  ;;  %v1050_v33 = vsel %vm232_vm2, %v1000_v26, 0.0 }
 0x4d0   :  { %1051 = vadd.xlane.f32.xlu0 %v1050_v33  ;;  %v1009_v38 = vpop.f32.mrf.mxu0 }
 0x4d1   :  { %v1010_v32 = vadd.f32 %v1313_v62, %v1009_v38  ;;  %v1059_v36 = vsel %vm232_vm2, %v1015_v31, 0.0 }
 0x4d2   :  { %1060 = vadd.xlane.f32.xlu1 %v1059_v36  ;;  %v1441_v43 = vpop.f32.mrf.mxu0 }
 0x4d3   :  { %v1056_v37 = vsel %vm232_vm2, %v1010_v32, 0.0  ;;  %v1974_v34 = vadd.f32 %v1441_v43, %v1313_v62 }
 0x4d4   :  { %1057 = vadd.xlane.f32.xlu0 %v1056_v37  ;;  %v1019_v52 = vpop.f32.mrf.mxu0 }
 0x4d5   :  { %v1976_v39 = vadd.f32 %v1313_v62, %v1019_v52  ;;  %v1065_v40 = vsel %vm232_vm2, %v1974_v34, 0.0 }
 0x4d6   :  { %1066 = vadd.xlane.f32.xlu1 %v1065_v40  ;;  %v1444_v42 = vpop.f32.mrf.mxu0 }
 0x4d7   :  { %v1980_v47 = vadd.f32 %v1444_v42, %v1313_v62  ;;  %v1062_v41 = vsel %vm232_vm2, %v1976_v39, 0.0 }
 0x4d8   :  { %1063 = vadd.xlane.f32.xlu0 %v1062_v41  ;;  %v1029_v44 = vpop.f32.mrf.mxu0 }
 0x4d9   :  { %v1984_v19 = vadd.f32 %v1313_v62, %v1029_v44  ;;  %v1071_v58 = vsel %vm232_vm2, %v1980_v47, 0.0 }
 0x4da   :  { %1072 = vadd.xlane.f32.xlu1 %v1071_v58 }
 0x4db   :  { %v1068_v45 = vsel %vm232_vm2, %v1984_v19, 0.0 }
 0x4dc   :  { %1069 = vadd.xlane.f32.xlu0 %v1068_v45 }
 0x54f   :  { %v1043_v46 = vpop.xlane.xlu1 %1042 }
 0x550   :  { %v1075_v59 = vmul.f32 0.03125, %v1043_v46 }
 0x551   :  { %v1040_v27 = vpop.xlane.xlu0 %1039 }
 0x552   :  { %v1990_v48 = vsub.f32 %v985_v10, %v1075_v59  ;;  %v1074_v49 = vmul.f32 0.03125, %v1040_v27 }
 0x553   :  { %v1049_v50 = vpop.xlane.xlu1 %1048 }
 0x554   :  { %v1992_v51 = vsub.f32 %v980_v11, %v1074_v49  ;;  %v1077_v53 = vmul.f32 0.03125, %v1049_v50  ;;  %v1099_v55 = vmul.f32 %v1990_v48, %v1990_v48 }
 0x555   :  { %v1046_v56 = vpop.xlane.xlu0 %1045 }
 0x556   :  { %v1996_v57 = vsub.f32 %v995_v16, %v1077_v53  ;;  %v1076_v3 = vmul.f32 0.03125, %v1046_v56  ;;  %v1113_v60 = vsel %vm232_vm2, %v1099_v55, 0.0  ;;  %v1098_v21 = vmul.f32 %v1992_v51, %v1992_v51 }
 0x557   :  { %v1055_v61 = vpop.xlane.xlu1 %1054  ;;  %1114 = vadd.xlane.f32.xlu1 %v1113_v60 }
 0x558   :  { %v2001_v63 = vsub.f32 %v990_v20, %v1076_v3  ;;  %v1079_v4 = vmul.f32 0.03125, %v1055_v61  ;;  %v1110_v1 = vsel %vm232_vm2, %v1098_v21, 0.0  ;;  %v1101_v0 = vmul.f32 %v1996_v57, %v1996_v57 }
 0x559   :  { %1111 = vadd.xlane.f32.xlu0 %v1110_v1  ;;  %v1052_v2 = vpop.xlane.xlu0 %1051 }
 0x55a   :  { %v2006_v5 = vsub.f32 %v1005_v22, %v1079_v4  ;;  %v1078_v7 = vmul.f32 0.03125, %v1052_v2  ;;  %v1119_v6 = vsel %vm232_vm2, %v1101_v0, 0.0  ;;  %v1100_v13 = vmul.f32 %v2001_v63, %v2001_v63 }
 0x55b   :  { %v1061_v8 = vpop.xlane.xlu1 %1060  ;;  %1120 = vadd.xlane.f32.xlu1 %v1119_v6 }
 0x55c   :  { %v2011_v14 = vsub.f32 %v1000_v26, %v1078_v7  ;;  %v1081_v54 = vmul.f32 0.03125, %v1061_v8  ;;  %v1116_v62 = vsel %vm232_vm2, %v1100_v13, 0.0  ;;  %v1103_v9 = vmul.f32 %v2006_v5, %v2006_v5 }
 0x55d   :  { %1117 = vadd.xlane.f32.xlu0 %v1116_v62  ;;  %v1058_v10 = vpop.xlane.xlu0 %1057 }
 0x55e   :  { %v2016_v24 = vsub.f32 %v1015_v31, %v1081_v54  ;;  %v1080_v11 = vmul.f32 0.03125, %v1058_v10  ;;  %v1125_v12 = vsel %vm232_vm2, %v1103_v9, 0.0  ;;  %v1102_v15 = vmul.f32 %v2011_v14, %v2011_v14  ;;  %v2057_v9 = vld [vmem:[%s2159_s11] ss:$0 sm:$0xff] }
 0x55f   :  { %1126 = vadd.xlane.f32.xlu1 %v1125_v12  ;;  %v1067_v17 = vpop.xlane.xlu1 %1066 }
 0x560   :  { %v2021_v16 = vsub.f32 %v1010_v32, %v1080_v11  ;;  %v1122_v18 = vsel %vm232_vm2, %v1102_v15, 0.0  ;;  %v1105_v20 = vmul.f32 %v2016_v24, %v2016_v24  ;;  %v1083_v29 = vmul.f32 0.03125, %v1067_v17  ;;  %v2063_v17 = vld [vmem:[%s2160_s12] ss:$0 sm:$0xff] }
 0x561   :  { %1123 = vadd.xlane.f32.xlu0 %v1122_v18  ;;  %v1064_v23 = vpop.xlane.xlu0 %1063 }
 0x562   :  { %v1131_v22 = vsel %vm232_vm2, %v1105_v20, 0.0  ;;  %v1104_v35 = vmul.f32 %v2021_v16, %v2021_v16  ;;  %v2030_v25 = vsub.f32 %v1974_v34, %v1083_v29  ;;  %v1082_v26 = vmul.f32 0.03125, %v1064_v23 }
 0x563   :  { %1132 = vadd.xlane.f32.xlu1 %v1131_v22  ;;  %v1073_v28 = vpop.xlane.xlu1 %1072 }
 0x564   :  { %v1128_v30 = vsel %vm232_vm2, %v1104_v35, 0.0  ;;  %v2034_v31 = vsub.f32 %v1976_v39, %v1082_v26  ;;  %v1085_v33 = vmul.f32 0.03125, %v1073_v28  ;;  %v1107_v38 = vmul.f32 %v2030_v25, %v2030_v25 }
 0x565   :  { %1129 = vadd.xlane.f32.xlu0 %v1128_v30  ;;  %v1070_v32 = vpop.xlane.xlu0 %1069 }
 0x566   :  { %v2039_v36 = vsub.f32 %v1980_v47, %v1085_v33  ;;  %v1084_v43 = vmul.f32 0.03125, %v1070_v32  ;;  %v1137_v37 = vsel %vm232_vm2, %v1107_v38, 0.0  ;;  %v1106_v34 = vmul.f32 %v2034_v31, %v2034_v31 }
 0x567   :  { %1138 = vadd.xlane.f32.xlu1 %v1137_v37 }
 0x568   :  { %v2045_v52 = vsub.f32 %v1984_v19, %v1084_v43  ;;  %v1134_v39 = vsel %vm232_vm2, %v1106_v34, 0.0  ;;  %v1109_v40 = vmul.f32 %v2039_v36, %v2039_v36 }
 0x569   :  { %1135 = vadd.xlane.f32.xlu0 %v1134_v39 }
 0x56a   :  { %v1143_v42 = vsel %vm232_vm2, %v1109_v40, 0.0  ;;  %v1108_v47 = vmul.f32 %v2045_v52, %v2045_v52 }
 0x56b   :  { %1144 = vadd.xlane.f32.xlu1 %v1143_v42 }
 0x56c   :  { %v1140_v41 = vsel %vm232_vm2, %v1108_v47, 0.0 }
 0x56d   :  { %1141 = vadd.xlane.f32.xlu0 %v1140_v41 }
 0x5e0   :  { %v1115_v44 = vpop.xlane.xlu1 %1114 }
 0x5e1   :  { %v1147_v58 = vmul.f32 0.03125, %v1115_v44 }
 0x5e2   :  { %v1112_v45 = vpop.xlane.xlu0 %1111 }
 0x5e3   :  { %v1159_v19 = vadd.f32 1e-05, %v1147_v58  ;;  %v1146_v46 = vmul.f32 0.03125, %v1112_v45 }
 0x5e4   :  { %v1121_v59 = vpop.xlane.xlu1 %1120 }
 0x5e5   :  { %1495 = vrsqrt.f32 %v1159_v19  ;;  %v1158_v27 = vadd.f32 1e-05, %v1146_v46  ;;  %v1149_v49 = vmul.f32 0.03125, %v1121_v59 }
 0x5e6   :  { %v1118_v50 = vpop.xlane.xlu0 %1117 }
 0x5e7   :  { %1497 = vrsqrt.f32 %v1158_v27  ;;  %v1161_v53 = vadd.f32 1e-05, %v1149_v49  ;;  %v1148_v55 = vmul.f32 0.03125, %v1118_v50 }
 0x5e8   :  { %v1127_v56 = vpop.xlane.xlu1 %1126 }
 0x5e9   :  { %1499 = vrsqrt.f32 %v1161_v53  ;;  %v1160_v3 = vadd.f32 1e-05, %v1148_v55  ;;  %v1151_v60 = vmul.f32 0.03125, %v1127_v56 }
 0x5ea   :  { %v1124_v21 = vpop.xlane.xlu0 %1123 }
 0x5eb   :  { %1501 = vrsqrt.f32 %v1160_v3  ;;  %v1163_v61 = vadd.f32 1e-05, %v1151_v60  ;;  %v1150_v4 = vmul.f32 0.03125, %v1124_v21 }
 0x5ec   :  { %v1133_v1 = vpop.xlane.xlu1 %1132 }
 0x5ed   :  { %1503 = vrsqrt.f32 %v1163_v61  ;;  %v1162_v0 = vadd.f32 1e-05, %v1150_v4  ;;  %v1153_v2 = vmul.f32 0.03125, %v1133_v1 }
 0x5ee   :  { %v1130_v7 = vpop.xlane.xlu0 %1129 }
 0x5ef   :  { %1505 = vrsqrt.f32 %v1162_v0  ;;  %v1165_v6 = vadd.f32 1e-05, %v1153_v2  ;;  %v1152_v13 = vmul.f32 0.03125, %v1130_v7 }
 0x5f0   :  { %v1139_v54 = vpop.xlane.xlu1 %1138 }
 0x5f1   :  { %1507 = vrsqrt.f32 %v1165_v6  ;;  %v1164_v8 = vadd.f32 1e-05, %v1152_v13  ;;  %v1155_v10 = vmul.f32 0.03125, %v1139_v54 }
 0x5f2   :  { %v1496_v62 = vpop.eup %1495  ;;  %v1136_v12 = vpop.xlane.xlu0 %1135 }
 0x5f3   :  { %v1183_v11 = vmul.f32 %v1496_v62, %v1990_v48  ;;  %1509 = vrsqrt.f32 %v1164_v8  ;;  %v1167_v18 = vadd.f32 1e-05, %v1155_v10  ;;  %v1154_v20 = vmul.f32 0.03125, %v1136_v12 }
 0x5f4   :  { %v1498_v15 = vpop.eup %1497  ;;  %v1145_v22 = vpop.xlane.xlu1 %1144 }
 0x5f5   :  { %v1201_v29 = vmul.f32 %v2057_v9, %v1183_v11  ;;  %v1182_v23 = vmul.f32 %v1498_v15, %v1992_v51  ;;  %1511 = vrsqrt.f32 %v1167_v18  ;;  %v1166_v26 = vadd.f32 1e-05, %v1154_v20 }
 0x5f6   :  { %v1500_v35 = vpop.eup %1499  ;;  %v1157_v28 = vmul.f32 0.03125, %v1145_v22  ;;  %v1142_v38 = vpop.xlane.xlu0 %1141 }
 0x5f7   :  { %v1219_v48 = vadd.f32 %v2063_v17, %v1201_v29  ;;  %v1200_v30 = vmul.f32 %v2057_v9, %v1182_v23  ;;  %v1185_v33 = vmul.f32 %v1500_v35, %v1996_v57  ;;  %1513 = vrsqrt.f32 %v1166_v26 }
 0x5f8   :  { %v1502_v32 = vpop.eup %1501  ;;  %v1169_v43 = vadd.f32 1e-05, %v1157_v28  ;;  %v1156_v37 = vmul.f32 0.03125, %v1142_v38 }
 0x5f9   :  { %vm1231_vm12 = vcmp.ge.f32.partialorder %v1219_v48, 0.0  ;;  %v1243_v34 = vmul.f32 0.01, %v1219_v48  ;;  %v1218_v51 = vadd.f32 %v2063_v17, %v1200_v30  ;;  %v1203_v39 = vmul.f32 %v2057_v9, %v1185_v33 }
 0x5fa   :  { %v1504_v40 = vpop.eup %1503  ;;  %v1184_v42 = vmul.f32 %v1502_v32, %v2001_v63  ;;  %1515 = vrsqrt.f32 %v1169_v43  ;;  %v1168_v47 = vadd.f32 1e-05, %v1156_v37 }
 0x5fb   :  { %v1255_v41 = vsel %vm1231_vm12, %v1219_v48, %v1243_v34  ;;  %vm1230_vm13 = vcmp.ge.f32.partialorder %v1218_v51, 0.0  ;;  %v1242_v44 = vmul.f32 0.01, %v1218_v51  ;;  %v1221_v57 = vadd.f32 %v2063_v17, %v1203_v39 }
 0x5fc   :  { %v1506_v58 = vpop.eup %1505  ;;  %1267 = vst.msk [vmem:[%s2161_s13 + $0x8] sm:$0xff] %vm232_vm2, %v1255_v41  ;;  %v1202_v45 = vmul.f32 %v2057_v9, %v1184_v42  ;;  %v1187_v19 = vmul.f32 %v1504_v40, %v2006_v5  ;;  %1517 = vrsqrt.f32 %v1168_v47 }
 0x5fd   :  { %v1254_v46 = vsel %vm1230_vm13, %v1218_v51, %v1242_v44  ;;  %vm1233_vm14 = vcmp.ge.f32.partialorder %v1221_v57, 0.0  ;;  %v1245_v63 = vmul.f32 0.01, %v1221_v57  ;;  %v1186_v59 = vmul.f32 %v1506_v58, %v2011_v14 }
 0x5fe   :  { %v1508_v27 = vpop.eup %1507  ;;  %1266 = vst.msk [vmem:[%s2161_s13] sm:$0xff] %vm232_vm2, %v1254_v46  ;;  %v1220_v49 = vadd.f32 %v2063_v17, %v1202_v45  ;;  %v1205_v50 = vmul.f32 %v2057_v9, %v1187_v19 }
 0x5ff   :  { %v1257_v53 = vsel %vm1233_vm14, %v1221_v57, %v1245_v63  ;;  %v1204_v55 = vmul.f32 %v2057_v9, %v1186_v59  ;;  %v1189_v5 = vmul.f32 %v1508_v27, %v2016_v24 }
 0x600   :  { %v1510_v56 = vpop.eup %1509  ;;  %1269 = vst.msk [vmem:[%s2161_s13 + $0x18] sm:$0xff] %vm232_vm2, %v1257_v53  ;;  %vm1232_vm15 = vcmp.ge.f32.partialorder %v1220_v49, 0.0  ;;  %v1244_v14 = vmul.f32 0.01, %v1220_v49  ;;  %v1223_v3 = vadd.f32 %v2063_v17, %v1205_v50 }
 0x601   :  { %v1222_v60 = vadd.f32 %v2063_v17, %v1204_v55  ;;  %v1207_v21 = vmul.f32 %v2057_v9, %v1189_v5  ;;  %v1188_v61 = vmul.f32 %v1510_v56, %v2021_v16 }
 0x602   :  { %v1256_v4 = vsel %vm1232_vm15, %v1220_v49, %v1244_v14  ;;  %vm1235_vm0 = vcmp.ge.f32.partialorder %v1223_v3, 0.0  ;;  %v1247_v1 = vmul.f32 0.01, %v1223_v3  ;;  %v1512_v24 = vpop.eup %1511 }
 0x603   :  { %1268 = vst.msk [vmem:[%s2161_s13 + $0x10] sm:$0xff] %vm232_vm2, %v1256_v4  ;;  %vm1234_vm1 = vcmp.ge.f32.partialorder %v1222_v60, 0.0  ;;  %v1246_v0 = vmul.f32 0.01, %v1222_v60  ;;  %v1225_v2 = vadd.f32 %v2063_v17, %v1207_v21  ;;  %v1206_v7 = vmul.f32 %v2057_v9, %v1188_v61 }
 0x604   :  { %v1259_v6 = vsel %vm1235_vm0, %v1223_v3, %v1247_v1  ;;  %v1191_v13 = vmul.f32 %v1512_v24, %v2030_v25  ;;  %v1514_v8 = vpop.eup %1513 }
 0x605   :  { %1271 = vst.msk [vmem:[%s2161_s13 + $0x28] sm:$0xff] %vm232_vm2, %v1259_v6  ;;  %v1258_v16 = vsel %vm1234_vm1, %v1222_v60, %v1246_v0  ;;  %vm1237_vm3 = vcmp.ge.f32.partialorder %v1225_v2, 0.0  ;;  %v1249_v54 = vmul.f32 0.01, %v1225_v2  ;;  %v1224_v62 = vadd.f32 %v2063_v17, %v1206_v7 }
 0x606   :  { %1270 = vst.msk [vmem:[%s2161_s13 + $0x20] sm:$0xff] %vm232_vm2, %v1258_v16  ;;  %v1209_v10 = vmul.f32 %v2057_v9, %v1191_v13  ;;  %v1190_v25 = vmul.f32 %v1514_v8, %v2034_v31 }
 0x607   :  { %v1516_v11 = vpop.eup %1515  ;;  %v1261_v12 = vsel %vm1237_vm3, %v1225_v2, %v1249_v54  ;;  %vm1236_vm4 = vcmp.ge.f32.partialorder %v1224_v62, 0.0  ;;  %v1248_v15 = vmul.f32 0.01, %v1224_v62 }
 0x608   :  { %1273 = vst.msk [vmem:[%s2161_s13 + $0x38] sm:$0xff] %vm232_vm2, %v1261_v12  ;;  %v1227_v18 = vadd.f32 %v2063_v17, %v1209_v10  ;;  %v1208_v20 = vmul.f32 %v2057_v9, %v1190_v25  ;;  %v1193_v29 = vmul.f32 %v1516_v11, %v2039_v36 }
 0x609   :  { %v1518_v23 = vpop.eup %1517  ;;  %v1260_v22 = vsel %vm1236_vm4, %v1224_v62, %v1248_v15 }
 0x60a   :  { %1272 = vst.msk [vmem:[%s2161_s13 + $0x30] sm:$0xff] %vm232_vm2, %v1260_v22  ;;  %vm1239_vm5 = vcmp.ge.f32.partialorder %v1227_v18, 0.0  ;;  %v1251_v31 = vmul.f32 0.01, %v1227_v18  ;;  %v1226_v35 = vadd.f32 %v2063_v17, %v1208_v20  ;;  %v1211_v26 = vmul.f32 %v2057_v9, %v1193_v29 }
 0x60b   :  { %v1192_v28 = vmul.f32 %v1518_v23, %v2045_v52 }
 0x60c   :  { %v1263_v48 = vsel %vm1239_vm5, %v1227_v18, %v1251_v31  ;;  %vm1238_vm6 = vcmp.ge.f32.partialorder %v1226_v35, 0.0  ;;  %v1250_v30 = vmul.f32 0.01, %v1226_v35  ;;  %v1229_v36 = vadd.f32 %v2063_v17, %v1211_v26 }
 0x60d   :  { %1275 = vst.msk [vmem:[%s2161_s13 + $0x48] sm:$0xff] %vm232_vm2, %v1263_v48  ;;  %v1210_v33 = vmul.f32 %v2057_v9, %v1192_v28 }
 0x60e   :  { %v1262_v38 = vsel %vm1238_vm6, %v1226_v35, %v1250_v30  ;;  %vm1241_vm7 = vcmp.ge.f32.partialorder %v1229_v36, 0.0  ;;  %v1253_v32 = vmul.f32 0.01, %v1229_v36 }
 0x60f   :  { %1274 = vst.msk [vmem:[%s2161_s13 + $0x40] sm:$0xff] %vm232_vm2, %v1262_v38  ;;  %v1228_v52 = vadd.f32 %v2063_v17, %v1210_v33 }
 0x610   :  { %v1265_v43 = vsel %vm1241_vm7, %v1229_v36, %v1253_v32 }
 0x611   :  { %1277 = vst.msk [vmem:[%s2161_s13 + $0x58] sm:$0xff] %vm232_vm2, %v1265_v43  ;;  %vm1240_vm8 = vcmp.ge.f32.partialorder %v1228_v52, 0.0  ;;  %v1252_v37 = vmul.f32 0.01, %v1228_v52 }
 0x613   :  { %v1264_v34 = vsel %vm1240_vm8, %v1228_v52, %v1252_v37 }
 0x614   :  { %1276 = vst.msk [vmem:[%s2161_s13 + $0x50] sm:$0xff] %vm232_vm2, %v1264_v34 }

// kernel: mfcc_decoder_forward.5
= control target key start
LH: loop header
LB: loop body
LE: loop exit
PB: predicated region body
PF: predicated region fallthrough
CT: control target
= control target key end

     0   :  { %v1221_v0 = vmov 0.0   ;;  %vm55_vm0 = vcmask 523264   ;;  %vm1222_vm1 = vmmov 0   ;;  %s1223_s27 = smov 64   ;;  %vm252_vm2 = vcmask 254976   ;;  %s1599_s1 = inlined_call_operand.vmem [shape: f32[192,96], index: 1, kind: input, shape index: {}]   ;;  %s1600_s2 = inlined_call_operand.vmem [shape: f32[32,96], index: 2, kind: input, shape index: {}]   ;;  %s1601_s0 = inlined_call_operand.vmem [shape: f32[16,192], index: 0, kind: input, shape index: {}]   ;;  %s1602_s4 = inlined_call_operand.vmem [shape: f32[1,96], index: 4, kind: input, shape index: {}]   ;;  %s1603_s3 = inlined_call_operand.vmem [shape: f32[1,96], index: 3, kind: input, shape index: {}]   ;;  %s1604_s5 = inlined_call_operand.vmem [shape: f32[16,32], index: 5, kind: output, shape index: {}]  }
   0x1   :  { %62 = vmatprep.subr.mxu0 %v1221_v0  ;;  %1081 = vmatprep.subr.mxu1 %v1221_v0  ;;  %v39_v1 = vld [vmem:[%s1599_s1 + $0x78] sm:$0xff]  ;;  %v38_v3 = vld [vmem:[%s1599_s1 + $0x70] sm:$0xff]  ;;  %v37_v5 = vld [vmem:[%s1599_s1 + $0x68] sm:$0xff]  ;;  %vm148_vm3 = vcmask 261120   ;;  %vm360_vm4 = vcmask 257026   ;;  %vm582_vm5 = vcmask 261126  }
   0x2   :  { %v1263_v2 = vld [vmem:[%s1600_s2 + $0x18] sm:$0xff]  ;;  %63 = vmatpush1.msra.mxu0 %v39_v1  ;;  %v1272_v4 = vld [vmem:[%s1600_s2 + $0x10] sm:$0xff]  ;;  %v1282_v6 = vld [vmem:[%s1600_s2 + $0x8] sm:$0xff]  ;;  %1089 = vmatprep.mubr.msk.f32.mxu1 %vm1222_vm1, %v1221_v0  ;;  %vm471_vm6 = vcmask 259076  }
   0x3   :  { %1082 = vmatpush3.msra.mxu1 %v1263_v2  ;;  %64 = vmatprep.subr.mxu0 %v1221_v0  ;;  %v36_v7 = vld [vmem:[%s1599_s1 + $0x60] sm:$0xff]  ;;  %v35_v9 = vld [vmem:[%s1599_s1 + $0x58] sm:$0xff]  ;;  %v34_v10 = vld [vmem:[%s1599_s1 + $0x50] sm:$0xff] }
   0x4   :  { %1083 = vmatprep.subr.mxu1 %v1221_v0  ;;  %65 = vmatpush1.msra.mxu0 %v38_v3  ;;  %v1293_v8 = vld [vmem:[%s1600_s2] sm:$0xff]  ;;  %v21_v11 = vld [vmem:[%s1601_s0 + $0x8] sm:$0xff]  ;;  %v31_v14 = vld [vmem:[%s1599_s1 + $0x38] sm:$0xff] }
   0x5   :  { %1084 = vmatpush3.msra.mxu1 %v1272_v4  ;;  %66 = vmatprep.subr.mxu0 %v1221_v0  ;;  %v33_v12 = vld [vmem:[%s1599_s1 + $0x48] sm:$0xff]  ;;  %v32_v13 = vld [vmem:[%s1599_s1 + $0x40] sm:$0xff]  ;;  %v30_v15 = vld [vmem:[%s1599_s1 + $0x30] sm:$0xff] }
   0x6   :  { %1085 = vmatprep.subr.mxu1 %v1221_v0  ;;  %67 = vmatpush1.msra.mxu0 %v37_v5  ;;  %v29_v16 = vld [vmem:[%s1599_s1 + $0x28] sm:$0xff]  ;;  %v28_v17 = vld [vmem:[%s1599_s1 + $0x20] sm:$0xff]  ;;  %v27_v18 = vld [vmem:[%s1599_s1 + $0x18] sm:$0xff] }
   0x7   :  { %1086 = vmatpush3.msra.mxu1 %v1282_v6  ;;  %68 = vmatprep.subr.mxu0 %v1221_v0  ;;  %v26_v19 = vld [vmem:[%s1599_s1 + $0x10] sm:$0xff]  ;;  %v25_v20 = vld [vmem:[%s1599_s1 + $0x8] sm:$0xff]  ;;  %v24_v21 = vld [vmem:[%s1599_s1] sm:$0xff] }
   0x8   :  { %1087 = vmatprep.subr.mxu1 %v1221_v0  ;;  %69 = vmatpush1.msra.mxu0 %v36_v7  ;;  %v47_v22 = vld [vmem:[%s1599_s1 + $0xb8] sm:$0xff]  ;;  %v46_v23 = vld [vmem:[%s1599_s1 + $0xb0] sm:$0xff]  ;;  %v45_v24 = vld [vmem:[%s1599_s1 + $0xa8] sm:$0xff] }
   0x9   :  { %1088 = vmatpush3.msra.mxu1 %v1293_v8  ;;  %70 = vmatprep.subr.mxu0 %v1221_v0  ;;  %v44_v25 = vld [vmem:[%s1599_s1 + $0xa0] sm:$0xff]  ;;  %v43_v26 = vld [vmem:[%s1599_s1 + $0x98] sm:$0xff]  ;;  %v42_v27 = vld [vmem:[%s1599_s1 + $0x90] sm:$0xff] }
   0xa   :  { %1090 = vmatmul.mubr.f32.vlgmr.msra.gmra.mxu1 %v1221_v0  ;;  %71 = vmatpush1.msra.mxu0 %v35_v9  ;;  %v41_v28 = vld [vmem:[%s1599_s1 + $0x88] sm:$0xff]  ;;  %v40_v29 = vld [vmem:[%s1599_s1 + $0x80] sm:$0xff] }
   0xb   :  { %72 = vmatprep.subr.mxu0 %v1221_v0  ;;  %1023 = vmatprep.mubr.msk.f32.mxu0 %vm55_vm0, %v21_v11  ;;  %v20_v30 = vld [vmem:[%s1601_s0] sm:$0xff] }
   0xc   :  { %73 = vmatpush1.msra.mxu0 %v34_v10  ;;  %1092 = vmatprep.subr.mxu1 %v1221_v0  ;;  %v1411_v31 = vld [vmem:[%s1602_s4] ss:$0 sm:$0xff] }
   0xd   :  { %74 = vmatprep.subr.mxu0 %v1221_v0  ;;  %1093 = vmatpush3.msra.mxu1 %v1263_v2  ;;  %v1418_v37 = vld [vmem:[%s1603_s3] ss:$0 sm:$0xff]  ;;  %s1224_s3 = smov 96  }
   0xe   :  { %75 = vmatpush1.msra.mxu0 %v33_v12  ;;  %1094 = vmatprep.subr.mxu1 %v1221_v0 }
   0xf   :  { %76 = vmatprep.subr.mxu0 %v1221_v0  ;;  %1095 = vmatpush3.msra.mxu1 %v1272_v4 }
  0x10   :  { %77 = vmatpush1.msra.mxu0 %v32_v13  ;;  %1096 = vmatprep.subr.mxu1 %v1221_v0 }
  0x11   :  { %78 = vmatprep.subr.mxu0 %v1221_v0  ;;  %1097 = vmatpush3.msra.mxu1 %v1282_v6 }
  0x12   :  { %79 = vmatpush1.msra.mxu0 %v31_v14  ;;  %1098 = vmatprep.subr.mxu1 %v1221_v0 }
  0x13   :  { %80 = vmatprep.subr.mxu0 %v1221_v0  ;;  %1099 = vmatpush3.msra.mxu1 %v1293_v8 }
  0x14   :  { %81 = vmatpush1.msra.mxu0 %v30_v15  ;;  %1100 = vmatprep.mubr.msk.f32.mxu1 %vm1222_vm1, %v1221_v0 }
  0x15   :  { %82 = vmatprep.subr.mxu0 %v1221_v0  ;;  %1103 = vmatprep.subr.mxu1 %v1221_v0 }
  0x16   :  { %83 = vmatpush1.msra.mxu0 %v29_v16 }
  0x17   :  { %84 = vmatprep.subr.mxu0 %v1221_v0 }
  0x18   :  { %85 = vmatpush1.msra.mxu0 %v28_v17 }
  0x19   :  { %86 = vmatprep.subr.mxu0 %v1221_v0 }
  0x1a   :  { %87 = vmatpush1.msra.mxu0 %v27_v18 }
  0x1b   :  { %88 = vmatprep.subr.mxu0 %v1221_v0 }
  0x1c   :  { %89 = vmatpush1.msra.mxu0 %v26_v19 }
  0x1d   :  { %90 = vmatprep.subr.mxu0 %v1221_v0 }
  0x1e   :  { %91 = vmatpush1.msra.mxu0 %v25_v20 }
  0x1f   :  { %92 = vmatprep.subr.mxu0 %v1221_v0 }
  0x20   :  { %93 = vmatpush1.msra.mxu0 %v24_v21 }
  0x21   :  { %110 = vmatprep.subr.mxu0 %v1221_v0 }
  0x22   :  { %111 = vmatpush2.msra.mxu0 %v47_v22 }
  0x23   :  { %112 = vmatprep.subr.mxu0 %v1221_v0 }
  0x24   :  { %113 = vmatpush2.msra.mxu0 %v46_v23 }
  0x25   :  { %114 = vmatprep.subr.mxu0 %v1221_v0 }
  0x26   :  { %115 = vmatpush2.msra.mxu0 %v45_v24 }
  0x27   :  { %116 = vmatprep.subr.mxu0 %v1221_v0 }
  0x28   :  { %117 = vmatpush2.msra.mxu0 %v44_v25 }
  0x29   :  { %118 = vmatprep.subr.mxu0 %v1221_v0 }
  0x2a   :  { %119 = vmatpush2.msra.mxu0 %v43_v26 }
  0x2b   :  { %120 = vmatprep.subr.mxu0 %v1221_v0 }
  0x2c   :  { %121 = vmatpush2.msra.mxu0 %v42_v27 }
  0x2d   :  { %122 = vmatprep.subr.mxu0 %v1221_v0 }
  0x2e   :  { %123 = vmatpush2.msra.mxu0 %v41_v28 }
  0x2f   :  { %124 = vmatprep.subr.mxu0 %v1221_v0 }
  0x30   :  { %125 = vmatpush2.msra.mxu0 %v40_v29 }
  0x31   :  { %127 = vmatmul.mubr.f32.vlgmr.msra.gmra.mxu0 %v20_v30  ;;  %1147 = vmatprep.subr.mxu0 %v1221_v0 }
  0x32   :  { %1148 = vmatpush3.msra.mxu0 %v1263_v2 }
  0x33   :  { %1149 = vmatprep.subr.mxu0 %v1221_v0 }
  0x34   :  { %1150 = vmatpush3.msra.mxu0 %v1272_v4 }
  0x35   :  { %1151 = vmatprep.subr.mxu0 %v1221_v0 }
  0x36   :  { %1152 = vmatpush3.msra.mxu0 %v1282_v6 }
  0x37   :  { %1153 = vmatprep.subr.mxu0 %v1221_v0 }
  0x38   :  { %1154 = vmatpush3.msra.mxu0 %v1293_v8 }
  0xca   :  { %v218_v32 = vpop.f32.mrf.mxu1 }
  0xcb   :  { %v219_v33 = vadd.f32 %v1411_v31, %v218_v32 }
  0xcc   :  { %v1091_v34 = vpop.f32.mrf.mxu1 }
  0xcd   :  { %230 = vrot.lane.b32.xlu0 %v219_v33, %s1223_s27 }
  0xf1   :  { %v128_v35 = vpop.f32.mrf.mxu0 }
  0xf2   :  { %v1421_v38 = vadd.f32 %v1418_v37, %v128_v35 }
  0xf3   :  { %v130_v36 = vpop.f32.mrf.mxu0 }
  0xf4   :  { %v222_v39 = vadd.f32 %v219_v33, %v1421_v38 }
  0xf6   :  { %v1026_v40 = vmul.f32 -1.442695, %v222_v39 }
  0xf8   :  { %1173 = vpow2.f32 %v1026_v40 }
 0x105   :  { %v1174_v41 = vpop.eup %1173 }
 0x106   :  { %v226_v42 = vadd.f32 1.0, %v1174_v41 }
 0x108   :  { %1175 = vrcp.f32 %v226_v42 }
 0x115   :  { %v1176_v43 = vpop.eup %1175 }
 0x116   :  { %v240_v49 = vsub.f32 1.0, %v1176_v43  ;;  %v246_v51 = vmul.f32 0.0, %v1176_v43 }
 0x13f   :  { %v231_v44 = vpop.permute.xlu0 %230 }
 0x140   :  { %v233_v45 = vmul.f32 %v1176_v43, %v231_v44 }
 0x142   :  { %235 = vrot.lane.b32.xlu0 %v233_v45, %s1223_s27 }
 0x1b4   :  { %v236_v46 = vpop.permute.xlu0 %235 }
 0x1b5   :  { %v238_v47 = vadd.f32 %v236_v46, %v1421_v38 }
 0x1b7   :  { %1177 = vtanh.f32 %v238_v47 }
 0x1c4   :  { %v1178_v48 = vpop.eup %1177 }
 0x1c5   :  { %242 = vrot.lane.b32.xlu1 %v1178_v48, %s1224_s3 }
 0x237   :  { %v243_v50 = vpop.permute.xlu1 %242 }
 0x238   :  { %v245_v52 = vmul.f32 %v243_v50, %v240_v49 }
 0x23a   :  { %v247_v53 = vadd.f32 %v246_v51, %v245_v52 }
 0x23c   :  { %249 = vrot.lane.b32.xlu1 %v247_v53, %s1224_s3  ;;  %v352_v10 = vrot.slane %v247_v53, 6 }
 0x2ae   :  { %v250_v54 = vpop.permute.xlu1 %249 }
 0x2af   :  { %253 = vst.msk [vmem:[%s1604_s5] sm:$0x3] %vm252_vm2, %v250_v54  ;;  %1101 = vmatmul.mubr.msk.f32.vlgmr.msra.gmra.mxu1 %vm148_vm3, %v250_v54 }
 0x2b0   :  { %1104 = vmatpush3.msra.mxu1 %v1263_v2  ;;  %1111 = vmatprep.mubr.msk.f32.mxu1 %vm1222_vm1, %v1221_v0 }
 0x2b1   :  { %1105 = vmatprep.subr.mxu1 %v1221_v0 }
 0x2b2   :  { %1106 = vmatpush3.msra.mxu1 %v1272_v4 }
 0x2b3   :  { %1107 = vmatprep.subr.mxu1 %v1221_v0 }
 0x2b4   :  { %1108 = vmatpush3.msra.mxu1 %v1282_v6 }
 0x2b5   :  { %1109 = vmatprep.subr.mxu1 %v1221_v0 }
 0x2b6   :  { %1110 = vmatpush3.msra.mxu1 %v1293_v8 }
 0x2b7   :  { %1114 = vmatprep.subr.mxu1 %v1221_v0 }
 0x36f   :  { %v322_v55 = vpop.f32.mrf.mxu1 }
 0x370   :  { %v323_v56 = vadd.f32 %v1411_v31, %v322_v55 }
 0x371   :  { %v1102_v57 = vpop.f32.mrf.mxu1 }
 0x372   :  { %v327_v58 = vrot.slane %v323_v56, 6  ;;  %v23_v56 = vld [vmem:[%s1601_s0 + $0x18] sm:$0xff] }
 0x373   :  { %1024 = vmatprep.mubr.msk.f32.mxu0 %vm55_vm0, %v23_v56 }
 0x374   :  { %336 = vrot.lane.b32.xlu0 %v327_v58, %s1223_s27  ;;  %v329_v59 = vadd.f32 %v327_v58, %v1421_v38  ;;  %v22_v58 = vld [vmem:[%s1601_s0 + $0x10] sm:$0xff] }
 0x375   :  { %132 = vmatmul.mubr.f32.gmra.mxu0 %v22_v58 }
 0x376   :  { %v1028_v60 = vmul.f32 -1.442695, %v329_v59  ;;  %1155 = vmatprep.mubr.msk.f32.mxu0 %vm1222_vm1, %v1221_v0 }
 0x378   :  { %1179 = vpow2.f32 %v1028_v60 }
 0x385   :  { %v1180_v61 = vpop.eup %1179 }
 0x386   :  { %v333_v62 = vadd.f32 1.0, %v1180_v61 }
 0x388   :  { %1181 = vrcp.f32 %v333_v62 }
 0x395   :  { %v1182_v63 = vpop.eup %1181 }
 0x396   :  { %v346_v11 = vsub.f32 1.0, %v1182_v63  ;;  %v354_v14 = vmul.f32 %v1182_v63, %v352_v10 }
 0x3e6   :  { %v337_v1 = vpop.permute.xlu0 %336 }
 0x3e7   :  { %v339_v3 = vmul.f32 %v1182_v63, %v337_v1 }
 0x3e9   :  { %341 = vrot.lane.b32.xlu1 %v339_v3, %s1223_s27 }
 0x45b   :  { %v342_v5 = vpop.permute.xlu1 %341 }
 0x45c   :  { %v344_v7 = vadd.f32 %v342_v5, %v1421_v38  ;;  %v133_v5 = vpop.f32.mrf.mxu0 }
 0x45e   :  { %1183 = vtanh.f32 %v344_v7  ;;  %v135_v7 = vpop.f32.mrf.mxu0 }
 0x46b   :  { %v1184_v9 = vpop.eup %1183 }
 0x46c   :  { %348 = vrot.lane.b32.xlu0 %v1184_v9, %s1224_s3 }
 0x4de   :  { %v349_v12 = vpop.permute.xlu0 %348 }
 0x4df   :  { %v351_v13 = vmul.f32 %v349_v12, %v346_v11  ;;  %v1520_v12 = vadd.f32 %v1418_v37, %v133_v5 }
 0x4e1   :  { %v1449_v15 = vadd.f32 %v354_v14, %v351_v13 }
 0x4e3   :  { %v362_v16 = vrot.slane %v1449_v15, 2  ;;  %v463_v34 = vrot.slane %v1449_v15, 6 }
 0x4e5   :  { %363 = vrot.lane.b32.xlu1 %v362_v16, %s1224_s3 }
 0x557   :  { %v364_v17 = vpop.permute.xlu1 %363 }
 0x558   :  { %1112 = vmatmul.mubr.msk.f32.vlgmr.msra.gmra.mxu1 %vm148_vm3, %v364_v17 }
 0x559   :  { %1115 = vmatpush3.msra.mxu1 %v1263_v2  ;;  %1122 = vmatprep.mubr.msk.f32.mxu1 %vm1222_vm1, %v1221_v0 }
 0x55a   :  { %1116 = vmatprep.subr.mxu1 %v1221_v0 }
 0x55b   :  { %1117 = vmatpush3.msra.mxu1 %v1272_v4 }
 0x55c   :  { %1118 = vmatprep.subr.mxu1 %v1221_v0 }
 0x55d   :  { %1119 = vmatpush3.msra.mxu1 %v1282_v6 }
 0x55e   :  { %1120 = vmatprep.subr.mxu1 %v1221_v0 }
 0x55f   :  { %1121 = vmatpush3.msra.mxu1 %v1293_v8 }
 0x560   :  { %1125 = vmatprep.subr.mxu1 %v1221_v0 }
 0x618   :  { %v433_v18 = vpop.f32.mrf.mxu1 }
 0x619   :  { %v434_v19 = vadd.f32 %v1411_v31, %v433_v18 }
 0x61a   :  { %v1113_v20 = vpop.f32.mrf.mxu1 }
 0x61b   :  { %v438_v21 = vrot.slane %v434_v19, 4 }
 0x61d   :  { %447 = vrot.lane.b32.xlu0 %v438_v21, %s1223_s27  ;;  %v440_v22 = vadd.f32 %v438_v21, %v1421_v38 }
 0x61f   :  { %v1030_v23 = vmul.f32 -1.442695, %v440_v22 }
 0x621   :  { %1185 = vpow2.f32 %v1030_v23 }
 0x62e   :  { %v1186_v24 = vpop.eup %1185 }
 0x62f   :  { %v444_v25 = vadd.f32 1.0, %v1186_v24 }
 0x631   :  { %1187 = vrcp.f32 %v444_v25 }
 0x63e   :  { %v1188_v26 = vpop.eup %1187 }
 0x63f   :  { %v457_v33 = vsub.f32 1.0, %v1188_v26  ;;  %v465_v36 = vmul.f32 %v1188_v26, %v463_v34 }
 0x68f   :  { %v448_v27 = vpop.permute.xlu0 %447 }
 0x690   :  { %v450_v28 = vmul.f32 %v1188_v26, %v448_v27 }
 0x692   :  { %452 = vrot.lane.b32.xlu1 %v450_v28, %s1223_s27 }
 0x704   :  { %v453_v29 = vpop.permute.xlu1 %452 }
 0x705   :  { %v455_v30 = vadd.f32 %v453_v29, %v1421_v38 }
 0x707   :  { %1189 = vtanh.f32 %v455_v30 }
 0x714   :  { %v1190_v32 = vpop.eup %1189 }
 0x715   :  { %459 = vrot.lane.b32.xlu0 %v1190_v32, %s1224_s3 }
 0x787   :  { %v460_v35 = vpop.permute.xlu0 %459 }
 0x788   :  { %v462_v39 = vmul.f32 %v460_v35, %v457_v33 }
 0x78a   :  { %v1471_v40 = vadd.f32 %v465_v36, %v462_v39 }
 0x78c   :  { %v473_v41 = vrot.slane %v1471_v40, 4 }
 0x78e   :  { %474 = vrot.lane.b32.xlu1 %v473_v41, %s1224_s3 }
 0x800   :  { %v475_v42 = vpop.permute.xlu1 %474 }
 0x801   :  { %1123 = vmatmul.mubr.msk.f32.vlgmr.msra.gmra.mxu1 %vm148_vm3, %v475_v42 }
 0x802   :  { %1126 = vmatpush3.msra.mxu1 %v1263_v2  ;;  %1133 = vmatprep.mubr.msk.f32.mxu1 %vm1222_vm1, %v1221_v0 }
 0x803   :  { %1127 = vmatprep.subr.mxu1 %v1221_v0 }
 0x804   :  { %1128 = vmatpush3.msra.mxu1 %v1272_v4 }
 0x805   :  { %1129 = vmatprep.subr.mxu1 %v1221_v0 }
 0x806   :  { %1130 = vmatpush3.msra.mxu1 %v1282_v6 }
 0x807   :  { %1131 = vmatprep.subr.mxu1 %v1221_v0 }
 0x808   :  { %1132 = vmatpush3.msra.mxu1 %v1293_v8 }
 0x809   :  { %1136 = vmatprep.subr.mxu1 %v1221_v0 }
 0x8c1   :  { %v544_v43 = vpop.f32.mrf.mxu1 }
 0x8c2   :  { %v545_v44 = vadd.f32 %v1411_v31, %v544_v43 }
 0x8c3   :  { %v1124_v45 = vpop.f32.mrf.mxu1 }
 0x8c4   :  { %v549_v46 = vrot.slane %v545_v44, 2 }
 0x8c6   :  { %558 = vrot.lane.b32.xlu0 %v549_v46, %s1223_s27  ;;  %v551_v47 = vadd.f32 %v549_v46, %v1421_v38 }
 0x8c8   :  { %v1032_v48 = vmul.f32 -1.442695, %v551_v47 }
 0x8ca   :  { %1191 = vpow2.f32 %v1032_v48 }
 0x8d7   :  { %v1192_v49 = vpop.eup %1191 }
 0x8d8   :  { %v555_v50 = vadd.f32 1.0, %v1192_v49 }
 0x8da   :  { %1193 = vrcp.f32 %v555_v50 }
 0x8e7   :  { %v1194_v51 = vpop.eup %1193 }
 0x8e8   :  { %v568_v59 = vsub.f32 1.0, %v1194_v51 }
 0x938   :  { %v559_v52 = vpop.permute.xlu0 %558 }
 0x939   :  { %v561_v53 = vmul.f32 %v1194_v51, %v559_v52 }
 0x93b   :  { %563 = vrot.lane.b32.xlu1 %v561_v53, %s1223_s27 }
 0x9ad   :  { %v564_v54 = vpop.permute.xlu1 %563 }
 0x9ae   :  { %v566_v55 = vadd.f32 %v564_v54, %v1421_v38  ;;  %v574_v38 = vrot.slane %v1471_v40, 6 }
 0x9b0   :  { %1195 = vtanh.f32 %v566_v55  ;;  %v576_v61 = vmul.f32 %v1194_v51, %v574_v38 }
 0x9bd   :  { %v1196_v57 = vpop.eup %1195 }
 0x9be   :  { %570 = vrot.lane.b32.xlu0 %v1196_v57, %s1224_s3 }
 0xa30   :  { %v571_v60 = vpop.permute.xlu0 %570 }
 0xa31   :  { %v573_v62 = vmul.f32 %v571_v60, %v568_v59 }
 0xa33   :  { %v1502_v63 = vadd.f32 %v576_v61, %v573_v62 }
 0xa35   :  { %v584_v1 = vrot.slane %v1502_v63, 6 }
 0xa37   :  { %585 = vrot.lane.b32.xlu1 %v584_v1, %s1224_s3 }
 0xaa9   :  { %v586_v3 = vpop.permute.xlu1 %585 }
 0xaaa   :  { %1134 = vmatmul.mubr.msk.f32.vlgmr.msra.gmra.mxu1 %vm148_vm3, %v586_v3 }
 0xaab   :  { %1137 = vmatpush3.msra.mxu1 %v1263_v2  ;;  %1144 = vmatprep.mubr.msk.f32.mxu1 %vm1222_vm1, %v1221_v0 }
 0xaac   :  { %1138 = vmatprep.subr.mxu1 %v1221_v0 }
 0xaad   :  { %1139 = vmatpush3.msra.mxu1 %v1272_v4 }
 0xaae   :  { %1140 = vmatprep.subr.mxu1 %v1221_v0 }
 0xaaf   :  { %1141 = vmatpush3.msra.mxu1 %v1282_v6 }
 0xab0   :  { %1142 = vmatprep.subr.mxu1 %v1221_v0 }
 0xab1   :  { %1143 = vmatpush3.msra.mxu1 %v1293_v8 }
 0xab2   :  { %1158 = vmatprep.subr.mxu1 %v1221_v0 }
 0xb6a   :  { %v655_v9 = vpop.f32.mrf.mxu1 }
 0xb6b   :  { %v656_v10 = vadd.f32 %v1411_v31, %v655_v9 }
 0xb6c   :  { %v1135_v11 = vpop.f32.mrf.mxu1 }
 0xb6d   :  { %667 = vrot.lane.b32.xlu0 %v656_v10, %s1223_s27  ;;  %v659_v13 = vadd.f32 %v656_v10, %v1520_v12 }
 0xb6f   :  { %v1034_v14 = vmul.f32 -1.442695, %v659_v13 }
 0xb71   :  { %1197 = vpow2.f32 %v1034_v14 }
 0xb7e   :  { %v1198_v16 = vpop.eup %1197 }
 0xb7f   :  { %v663_v17 = vadd.f32 1.0, %v1198_v16 }
 0xb81   :  { %1199 = vrcp.f32 %v663_v17 }
 0xb8e   :  { %v1200_v18 = vpop.eup %1199 }
 0xb8f   :  { %v677_v37 = vsub.f32 1.0, %v1200_v18  ;;  %v684_v25 = vmul.f32 %v1200_v18, %v584_v1 }
 0xbdf   :  { %v668_v19 = vpop.permute.xlu0 %667 }
 0xbe0   :  { %v670_v20 = vmul.f32 %v1200_v18, %v668_v19 }
 0xbe2   :  { %672 = vrot.lane.b32.xlu1 %v670_v20, %s1223_s27 }
 0xc54   :  { %v673_v21 = vpop.permute.xlu1 %672 }
 0xc55   :  { %v675_v22 = vadd.f32 %v673_v21, %v1520_v12 }
 0xc57   :  { %1201 = vtanh.f32 %v675_v22 }
 0xc64   :  { %v1202_v23 = vpop.eup %1201 }
 0xc65   :  { %679 = vrot.lane.b32.xlu0 %v1202_v23, %s1224_s3 }
 0xcd7   :  { %v680_v24 = vpop.permute.xlu0 %679 }
 0xcd8   :  { %v682_v26 = vmul.f32 %v680_v24, %v677_v37 }
 0xcda   :  { %v685_v27 = vadd.f32 %v684_v25, %v682_v26 }
 0xcdc   :  { %687 = vrot.lane.b32.xlu1 %v685_v27, %s1224_s3  ;;  %v789_v42 = vrot.slane %v685_v27, 6 }
 0xd4e   :  { %v688_v28 = vpop.permute.xlu1 %687 }
 0xd4f   :  { %690 = vst.msk [vmem:[%s1604_s5 + $0x8] sm:$0x3] %vm252_vm2, %v688_v28  ;;  %1145 = vmatmul.mubr.msk.f32.vlgmr.msra.gmra.mxu1 %vm148_vm3, %v688_v28 }
 0xd50   :  { %1159 = vmatpush3.msra.mxu1 %v1263_v2  ;;  %1166 = vmatprep.mubr.msk.f32.mxu1 %vm1222_vm1, %v1221_v0 }
 0xd51   :  { %1160 = vmatprep.subr.mxu1 %v1221_v0 }
 0xd52   :  { %1161 = vmatpush3.msra.mxu1 %v1272_v4 }
 0xd53   :  { %1162 = vmatprep.subr.mxu1 %v1221_v0 }
 0xd54   :  { %1163 = vmatpush3.msra.mxu1 %v1282_v6 }
 0xd55   :  { %1164 = vmatprep.subr.mxu1 %v1221_v0 }
 0xd56   :  { %1165 = vmatpush3.msra.mxu1 %v1293_v8 }
 0xe0f   :  { %v759_v29 = vpop.f32.mrf.mxu1 }
 0xe10   :  { %v760_v30 = vadd.f32 %v1411_v31, %v759_v29 }
 0xe11   :  { %v1146_v32 = vpop.f32.mrf.mxu1 }
 0xe12   :  { %v764_v2 = vrot.slane %v760_v30, 6 }
 0xe14   :  { %773 = vrot.lane.b32.xlu0 %v764_v2, %s1223_s27  ;;  %v766_v33 = vadd.f32 %v764_v2, %v1520_v12 }
 0xe16   :  { %v1036_v34 = vmul.f32 -1.442695, %v766_v33 }
 0xe18   :  { %1203 = vpow2.f32 %v1036_v34 }
 0xe25   :  { %v1204_v4 = vpop.eup %1203 }
 0xe26   :  { %v770_v35 = vadd.f32 1.0, %v1204_v4 }
 0xe28   :  { %1205 = vrcp.f32 %v770_v35 }
 0xe35   :  { %v1206_v36 = vpop.eup %1205 }
 0xe36   :  { %v783_v43 = vsub.f32 1.0, %v1206_v36  ;;  %v791_v45 = vmul.f32 %v1206_v36, %v789_v42 }
 0xe86   :  { %v774_v6 = vpop.permute.xlu0 %773 }
 0xe87   :  { %v776_v39 = vmul.f32 %v1206_v36, %v774_v6 }
 0xe89   :  { %778 = vrot.lane.b32.xlu1 %v776_v39, %s1223_s27 }
 0xefb   :  { %v779_v0 = vpop.permute.xlu1 %778 }
 0xefc   :  { %v781_v8 = vadd.f32 %v779_v0, %v1520_v12 }
 0xefe   :  { %1207 = vtanh.f32 %v781_v8 }
 0xf0b   :  { %v1208_v41 = vpop.eup %1207 }
 0xf0c   :  { %785 = vrot.lane.b32.xlu0 %v1208_v41, %s1224_s3 }
 0xf7e   :  { %v786_v44 = vpop.permute.xlu0 %785 }
 0xf7f   :  { %v788_v46 = vmul.f32 %v786_v44, %v783_v43 }
 0xf81   :  { %v1547_v47 = vadd.f32 %v791_v45, %v788_v46 }
 0xf83   :  { %v798_v48 = vrot.slane %v1547_v47, 2  ;;  %v899_v3 = vrot.slane %v1547_v47, 6 }
 0xf85   :  { %799 = vrot.lane.b32.xlu1 %v798_v48, %s1224_s3 }
 0xff7   :  { %v800_v49 = vpop.permute.xlu1 %799 }
 0xff8   :  { %1156 = vmatmul.mubr.msk.f32.vlgmr.msra.gmra.mxu0 %vm148_vm3, %v800_v49 }
0x10b8   :  { %v869_v50 = vpop.f32.mrf.mxu0 }
0x10b9   :  { %v870_v51 = vadd.f32 %v1411_v31, %v869_v50 }
0x10ba   :  { %v1157_v52 = vpop.f32.mrf.mxu0 }
0x10bb   :  { %v874_v53 = vrot.slane %v870_v51, 4 }
0x10bd   :  { %883 = vrot.lane.b32.xlu0 %v874_v53, %s1223_s27  ;;  %v876_v54 = vadd.f32 %v874_v53, %v1520_v12 }
0x10bf   :  { %v1038_v55 = vmul.f32 -1.442695, %v876_v54 }
0x10c1   :  { %1209 = vpow2.f32 %v1038_v55 }
0x10ce   :  { %v1210_v56 = vpop.eup %1209 }
0x10cf   :  { %v880_v57 = vadd.f32 1.0, %v1210_v56 }
0x10d1   :  { %1211 = vrcp.f32 %v880_v57 }
0x10de   :  { %v1212_v58 = vpop.eup %1211 }
0x10df   :  { %v893_v1 = vsub.f32 1.0, %v1212_v58  ;;  %v901_v7 = vmul.f32 %v1212_v58, %v899_v3 }
0x112f   :  { %v884_v59 = vpop.permute.xlu0 %883 }
0x1130   :  { %v886_v38 = vmul.f32 %v1212_v58, %v884_v59 }
0x1132   :  { %888 = vrot.lane.b32.xlu1 %v886_v38, %s1223_s27 }
0x11a4   :  { %v889_v60 = vpop.permute.xlu1 %888 }
0x11a5   :  { %v891_v61 = vadd.f32 %v889_v60, %v1520_v12 }
0x11a7   :  { %1213 = vtanh.f32 %v891_v61 }
0x11b4   :  { %v1214_v62 = vpop.eup %1213 }
0x11b5   :  { %895 = vrot.lane.b32.xlu0 %v1214_v62, %s1224_s3 }
0x1227   :  { %v896_v5 = vpop.permute.xlu0 %895 }
0x1228   :  { %v898_v9 = vmul.f32 %v896_v5, %v893_v1 }
0x122a   :  { %v902_v10 = vadd.f32 %v901_v7, %v898_v9 }
0x122c   :  { %v908_v11 = vrot.slane %v902_v10, 4  ;;  %v1009_v28 = vrot.slane %v902_v10, 6 }
0x122e   :  { %909 = vrot.lane.b32.xlu1 %v908_v11, %s1224_s3 }
0x12a0   :  { %v910_v13 = vpop.permute.xlu1 %909 }
0x12a1   :  { %1167 = vmatmul.mubr.msk.f32.vlgmr.msra.gmra.mxu1 %vm148_vm3, %v910_v13 }
0x1361   :  { %v979_v14 = vpop.f32.mrf.mxu1 }
0x1362   :  { %v980_v16 = vadd.f32 %v1411_v31, %v979_v14 }
0x1363   :  { %v1168_v17 = vpop.f32.mrf.mxu1 }
0x1364   :  { %v984_v18 = vrot.slane %v980_v16, 2 }
0x1366   :  { %993 = vrot.lane.b32.xlu0 %v984_v18, %s1223_s27  ;;  %v986_v19 = vadd.f32 %v984_v18, %v1520_v12 }
0x1368   :  { %v1040_v20 = vmul.f32 -1.442695, %v986_v19 }
0x136a   :  { %1215 = vpow2.f32 %v1040_v20 }
0x1377   :  { %v1216_v21 = vpop.eup %1215 }
0x1378   :  { %v990_v22 = vadd.f32 1.0, %v1216_v21 }
0x137a   :  { %1217 = vrcp.f32 %v990_v22 }
0x1387   :  { %v1218_v23 = vpop.eup %1217 }
0x1388   :  { %v1011_v30 = vmul.f32 %v1218_v23, %v1009_v28 }
0x13d8   :  { %v994_v37 = vpop.permute.xlu0 %993 }
0x13d9   :  { %v996_v24 = vmul.f32 %v1218_v23, %v994_v37 }
0x13db   :  { %998 = vrot.lane.b32.xlu1 %v996_v24, %s1223_s27 }
0x13df   :  { %357 = vrot.lane.b32.xlu1 %v1449_v15, %s1224_s3 }
0x13e3   :  { %579 = vrot.lane.b32.xlu1 %v1502_v63, %s1224_s3 }
0x13e7   :  { %904 = vrot.lane.b32.xlu1 %v902_v10, %s1224_s3 }
0x144d   :  { %v999_v31 = vpop.permute.xlu1 %998 }
0x144e   :  { %v1001_v25 = vadd.f32 %v999_v31, %v1520_v12  ;;  %v1003_v12 = vsub.f32 1.0, %v1218_v23 }
0x1450   :  { %1219 = vtanh.f32 %v1001_v25 }
0x1451   :  { %v358_v26 = vpop.permute.xlu1 %357 }
0x1452   :  { %361 = vst.msk [vmem:[%s1604_s5] sm:$0xc] %vm360_vm4, %v358_v26 }
0x1455   :  { %v580_v27 = vpop.permute.xlu1 %579 }
0x1456   :  { %583 = vst.msk [vmem:[%s1604_s5] sm:$0xc0] %vm582_vm5, %v580_v27 }
0x1459   :  { %v905_v15 = vpop.permute.xlu1 %904 }
0x145a   :  { %907 = vst.msk [vmem:[%s1604_s5 + $0x8] sm:$0x30] %vm471_vm6, %v905_v15 }
0x145d   :  { %v1220_v63 = vpop.eup %1219 }
0x145e   :  { %1005 = vrot.lane.b32.xlu0 %v1220_v63, %s1224_s3 }
0x1462   :  { %468 = vrot.lane.b32.xlu0 %v1471_v40, %s1224_s3 }
0x1466   :  { %794 = vrot.lane.b32.xlu0 %v1547_v47, %s1224_s3 }
0x14d0   :  { %v1006_v29 = vpop.permute.xlu0 %1005 }
0x14d1   :  { %v1008_v32 = vmul.f32 %v1006_v29, %v1003_v12 }
0x14d3   :  { %v1012_v2 = vadd.f32 %v1011_v30, %v1008_v32 }
0x14d4   :  { %v469_v33 = vpop.permute.xlu0 %468 }
0x14d5   :  { %472 = vst.msk [vmem:[%s1604_s5] sm:$0x30] %vm471_vm6, %v469_v33  ;;  %1014 = vrot.lane.b32.xlu0 %v1012_v2, %s1224_s3 }
0x14d8   :  { %v795_v34 = vpop.permute.xlu0 %794 }
0x14d9   :  { %797 = vst.msk [vmem:[%s1604_s5 + $0x8] sm:$0xc] %vm360_vm4, %v795_v34 }
0x1547   :  { %v1015_v40 = vpop.permute.xlu0 %1014 }
0x1548   :  { %1017 = vst.msk [vmem:[%s1604_s5 + $0x8] sm:$0xc0] %vm582_vm5, %v1015_v40 }

// kernel: mfcc_decoder_forward.6
= control target key start
LH: loop header
LB: loop body
LE: loop exit
PB: predicated region body
PF: predicated region fallthrough
CT: control target
= control target key end

     0   :  { %vm73_vm0 = vcmask 1045504   ;;  %vm66_vm1 = vcmask 310272   ;;  %vm152_vm2 = vcmask 261120   ;;  %s976_s1 = inlined_call_operand.vmem [shape: f32[38,32], index: 1, kind: input, shape index: {}]   ;;  %s977_s0 = inlined_call_operand.vmem [shape: f32[16,38], index: 0, kind: input, shape index: {}]   ;;  %s978_s2 = inlined_call_operand.vmem [shape: f32[1,32], index: 2, kind: input, shape index: {}]   ;;  %s979_s5 = inlined_call_operand.vmem [shape: f32[32,32], index: 5, kind: input, shape index: {}]   ;;  %s980_s3 = inlined_call_operand.vmem [shape: f32[1,32], index: 3, kind: input, shape index: {}]   ;;  %s981_s4 = inlined_call_operand.vmem [shape: f32[1,32], index: 4, kind: input, shape index: {}]   ;;  %s982_s6 = inlined_call_operand.vmem [shape: f32[1,32], index: 6, kind: input, shape index: {}]   ;;  %s983_s9 = inlined_call_operand.vmem [shape: f32[32,32], index: 9, kind: input, shape index: {}]   ;;  %s984_s7 = inlined_call_operand.vmem [shape: f32[1,32], index: 7, kind: input, shape index: {}]   ;;  %s985_s8 = inlined_call_operand.vmem [shape: f32[1,32], index: 8, kind: input, shape index: {}]   ;;  %s986_s10 = inlined_call_operand.vmem [shape: f32[1,32], index: 10, kind: input, shape index: {}]   ;;  %s987_s13 = inlined_call_operand.vmem [shape: f32[32,25], index: 13, kind: input, shape index: {}]   ;;  %s988_s11 = inlined_call_operand.vmem [shape: f32[1,32], index: 11, kind: input, shape index: {}]   ;;  %s989_s12 = inlined_call_operand.vmem [shape: f32[1,32], index: 12, kind: input, shape index: {}]   ;;  %s990_s14 = inlined_call_operand.vmem [shape: f32[1,25], index: 14, kind: input, shape index: {}]   ;;  %s991_s15 = inlined_call_operand.vmem [shape: f32[16,25], index: 15, kind: output, shape index: {}]  }
   0x1   :  { %v56_v0 = vld [vmem:[%s976_s1 + $0x20] sm:$0x3f]  ;;  %v55_v1 = vld [vmem:[%s976_s1 + $0x18] sm:$0xff]  ;;  %v54_v3 = vld [vmem:[%s976_s1 + $0x10] sm:$0xff] }
   0x2   :  { %655 = vmatprep.subr.msk.mxu0 %vm73_vm0, %v56_v0  ;;  %v50_v2 = vld [vmem:[%s977_s0] sm:$0xff]  ;;  %v53_v4 = vld [vmem:[%s976_s1 + $0x8] sm:$0xff]  ;;  %v205_v24 = vld [vmem:[%s979_s5 + $0x18] sm:$0xff] }
   0x3   :  { %656 = vmatpush3.msk.msra.mxu0 %vm73_vm0, %v56_v0  ;;  %665 = vmatprep.mubr.msk.f32.mxu0 %vm66_vm1, %v50_v2  ;;  %v52_v5 = vld [vmem:[%s976_s1] sm:$0xff]  ;;  %v51_v6 = vld [vmem:[%s977_s0 + $0x8] sm:$0xff]  ;;  %v204_v25 = vld [vmem:[%s979_s5 + $0x10] sm:$0xff] }
   0x4   :  { %657 = vmatprep.subr.mxu0 %v55_v1  ;;  %v609_v8 = vld [vmem:[%s978_s2] ss:$0 sm:$0xff]  ;;  %668 = vmatprep.subr.mxu1 %v205_v24  ;;  %v203_v26 = vld [vmem:[%s979_s5 + $0x8] sm:$0xff]  ;;  %v346_v2 = vld [vmem:[%s983_s9 + $0x10] sm:$0xff] }
   0x5   :  { %658 = vmatpush3.msra.mxu0 %v55_v1  ;;  %669 = vmatpush3.msra.mxu1 %v205_v24  ;;  %v202_v27 = vld [vmem:[%s979_s5] sm:$0xff]  ;;  %v347_v1 = vld [vmem:[%s983_s9 + $0x18] sm:$0xff] }
   0x6   :  { %659 = vmatprep.subr.mxu0 %v54_v3  ;;  %670 = vmatprep.subr.mxu1 %v204_v25  ;;  %v613_v35 = vld [vmem:[%s980_s3] ss:$0 sm:$0xff] }
   0x7   :  { %660 = vmatpush3.msra.mxu0 %v54_v3  ;;  %671 = vmatpush3.msra.mxu1 %v204_v25  ;;  %v614_v37 = vld [vmem:[%s981_s4] ss:$0 sm:$0xff]  ;;  %v345_v3 = vld [vmem:[%s983_s9 + $0x8] sm:$0xff] }
   0x8   :  { %661 = vmatprep.subr.mxu0 %v53_v4  ;;  %672 = vmatprep.subr.mxu1 %v203_v26  ;;  %v615_v48 = vld [vmem:[%s982_s6] ss:$0 sm:$0xff] }
   0x9   :  { %662 = vmatpush3.msra.mxu0 %v53_v4  ;;  %673 = vmatpush3.msra.mxu1 %v203_v26  ;;  %v344_v4 = vld [vmem:[%s983_s9] sm:$0xff] }
   0xa   :  { %663 = vmatprep.subr.mxu0 %v52_v5  ;;  %674 = vmatprep.subr.mxu1 %v202_v27  ;;  %v620_v25 = vld [vmem:[%s986_s10] ss:$0 sm:$0xff] }
   0xb   :  { %664 = vmatpush3.msra.mxu0 %v52_v5  ;;  %675 = vmatpush3.msra.mxu1 %v202_v27 }
   0xc   :  { %666 = vmatmul.mubr.msk.f32.vlgmr.msra.gmra.mxu0 %vm66_vm1, %v51_v6  ;;  %679 = vmatprep.subr.mxu1 %v347_v1 }
  0xcc   :  { %v667_v7 = vpop.f32.mrf.mxu0 }
  0xcd   :  { %v149_v11 = vadd.f32 %v667_v7, %v609_v8 }
  0xce   :  { %v143_v9 = vpop.f32.mrf.mxu0 }
  0xcf   :  { %v144_v10 = vadd.f32 %v609_v8, %v143_v9  ;;  %v156_v13 = vsel %vm152_vm2, %v149_v11, 0.0 }
  0xd1   :  { %v153_v12 = vsel %vm152_vm2, %v144_v10, 0.0 }
  0xd2   :  { %154 = vadd.xlane.f32.xlu0 %v153_v12  ;;  %v618_v12 = vld [vmem:[%s984_s7] ss:$0 sm:$0xff] }
  0xd6   :  { %157 = vadd.xlane.f32.xlu0 %v156_v13 }
 0x15b   :  { %v155_v14 = vpop.xlane.xlu0 %154 }
 0x15c   :  { %v160_v15 = vmul.f32 0.03125, %v155_v14 }
 0x15e   :  { %v162_v16 = vsub.f32 %v144_v10, %v160_v15  ;;  %v619_v15 = vld [vmem:[%s985_s8] ss:$0 sm:$0xff] }
 0x15f   :  { %v158_v17 = vpop.xlane.xlu0 %157 }
 0x160   :  { %v161_v18 = vmul.f32 0.03125, %v158_v17  ;;  %v164_v19 = vmul.f32 %v162_v16, %v162_v16 }
 0x162   :  { %v163_v20 = vsub.f32 %v149_v11, %v161_v18  ;;  %v166_v21 = vsel %vm152_vm2, %v164_v19, 0.0 }
 0x163   :  { %167 = vadd.xlane.f32.xlu1 %v166_v21 }
 0x164   :  { %v165_v22 = vmul.f32 %v163_v20, %v163_v20 }
 0x166   :  { %v169_v23 = vsel %vm152_vm2, %v165_v22, 0.0 }
 0x167   :  { %170 = vadd.xlane.f32.xlu1 %v169_v23 }
 0x1ec   :  { %v168_v28 = vpop.xlane.xlu1 %167 }
 0x1ed   :  { %v172_v29 = vmul.f32 0.03125, %v168_v28 }
 0x1ef   :  { %v174_v30 = vadd.f32 1e-05, %v172_v29 }
 0x1f0   :  { %v171_v31 = vpop.xlane.xlu1 %170 }
 0x1f1   :  { %754 = vrsqrt.f32 %v174_v30  ;;  %v173_v32 = vmul.f32 0.03125, %v171_v31 }
 0x1f3   :  { %v175_v33 = vadd.f32 1e-05, %v173_v32 }
 0x1f5   :  { %756 = vrsqrt.f32 %v175_v33 }
 0x1fe   :  { %v755_v34 = vpop.eup %754 }
 0x1ff   :  { %v178_v36 = vmul.f32 %v755_v34, %v162_v16 }
 0x201   :  { %v186_v38 = vmul.f32 %v613_v35, %v178_v36 }
 0x202   :  { %v757_v39 = vpop.eup %756 }
 0x203   :  { %v179_v40 = vmul.f32 %v757_v39, %v163_v20  ;;  %v194_v41 = vadd.f32 %v614_v37, %v186_v38 }
 0x205   :  { %v187_v42 = vmul.f32 %v613_v35, %v179_v40  ;;  %vm196_vm3 = vcmp.ge.f32.partialorder %v194_v41, 0.0  ;;  %v198_v43 = vmul.f32 0.01, %v194_v41 }
 0x207   :  { %v195_v44 = vadd.f32 %v614_v37, %v187_v42  ;;  %v200_v45 = vsel %vm196_vm3, %v194_v41, %v198_v43  ;;  %v489_v42 = vld [vmem:[%s987_s13 + $0x18] sm:$0xff]  ;;  %v488_v43 = vld [vmem:[%s987_s13 + $0x10] sm:$0xff] }
 0x208   :  { %676 = vmatprep.mubr.msk.f32.mxu1 %vm152_vm2, %v200_v45  ;;  %690 = vmatprep.subr.mxu0 %v489_v42  ;;  %v486_v45 = vld [vmem:[%s987_s13] sm:$0xff] }
 0x209   :  { %vm197_vm4 = vcmp.ge.f32.partialorder %v195_v44, 0.0  ;;  %v199_v46 = vmul.f32 0.01, %v195_v44  ;;  %691 = vmatpush3.msra.mxu0 %v489_v42 }
 0x20a   :  { %692 = vmatprep.subr.mxu0 %v488_v43 }
 0x20b   :  { %v201_v47 = vsel %vm197_vm4, %v195_v44, %v199_v46  ;;  %v487_v44 = vld [vmem:[%s987_s13 + $0x8] sm:$0xff]  ;;  %693 = vmatpush3.msra.mxu0 %v488_v43  ;;  %vm602_vm4 = vcmask 203776  }
 0x20c   :  { %677 = vmatmul.mubr.msk.f32.vlgmr.msra.gmra.mxu1 %vm152_vm2, %v201_v47  ;;  %694 = vmatprep.subr.mxu0 %v487_v44 }
 0x20d   :  { %680 = vmatpush3.msra.mxu1 %v347_v1  ;;  %695 = vmatpush3.msra.mxu0 %v487_v44 }
 0x20e   :  { %681 = vmatprep.subr.mxu1 %v346_v2  ;;  %696 = vmatprep.subr.mxu0 %v486_v45 }
 0x20f   :  { %682 = vmatpush3.msra.mxu1 %v346_v2  ;;  %697 = vmatpush3.msra.mxu0 %v486_v45  ;;  %v578_v2 = vlaneseq }
 0x210   :  { %683 = vmatprep.subr.mxu1 %v345_v3 }
 0x211   :  { %684 = vmatpush3.msra.mxu1 %v345_v3  ;;  %v579_v3 = vand.u32 127, %v578_v2 }
 0x212   :  { %685 = vmatprep.subr.mxu1 %v344_v4 }
 0x213   :  { %686 = vmatpush3.msra.mxu1 %v344_v4  ;;  %vm580_vm9 = vcmp.lt.s32.totalorder %v579_v3, 17  ;;  %v625_v4 = vld [vmem:[%s990_s14] ss:$0 sm:$0xff] }
 0x2cc   :  { %v678_v49 = vpop.f32.mrf.mxu1 }
 0x2cd   :  { %v293_v50 = vadd.f32 %v678_v49, %v615_v48 }
 0x2ce   :  { %v287_v51 = vpop.f32.mrf.mxu1 }
 0x2cf   :  { %v288_v52 = vadd.f32 %v615_v48, %v287_v51  ;;  %v299_v53 = vsel %vm152_vm2, %v293_v50, 0.0 }
 0x2d0   :  { %300 = vadd.xlane.f32.xlu1 %v299_v53  ;;  %v623_v53 = vld [vmem:[%s988_s11] ss:$0 sm:$0xff] }
 0x2d1   :  { %v296_v54 = vsel %vm152_vm2, %v288_v52, 0.0 }
 0x2d2   :  { %297 = vadd.xlane.f32.xlu0 %v296_v54 }
 0x359   :  { %v301_v55 = vpop.xlane.xlu1 %300 }
 0x35a   :  { %v303_v56 = vmul.f32 0.03125, %v301_v55 }
 0x35b   :  { %v298_v57 = vpop.xlane.xlu0 %297 }
 0x35c   :  { %v305_v58 = vsub.f32 %v293_v50, %v303_v56  ;;  %v302_v59 = vmul.f32 0.03125, %v298_v57  ;;  %v624_v56 = vld [vmem:[%s989_s12] ss:$0 sm:$0xff] }
 0x35e   :  { %v304_v60 = vsub.f32 %v288_v52, %v302_v59  ;;  %v307_v61 = vmul.f32 %v305_v58, %v305_v58 }
 0x360   :  { %v311_v62 = vsel %vm152_vm2, %v307_v61, 0.0  ;;  %v306_v63 = vmul.f32 %v304_v60, %v304_v60 }
 0x361   :  { %312 = vadd.xlane.f32.xlu1 %v311_v62 }
 0x362   :  { %v308_v0 = vsel %vm152_vm2, %v306_v63, 0.0 }
 0x363   :  { %309 = vadd.xlane.f32.xlu0 %v308_v0 }
 0x3ea   :  { %v313_v5 = vpop.xlane.xlu1 %312 }
 0x3eb   :  { %v315_v6 = vmul.f32 0.03125, %v313_v5 }
 0x3ec   :  { %v310_v7 = vpop.xlane.xlu0 %309 }
 0x3ed   :  { %v317_v8 = vadd.f32 1e-05, %v315_v6  ;;  %v314_v9 = vmul.f32 0.03125, %v310_v7  ;;  %v782_v6 = vmov 5.0  }
 0x3ee   :  { %v581_v7 = vsel %vm580_vm9, 0.0, %v782_v6 }
 0x3ef   :  { %758 = vrsqrt.f32 %v317_v8  ;;  %v316_v10 = vadd.f32 1e-05, %v314_v9 }
 0x3f1   :  { %760 = vrsqrt.f32 %v316_v10 }
 0x3fc   :  { %v759_v11 = vpop.eup %758 }
 0x3fd   :  { %v321_v13 = vmul.f32 %v759_v11, %v305_v58 }
 0x3fe   :  { %v761_v14 = vpop.eup %760 }
 0x3ff   :  { %v320_v16 = vmul.f32 %v761_v14, %v304_v60  ;;  %v329_v17 = vmul.f32 %v618_v12, %v321_v13 }
 0x401   :  { %v328_v18 = vmul.f32 %v618_v12, %v320_v16  ;;  %v337_v19 = vadd.f32 %v619_v15, %v329_v17 }
 0x403   :  { %v336_v20 = vadd.f32 %v619_v15, %v328_v18  ;;  %v341_v21 = vmul.f32 0.01, %v337_v19  ;;  %vm339_vm6 = vcmp.ge.f32.partialorder %v337_v19, 0.0 }
 0x405   :  { %vm338_vm5 = vcmp.ge.f32.partialorder %v336_v20, 0.0  ;;  %v340_v22 = vmul.f32 0.01, %v336_v20  ;;  %v343_v24 = vsel %vm339_vm6, %v337_v19, %v341_v21 }
 0x407   :  { %v342_v23 = vsel %vm338_vm5, %v336_v20, %v340_v22 }
 0x408   :  { %687 = vmatprep.mubr.msk.f32.mxu1 %vm152_vm2, %v342_v23 }
 0x409   :  { %688 = vmatmul.mubr.msk.f32.vlgmr.msra.gmra.mxu1 %vm152_vm2, %v343_v24 }
 0x4c9   :  { %v689_v26 = vpop.f32.mrf.mxu1 }
 0x4ca   :  { %v435_v27 = vadd.f32 %v689_v26, %v620_v25 }
 0x4cb   :  { %v429_v28 = vpop.f32.mrf.mxu1 }
 0x4cc   :  { %v430_v29 = vadd.f32 %v620_v25, %v429_v28  ;;  %v441_v30 = vsel %vm152_vm2, %v435_v27, 0.0 }
 0x4cd   :  { %442 = vadd.xlane.f32.xlu1 %v441_v30 }
 0x4ce   :  { %v438_v31 = vsel %vm152_vm2, %v430_v29, 0.0 }
 0x4cf   :  { %439 = vadd.xlane.f32.xlu0 %v438_v31 }
 0x556   :  { %v443_v32 = vpop.xlane.xlu1 %442 }
 0x557   :  { %v445_v33 = vmul.f32 0.03125, %v443_v32 }
 0x558   :  { %v440_v34 = vpop.xlane.xlu0 %439 }
 0x559   :  { %v447_v35 = vsub.f32 %v435_v27, %v445_v33  ;;  %v444_v36 = vmul.f32 0.03125, %v440_v34 }
 0x55b   :  { %v446_v37 = vsub.f32 %v430_v29, %v444_v36  ;;  %v449_v38 = vmul.f32 %v447_v35, %v447_v35 }
 0x55d   :  { %v453_v39 = vsel %vm152_vm2, %v449_v38, 0.0  ;;  %v448_v40 = vmul.f32 %v446_v37, %v446_v37 }
 0x55e   :  { %454 = vadd.xlane.f32.xlu1 %v453_v39 }
 0x55f   :  { %v450_v41 = vsel %vm152_vm2, %v448_v40, 0.0 }
 0x560   :  { %451 = vadd.xlane.f32.xlu0 %v450_v41 }
 0x5e7   :  { %v455_v46 = vpop.xlane.xlu1 %454 }
 0x5e8   :  { %v457_v47 = vmul.f32 0.03125, %v455_v46 }
 0x5e9   :  { %v452_v48 = vpop.xlane.xlu0 %451 }
 0x5ea   :  { %v459_v49 = vadd.f32 1e-05, %v457_v47  ;;  %v456_v50 = vmul.f32 0.03125, %v452_v48 }
 0x5ec   :  { %762 = vrsqrt.f32 %v459_v49  ;;  %v458_v51 = vadd.f32 1e-05, %v456_v50 }
 0x5ee   :  { %764 = vrsqrt.f32 %v458_v51 }
 0x5f9   :  { %v763_v52 = vpop.eup %762 }
 0x5fa   :  { %v463_v54 = vmul.f32 %v763_v52, %v447_v35 }
 0x5fb   :  { %v765_v55 = vpop.eup %764 }
 0x5fc   :  { %v462_v57 = vmul.f32 %v765_v55, %v446_v37  ;;  %v471_v58 = vmul.f32 %v623_v53, %v463_v54 }
 0x5fe   :  { %v470_v59 = vmul.f32 %v623_v53, %v462_v57  ;;  %v479_v60 = vadd.f32 %v624_v56, %v471_v58 }
 0x600   :  { %v478_v61 = vadd.f32 %v624_v56, %v470_v59  ;;  %v483_v62 = vmul.f32 0.01, %v479_v60  ;;  %vm481_vm8 = vcmp.ge.f32.partialorder %v479_v60, 0.0 }
 0x602   :  { %vm480_vm7 = vcmp.ge.f32.partialorder %v478_v61, 0.0  ;;  %v482_v63 = vmul.f32 0.01, %v478_v61  ;;  %v485_v1 = vsel %vm481_vm8, %v479_v60, %v483_v62 }
 0x604   :  { %v484_v0 = vsel %vm480_vm7, %v478_v61, %v482_v63 }
 0x605   :  { %698 = vmatprep.mubr.msk.f32.mxu0 %vm152_vm2, %v484_v0 }
 0x606   :  { %699 = vmatmul.mubr.msk.f32.vlgmr.msra.gmra.mxu0 %vm152_vm2, %v485_v1 }
 0x6c6   :  { %v700_v5 = vpop.f32.mrf.mxu0 }
 0x6c7   :  { %v575_v8 = vadd.f32 %v700_v5, %v625_v4 }
 0x6c8   :  { %v569_v9 = vpop.f32.mrf.mxu0 }
 0x6c9   :  { %v583_v10 = vsub.f32 %v575_v8, %v581_v7  ;;  %v570_v11 = vadd.f32 %v625_v4, %v569_v9 }
 0x6cb   :  { %v629_v12 = vmul.f32 -1.442695, %v583_v10  ;;  %v582_v13 = vsub.f32 %v570_v11, %v581_v7 }
 0x6cd   :  { %766 = vpow2.f32 %v629_v12  ;;  %v628_v14 = vmul.f32 -1.442695, %v582_v13 }
 0x6cf   :  { %768 = vpow2.f32 %v628_v14 }
 0x6da   :  { %v767_v15 = vpop.eup %766 }
 0x6db   :  { %v591_v16 = vadd.f32 1.0, %v767_v15 }
 0x6dc   :  { %v769_v17 = vpop.eup %768 }
 0x6dd   :  { %770 = vrcp.f32 %v591_v16  ;;  %v590_v18 = vadd.f32 1.0, %v769_v17 }
 0x6df   :  { %772 = vrcp.f32 %v590_v18 }
 0x6ea   :  { %v771_v19 = vpop.eup %770 }
 0x6eb   :  { %v731_v20 = vand.u32 2147483647, %v771_v19  ;;  %vm735_vm10 = vcmp.lt.f32.partialorder %v771_v19, 0  ;;  %vm736_vm11 = vcmp.eq.f32.partialorder %v771_v19, 0  ;;  %vm748_vm14 = vcmp.ne.f32.partialorder %v771_v19, %v771_v19 }
 0x6ec   :  { %v773_v21 = vpop.eup %772  ;;  %vm737_vm0 = vcmp.eq.f32.partialorder %v771_v19, 1065353216 }
 0x6ed   :  { %774 = vlog2.f32 %v731_v20  ;;  %v705_v22 = vand.u32 2147483647, %v773_v21  ;;  %vm740_vm12 = vcmp.eq.f32.partialorder %v731_v20, 2139095040  ;;  %vm709_vm13 = vcmp.lt.f32.partialorder %v773_v21, 0 }
 0x6ee   :  { %vm710_vm15 = vcmp.eq.f32.partialorder %v773_v21, 0  ;;  %vm722_vm2 = vcmp.ne.f32.partialorder %v773_v21, %v773_v21  ;;  %vm711_vm3 = vcmp.eq.f32.partialorder %v773_v21, 1065353216 }
 0x6ef   :  { %776 = vlog2.f32 %v705_v22  ;;  %vm714_vm1 = vcmp.eq.f32.partialorder %v705_v22, 2139095040 }
 0x6fa   :  { %v775_v23 = vpop.eup %774 }
 0x6fb   :  { %v733_v24 = vmul.f32 2.3025851, %v775_v23 }
 0x6fc   :  { %v777_v25 = vpop.eup %776 }
 0x6fd   :  { %778 = vpow2.f32 %v733_v24  ;;  %v707_v26 = vmul.f32 2.3025851, %v777_v25 }
 0x6ff   :  { %780 = vpow2.f32 %v707_v26 }
 0x70a   :  { %v779_v27 = vpop.eup %778 }
 0x70b   :  { %v741_v28 = vsel %vm735_vm10, 2143289344, %v779_v27 }
 0x70c   :  { %v781_v29 = vpop.eup %780  ;;  %v742_v30 = vsel %vm736_vm11, 0, %v741_v28 }
 0x70d   :  { %v747_v31 = vsel %vm740_vm12, 2139095040, %v742_v30  ;;  %v715_v32 = vsel %vm709_vm13, 2143289344, %v781_v29 }
 0x70e   :  { %v751_v33 = vsel %vm748_vm14, 2143289344, %v747_v31  ;;  %v716_v34 = vsel %vm710_vm15, 0, %v715_v32 }
 0x70f   :  { %v752_v35 = vsel %vm737_vm0, 1065353216, %v751_v33  ;;  %v721_v36 = vsel %vm714_vm1, 2139095040, %v716_v34 }
 0x710   :  { %v599_v37 = vmul.f32 2.0, %v752_v35  ;;  %v725_v38 = vsel %vm722_vm2, 2143289344, %v721_v36 }
 0x711   :  { %v726_v39 = vsel %vm711_vm3, 1065353216, %v725_v38 }
 0x712   :  { %v601_v40 = vadd.f32 1e-07, %v599_v37  ;;  %v598_v41 = vmul.f32 2.0, %v726_v39 }
 0x714   :  { %604 = vst.msk [vmem:[%s991_s15 + $0x8] sm:$0xff] %vm602_vm4, %v601_v40  ;;  %v600_v42 = vadd.f32 1e-07, %v598_v41 }
 0x716   :  { %603 = vst.msk [vmem:[%s991_s15] sm:$0xff] %vm602_vm4, %v600_v42 }

// kernel: reverse.1
= control target key start
LH: loop header
LB: loop body
LE: loop exit
PB: predicated region body
PF: predicated region fallthrough
CT: control target
= control target key end

     0   :  { %v2_v0 = vlaneseq  ;;  %s119_s0 = inlined_call_operand.vmem [shape: f32[2,8,15], index: 0, kind: input, shape index: {}]   ;;  %s120_s1 = inlined_call_operand.vmem [shape: f32[2,8,15], index: 1, kind: output, shape index: {}]  }
   0x1   :  { %v35_v2 = vld [vmem:[%s119_s0] sm:$0xff]  ;;  %v37_v3 = vld [vmem:[%s119_s0 + $0x8] sm:$0xff] }
   0x2   :  { %v3_v1 = vsub.s32 14, %v2_v0 }
   0x4   :  { %4 = vset.pattern.permute.xlu0 %v3_v1 }
   0x5   :  { %43 = vperm.xlu0 %4, %v35_v2  }
   0x9   :  { %49 = vperm.xlu0 %4, %v37_v3  }
  0x80   :  { %v44_v4 = vpop.permute.xlu0 %43 }
  0x81   :  { %83 = vst [vmem:[%s120_s1] sm:$0xff] %v44_v4 }
  0x84   :  { %v50_v5 = vpop.permute.xlu0 %49 }
  0x85   :  { %85 = vst [vmem:[%s120_s1 + $0x8] sm:$0xff] %v50_v5 }

// kernel: mfcc_decoder_forward.7
= control target key start
LH: loop header
LB: loop body
LE: loop exit
PB: predicated region body
PF: predicated region fallthrough
CT: control target
= control target key end

     0   :  { %v550_v0 = vmov 0   ;;  %v551_v32 = vmov 683565275   ;;  %v552_v34 = vmov 2475754826   ;;  %s887_s2 = inlined_call_operand.vmem [shape: f32[1,16,1], index: 2, kind: input, shape index: {}]   ;;  %s888_s0 = inlined_call_operand.vmem [shape: f32[2,1,128], index: 0, kind: input, shape index: {}]   ;;  %s889_s1 = inlined_call_operand.vmem [shape: f32[2,16,128], index: 1, kind: input, shape index: {}]   ;;  %s890_s3 = inlined_call_operand.vmem [shape: f32[2,128], index: 3, kind: output, shape index: {}]  }
   0x1   :  { %533 = vset.pattern.permute.xlu0 %v550_v0  ;;  %v20_v1 = vld [vmem:[%s887_s2] sm:$0xff]  ;;  %v21_v2 = vld [vmem:[%s887_s2 + $0x8] sm:$0xff]  ;;  %v553_v37 = vmov 2131351028   ;;  %v554_v39 = vmov 2102212464  }
   0x2   :  { %36 = vperm.xlu0 %533, %v20_v1   ;;  %v492_v3 = vld [vmem:[%s888_s0] ss:$0 sm:$0xff]  ;;  %v589_v4 = vld [vmem:[%s888_s0 + $0x1] ss:$0 sm:$0xff]  ;;  %v555_v41 = vmov 920167782  }
   0x3   :  { %v556_v48 = vmov 1326507024  }
   0x6   :  { %41 = vperm.xlu0 %533, %v21_v2  }
  0x7d   :  { %v37_v5 = vpop.permute.xlu0 %36 }
  0x7e   :  { %v591_v6 = vmul.f32 %v492_v3, %v37_v5  ;;  %v594_v7 = vmul.f32 %v589_v4, %v37_v5 }
  0x80   :  { %v48_v8 = vand.u32 2147483647, %v591_v6  ;;  %v51_v9 = vand.u32 2139095040, %v591_v6  ;;  %v259_v11 = vand.u32 2139095040, %v594_v7 }
  0x81   :  { %v598_v10 = vpop.permute.xlu0 %41 }
  0x82   :  { %v602_v12 = vmul.f32 %v492_v3, %v598_v10  ;;  %v52_v13 = vshrl.u32 %v51_v9, 23  ;;  %v55_v14 = vand.u32 8388607, %v48_v8  ;;  %v260_v15 = vshrl.u32 %v259_v11, 23 }
  0x84   :  { %v494_v16 = vadd.s32 4294967169, %v52_v13  ;;  %v152_v17 = vand.u32 2147483647, %v602_v12  ;;  %v155_v18 = vand.u32 2139095040, %v602_v12  ;;  %v502_v19 = vadd.s32 4294967169, %v260_v15 }
  0x85   :  { %v56_v22 = vor.u32 8388608, %v55_v14 }
  0x86   :  { %v58_v20 = vadd.s32 1, %v494_v16  ;;  %v156_v21 = vshrl.u32 %v155_v18, 23  ;;  %v159_v23 = vand.u32 8388607, %v152_v17  ;;  %v266_v25 = vadd.s32 1, %v502_v19 }
  0x87   :  { %v610_v29 = vshll.u32 %v56_v22, 8 }
  0x88   :  { %vm59_vm0 = vcmp.gt.s32.totalorder %v58_v20, 0  ;;  %v498_v24 = vadd.s32 4294967169, %v156_v21  ;;  %v160_v30 = vor.u32 8388608, %v159_v23  ;;  %vm267_vm1 = vcmp.gt.s32.totalorder %v266_v25, 0 }
  0x89   :  { %v60_v26 = vsel %vm59_vm0, %v58_v20, 0  ;;  %v268_v20 = vsel %vm267_vm1, %v266_v25, 0 }
  0x8a   :  { %v61_v27 = vshrl.u32 %v60_v26, 5  ;;  %v62_v28 = vand.u32 31, %v60_v26  ;;  %v162_v36 = vadd.s32 1, %v498_v24  ;;  %v632_v11 = vshll.u32 %v160_v30, 8 }
  0x8c   :  { %v63_v31 = vsub.s32 32, %v62_v28  ;;  %v65_v33 = vshll.u32 %v551_v32, %v62_v28  ;;  %v68_v35 = vshll.u32 %v552_v34, %v62_v28  ;;  %v71_v38 = vshll.u32 %v553_v37, %v62_v28 }
  0x8d   :  { %v74_v40 = vshll.u32 %v554_v39, %v62_v28  ;;  %v77_v42 = vshll.u32 %v555_v41, %v62_v28  ;;  %vm80_vm2 = vcmp.lt.s32.totalorder %v61_v27, 1  ;;  %vm81_vm3 = vcmp.lt.s32.totalorder %v61_v27, 2 }
  0x8e   :  { %v66_v43 = vshrl.u32 %v552_v34, %v63_v31  ;;  %v69_v44 = vshrl.u32 %v553_v37, %v63_v31  ;;  %v72_v45 = vshrl.u32 %v554_v39, %v63_v31  ;;  %v64_v46 = vshrl.u32 %v551_v32, %v63_v31 }
  0x8f   :  { %v75_v47 = vshrl.u32 %v555_v41, %v63_v31  ;;  %v78_v49 = vshrl.u32 %v556_v48, %v63_v31  ;;  %vm82_vm4 = vcmp.lt.s32.totalorder %v61_v27, 3  ;;  %vm163_vm5 = vcmp.gt.s32.totalorder %v162_v36, 0 }
  0x90   :  { %v67_v50 = vor.u32 %v66_v43, %v65_v33  ;;  %v70_v51 = vor.u32 %v69_v44, %v68_v35  ;;  %v73_v52 = vor.u32 %v72_v45, %v71_v38  ;;  %vm83_vm6 = vcmp.lt.s32.totalorder %v61_v27, 4 }
  0x91   :  { %v76_v53 = vor.u32 %v75_v47, %v74_v40  ;;  %v79_v54 = vor.u32 %v78_v49, %v77_v42  ;;  %v164_v55 = vsel %vm163_vm5, %v162_v36, 0  ;;  %v270_v42 = vand.u32 31, %v268_v20 }
  0x92   :  { %v84_v56 = vsel %vm80_vm2, %v64_v46, %v67_v50  ;;  %v85_v57 = vsel %vm83_vm6, %v73_v52, 2102212464  ;;  %v88_v58 = vsel %vm80_vm2, %v67_v50, %v70_v51  ;;  %v92_v59 = vsel %vm80_vm2, %v70_v51, %v73_v52 }
  0x93   :  { %v86_v60 = vsel %vm82_vm4, %v70_v51, %v85_v57  ;;  %v89_v61 = vsel %vm83_vm6, %v76_v53, 920167782  ;;  %v93_v62 = vsel %vm83_vm6, %v79_v54, 1326507024  ;;  %v165_v63 = vshrl.u32 %v164_v55, 5 }
  0x94   :  { %v87_v0 = vsel %vm81_vm3, %v84_v56, %v86_v60  ;;  %v90_v1 = vsel %vm82_vm4, %v73_v52, %v89_v61  ;;  %v94_v2 = vsel %vm82_vm4, %v76_v53, %v93_v62  ;;  %v166_v3 = vand.u32 31, %v164_v55 }
  0x95   :  { %v91_v5 = vsel %vm81_vm3, %v88_v58, %v90_v1  ;;  %v95_v9 = vsel %vm81_vm3, %v92_v59, %v94_v2  ;;  %v103_v18 = vmul.u32 %v610_v29, %v87_v0  ;;  %vm184_vm7 = vcmp.lt.s32.totalorder %v165_v63, 1 }
  0x96   :  { %v635_v13 = vmul.u32.u64.low %v610_v29, %v95_v9  ;;  %v636_v14 = vmul.u32.u64.high %v610_v29, %v95_v9, %v635_v13  ;;  %v639_v15 = vmul.u32.u64.low %v610_v29, %v91_v5  ;;  %v640_v16 = vmul.u32.u64.high %v610_v29, %v91_v5, %v639_v15 }
  0x97   :  { %v167_v19 = vsub.s32 32, %v166_v3  ;;  %v169_v21 = vshll.u32 %v551_v32, %v166_v3  ;;  %v172_v22 = vshll.u32 %v552_v34, %v166_v3  ;;  %v175_v23 = vshll.u32 %v553_v37, %v166_v3 }
  0x98   :  { %v178_v24 = vshll.u32 %v554_v39, %v166_v3  ;;  %v181_v29 = vshll.u32 %v555_v41, %v166_v3  ;;  %vm105_vm8 = vc.u32 %v636_v14, %v639_v15  ;;  %v106_v25 = vadd.s32 1, %v640_v16 }
  0x99   :  { %v170_v26 = vshrl.u32 %v552_v34, %v167_v19  ;;  %v173_v27 = vshrl.u32 %v553_v37, %v167_v19  ;;  %v176_v28 = vshrl.u32 %v554_v39, %v167_v19  ;;  %v179_v30 = vshrl.u32 %v555_v41, %v167_v19 }
  0x9a   :  { %vm185_vm9 = vcmp.lt.s32.totalorder %v165_v63, 2  ;;  %v182_v36 = vshrl.u32 %v556_v48, %v167_v19  ;;  %v107_v38 = vsel %vm105_vm8, %v106_v25, %v640_v16  ;;  %vm187_vm10 = vcmp.lt.s32.totalorder %v165_v63, 4 }
  0x9b   :  { %v171_v31 = vor.u32 %v170_v26, %v169_v21  ;;  %v174_v33 = vor.u32 %v173_v27, %v172_v22  ;;  %v177_v35 = vor.u32 %v176_v28, %v175_v23  ;;  %v180_v40 = vor.u32 %v179_v30, %v178_v24 }
  0x9c   :  { %v108_v43 = vadd.s32 %v107_v38, %v103_v18  ;;  %v168_v44 = vshrl.u32 %v551_v32, %v167_v19  ;;  %v183_v45 = vor.u32 %v182_v36, %v181_v29  ;;  %vm186_vm11 = vcmp.lt.s32.totalorder %v165_v63, 3 }
  0x9d   :  { %v189_v46 = vsel %vm187_vm10, %v177_v35, 2102212464  ;;  %v192_v47 = vsel %vm184_vm7, %v171_v31, %v174_v33  ;;  %v193_v49 = vsel %vm187_vm10, %v180_v40, 920167782  ;;  %v196_v50 = vsel %vm184_vm7, %v174_v33, %v177_v35 }
  0x9e   :  { %v109_v51 = vadd.s32 536870912, %v108_v43  ;;  %v188_v52 = vsel %vm184_vm7, %v168_v44, %v171_v31  ;;  %v194_v53 = vsel %vm186_vm11, %v177_v35, %v193_v49  ;;  %v197_v54 = vsel %vm187_vm10, %v183_v45, 1326507024 }
  0x9f   :  { %v190_v55 = vsel %vm186_vm11, %v174_v33, %v189_v46  ;;  %v195_v56 = vsel %vm185_vm9, %v192_v47, %v194_v53  ;;  %v198_v57 = vsel %vm186_vm11, %v180_v40, %v197_v54  ;;  %v271_v58 = vsub.s32 32, %v270_v42 }
  0xa0   :  { %v664_v59 = vshrl.u32 %v109_v51, 30  ;;  %v199_v60 = vsel %vm185_vm9, %v196_v50, %v198_v57  ;;  %v668_v61 = vmul.u32.u64.low %v632_v11, %v195_v56  ;;  %v669_v62 = vmul.u32.u64.high %v632_v11, %v195_v56, %v668_v61 }
  0xa1   :  { %v673_v0 = vmul.u32.u64.low %v632_v11, %v199_v60  ;;  %v674_v1 = vmul.u32.u64.high %v632_v11, %v199_v60, %v673_v0  ;;  %v191_v3 = vsel %vm185_vm9, %v188_v52, %v190_v55  ;;  %v256_v5 = vand.u32 2147483647, %v594_v7 }
  0xa2   :  { %v111_v2 = vshll.u32 %v664_v59, 30  ;;  %v210_v9 = vadd.s32 1, %v669_v62  ;;  %v269_v13 = vshrl.u32 %v268_v20, 5  ;;  %v274_v16 = vshrl.u32 %v552_v34, %v271_v58 }
  0xa3   :  { %v277_v18 = vshrl.u32 %v553_v37, %v271_v58  ;;  %v207_v21 = vmul.u32 %v632_v11, %v191_v3  ;;  %vm209_vm12 = vc.u32 %v674_v1, %v668_v61  ;;  %v280_v22 = vshrl.u32 %v554_v39, %v271_v58 }
  0xa4   :  { %v682_v19 = vsub.s32 %v108_v43, %v111_v2  ;;  %v211_v63 = vsel %vm209_vm12, %v210_v9, %v669_v62  ;;  %v273_v23 = vshll.u32 %v551_v32, %v270_v42  ;;  %v276_v24 = vshll.u32 %v552_v34, %v270_v42 }
  0xa5   :  { %v279_v20 = vshll.u32 %v553_v37, %v270_v42  ;;  %v212_v26 = vadd.s32 %v211_v63, %v207_v21  ;;  %v282_v27 = vshll.u32 %v554_v39, %v270_v42  ;;  %v283_v28 = vshrl.u32 %v555_v41, %v271_v58 }
  0xa6   :  { %v286_v11 = vshrl.u32 %v556_v48, %v271_v58  ;;  %v263_v29 = vand.u32 8388607, %v256_v5  ;;  %v275_v25 = vor.u32 %v274_v16, %v273_v23  ;;  %v278_v30 = vor.u32 %v277_v18, %v276_v24 }
  0xa7   :  { %v285_v31 = vshll.u32 %v555_v41, %v270_v42  ;;  %v114_v33 = vsub.s32 0, %v682_v19  ;;  %v213_v35 = vadd.s32 536870912, %v212_v26  ;;  %v281_v36 = vor.u32 %v280_v22, %v279_v20 }
  0xa8   :  { %v284_v38 = vor.u32 %v283_v28, %v282_v27  ;;  %v701_v43 = vmul.f32 %v589_v4, %v598_v10  ;;  %vm291_vm13 = vcmp.lt.s32.totalorder %v269_v13, 4  ;;  %v264_v45 = vor.u32 8388608, %v263_v29 }
  0xa9   :  { %v287_v40 = vor.u32 %v286_v11, %v285_v31  ;;  %v703_v44 = vshrl.u32 %v213_v35, 30  ;;  %vm288_vm14 = vcmp.lt.s32.totalorder %v269_v13, 1  ;;  %vm290_vm15 = vcmp.lt.s32.totalorder %v269_v13, 3 }
  0xaa   :  { %v297_v46 = vsel %vm291_vm13, %v284_v38, 920167782  ;;  %v495_v47 = vmin.u32 %v114_v33, %v682_v19  ;;  %v296_v49 = vsel %vm288_vm14, %v275_v25, %v278_v30  ;;  %v300_v51 = vsel %vm288_vm14, %v278_v30, %v281_v36 }
  0xab   :  { %v215_v42 = vshll.u32 %v703_v44, 30  ;;  %v298_v50 = vsel %vm290_vm15, %v281_v36, %v297_v46  ;;  %v301_v52 = vsel %vm291_vm13, %v287_v40, 1326507024  ;;  %vm289_vm0 = vcmp.lt.s32.totalorder %v269_v13, 2 }
  0xac   :  { %v293_v10 = vsel %vm291_vm13, %v281_v36, 2102212464  ;;  %v302_v53 = vsel %vm290_vm15, %v284_v38, %v301_v52  ;;  %v272_v54 = vshrl.u32 %v551_v32, %v271_v58  ;;  %v299_v55 = vsel %vm289_vm0, %v296_v49, %v298_v50 }
  0xad   :  { %v710_v4 = vsub.s32 %v212_v26, %v215_v42  ;;  %v304_v56 = vshll.u32 %v264_v45, 8  ;;  %v363_v57 = vand.u32 2139095040, %v701_v43  ;;  %v116_v60 = vclz %v495_v47 }
  0xae   :  { %v303_v0 = vsel %vm289_vm0, %v300_v51, %v302_v53  ;;  %v292_v2 = vsel %vm288_vm14, %v272_v54, %v275_v25  ;;  %v294_v3 = vsel %vm290_vm15, %v278_v30, %v293_v10  ;;  %v360_v38 = vand.u32 2147483647, %v701_v43 }
  0xaf   :  { %v218_v62 = vsub.s32 0, %v710_v4  ;;  %v720_v9 = vmul.u32.u64.low %v304_v56, %v303_v0  ;;  %v721_v16 = vmul.u32.u64.high %v304_v56, %v303_v0, %v720_v9  ;;  %v364_v22 = vshrl.u32 %v363_v57, 23 }
  0xb0   :  { %v724_v58 = vmul.u32.u64.low %v304_v56, %v299_v55  ;;  %v725_v21 = vmul.u32.u64.high %v304_v56, %v299_v55, %v724_v58  ;;  %v295_v23 = vsel %vm289_vm0, %v292_v2, %v294_v3  ;;  %v496_v24 = vadd.s32 4294967294, %v116_v60 }
  0xb1   :  { %v499_v18 = vmin.u32 %v218_v62, %v710_v4  ;;  %v506_v27 = vadd.s32 4294967169, %v364_v22  ;;  %v311_v28 = vmul.u32 %v304_v56, %v295_v23  ;;  %v104_v42 = vadd.s32 %v639_v15, %v636_v14 }
  0xb2   :  { %vm313_vm1 = vc.u32 %v721_v16, %v724_v58  ;;  %v314_v26 = vadd.s32 1, %v725_v21  ;;  %vm497_vm2 = vcmp.lt.s32.totalorder %v496_v24, 0  ;;  %v367_v50 = vand.u32 8388607, %v360_v38 }
  0xb3   :  { %v220_v63 = vclz %v499_v18  ;;  %v370_v29 = vadd.s32 1, %v506_v27  ;;  %v733_v13 = vsel %vm497_vm2, 0, %v496_v24  ;;  %v208_v52 = vadd.s32 %v668_v61, %v674_v1 }
  0xb4   :  { %v315_v11 = vsel %vm313_vm1, %v314_v26, %v725_v21  ;;  %v124_v45 = vsub.s32 4294967266, %v733_v13  ;;  %v120_v51 = vsub.s32 32, %v733_v13  ;;  %vm154_vm11 = vcmp.lt.s32.totalorder %v602_v12, 0 }
  0xb5   :  { %v500_v20 = vadd.s32 4294967294, %v220_v63  ;;  %v316_v25 = vadd.s32 %v315_v11, %v311_v28  ;;  %vm371_vm4 = vcmp.gt.s32.totalorder %v370_v29, 0  ;;  %vm50_vm12 = vcmp.lt.s32.totalorder %v591_v6, 0 }
  0xb6   :  { %v372_v31 = vsel %vm371_vm4, %v370_v29, 0  ;;  %v125_v54 = vadd.s32 127, %v124_v45  ;;  %v122_v22 = vshrl.u32 %v104_v42, %v120_v51  ;;  %vm801_vm13 = vcmp.le.f32.partialorder %v152_v17, 0.7853982 }
  0xb7   :  { %vm501_vm3 = vcmp.lt.s32.totalorder %v500_v20, 0  ;;  %v317_v30 = vadd.s32 536870912, %v316_v25  ;;  %v374_v35 = vand.u32 31, %v372_v31  ;;  %v373_v1 = vshrl.u32 %v372_v31, 5 }
  0xb8   :  { %v223_v33 = vsel %vm501_vm3, 0, %v500_v20  ;;  %v368_v20 = vor.u32 8388608, %v367_v50  ;;  %vm811_vm14 = vcmp.le.f32.partialorder %v48_v8, 0.7853982  ;;  %v134_v8 = vsub.s32 4, %v664_v59 }
  0xb9   :  { %v735_v36 = vshrl.u32 %v317_v30, 30  ;;  %v375_v40 = vsub.s32 32, %v374_v35  ;;  %v228_v46 = vsub.s32 4294967266, %v223_v33  ;;  %v377_v15 = vshll.u32 %v551_v32, %v374_v35 }
  0xba   :  { %v380_v57 = vshll.u32 %v552_v34, %v374_v35  ;;  %v386_v60 = vshll.u32 %v554_v39, %v374_v35  ;;  %v224_v0 = vsub.s32 32, %v223_v33  ;;  %v383_v2 = vshll.u32 %v553_v37, %v374_v35 }
  0xbb   :  { %v319_v47 = vshll.u32 %v735_v36, 30  ;;  %v378_v10 = vshrl.u32 %v552_v34, %v375_v40  ;;  %v381_v53 = vshrl.u32 %v553_v37, %v375_v40  ;;  %v229_v55 = vadd.s32 127, %v228_v46 }
  0xbc   :  { %v384_v14 = vshrl.u32 %v554_v39, %v375_v40  ;;  %v387_v62 = vshrl.u32 %v555_v41, %v375_v40  ;;  %v390_v21 = vshrl.u32 %v556_v48, %v375_v40  ;;  %v126_v34 = vshll.u32 %v125_v54, 23 }
  0xbd   :  { %v742_v49 = vsub.s32 %v316_v25, %v319_v47  ;;  %v379_v3 = vor.u32 %v378_v10, %v377_v15  ;;  %v382_v9 = vor.u32 %v381_v53, %v380_v57  ;;  %v230_v63 = vshll.u32 %v229_v55, 23 }
  0xbe   :  { %v388_v18 = vor.u32 %v387_v62, %v386_v60  ;;  %v385_v24 = vor.u32 %v384_v14, %v383_v2  ;;  %v225_v39 = vshll.u32 %v710_v4, %v223_v33  ;;  %v389_v26 = vshll.u32 %v555_v41, %v374_v35 }
  0xbf   :  { %v322_v56 = vsub.s32 0, %v742_v49  ;;  %v226_v27 = vshrl.u32 %v208_v52, %v224_v0  ;;  %vm392_vm5 = vcmp.lt.s32.totalorder %v373_v1, 1  ;;  %vm395_vm6 = vcmp.lt.s32.totalorder %v373_v1, 4 }
  0xc0   :  { %v391_v37 = vor.u32 %v390_v21, %v389_v26  ;;  %vm394_vm7 = vcmp.lt.s32.totalorder %v373_v1, 3  ;;  %v400_v11 = vsel %vm392_vm5, %v379_v3, %v382_v9  ;;  %v401_v48 = vsel %vm395_vm6, %v388_v18, 920167782 }
  0xc1   :  { %v503_v61 = vmin.u32 %v322_v56, %v742_v49  ;;  %v231_v29 = vor.u32 4788187, %v230_v63  ;;  %vm393_vm9 = vcmp.lt.s32.totalorder %v373_v1, 2  ;;  %v402_v25 = vsel %vm394_vm7, %v385_v24, %v401_v48 }
  0xc2   :  { %v121_v4 = vshll.u32 %v682_v19, %v733_v13  ;;  %v127_v30 = vor.u32 4788187, %v126_v34  ;;  %v403_v41 = vsel %vm393_vm9, %v400_v11, %v402_v25  ;;  %v408_v31 = vshll.u32 %v368_v20, 8 }
  0xc3   :  { %v324_v23 = vclz %v503_v61  ;;  %v227_v33 = vor.u32 %v226_v27, %v225_v39  ;;  %v397_v45 = vsel %vm395_vm6, %v385_v24, 2102212464  ;;  %v404_v46 = vsel %vm392_vm5, %v382_v9, %v385_v24 }
  0xc4   :  { %v376_v47 = vshrl.u32 %v551_v32, %v375_v40  ;;  %v405_v42 = vsel %vm395_vm6, %v391_v37, 1326507024  ;;  %v772_v50 = vmul.u32.u64.low %v408_v31, %v403_v41  ;;  %v773_v51 = vmul.u32.u64.high %v408_v31, %v403_v41, %v772_v50 }
  0xc5   :  { %v504_v28 = vadd.s32 4294967294, %v324_v23  ;;  %v123_v52 = vor.u32 %v122_v22, %v121_v4  ;;  %v232_v19 = vand.u32 2147483647, %v231_v29  ;;  %v406_v13 = vsel %vm394_vm7, %v388_v18, %v405_v42 }
  0xc6   :  { %v396_v53 = vsel %vm392_vm5, %v376_v47, %v379_v3  ;;  %v398_v54 = vsel %vm394_vm7, %v382_v9, %v397_v45  ;;  %v407_v55 = vsel %vm393_vm9, %v404_v46, %v406_v13  ;;  %v128_v56 = vand.u32 2147483647, %v127_v30 }
  0xc7   :  { %vm505_vm8 = vcmp.lt.s32.totalorder %v504_v28, 0  ;;  %v234_v14 = vcvt.s32.f32 %v227_v33  ;;  %v780_v32 = vmul.u32.u64.low %v408_v31, %v407_v55  ;;  %v781_v40 = vmul.u32.u64.high %v408_v31, %v407_v55, %v780_v32 }
  0xc8   :  { %v327_v35 = vsel %vm505_vm8, 0, %v504_v28  ;;  %v399_v15 = vsel %vm393_vm9, %v396_v53, %v398_v54  ;;  %v418_v57 = vadd.s32 1, %v773_v51  ;;  %v130_v60 = vcvt.s32.f32 %v123_v52 }
  0xc9   :  { %v332_v10 = vsub.s32 4294967266, %v327_v35  ;;  %v235_v62 = vmul.f32 %v234_v14, %v232_v19  ;;  %v328_v2 = vsub.s32 32, %v327_v35  ;;  %v415_v18 = vmul.u32 %v408_v31, %v399_v15 }
  0xca   :  { %v131_v61 = vmul.f32 %v130_v60, %v128_v56  ;;  %vm417_vm10 = vc.u32 %v781_v40, %v772_v50  ;;  %v312_v21 = vadd.s32 %v724_v58, %v721_v16  ;;  %v329_v39 = vshll.u32 %v742_v49, %v327_v35 }
  0xcb   :  { %v333_v0 = vadd.s32 127, %v332_v10  ;;  %v419_v3 = vsel %vm417_vm10, %v418_v57, %v773_v51  ;;  %v236_v9 = vxor.u32 2147483648, %v235_v62  ;;  %v238_v4 = vsub.s32 4, %v703_v44 }
  0xcc   :  { %v420_v1 = vadd.s32 %v419_v3, %v415_v18  ;;  %v132_v63 = vxor.u32 2147483648, %v131_v61  ;;  %v330_v23 = vshrl.u32 %v312_v21, %v328_v2  ;;  %v135_v46 = vsel %vm50_vm12, %v134_v8, %v664_v59 }
  0xcd   :  { %v334_v22 = vshll.u32 %v333_v0, 23  ;;  %v237_v34 = vsel %vm154_vm11, %v236_v9, %v235_v62  ;;  %v239_v33 = vsel %vm154_vm11, %v238_v4, %v703_v44  ;;  %vm258_vm0 = vcmp.lt.s32.totalorder %v594_v7, 0 }
  0xce   :  { %v421_v24 = vadd.s32 536870912, %v420_v1  ;;  %v133_v16 = vsel %vm50_vm12, %v132_v63, %v131_v61  ;;  %v331_v27 = vor.u32 %v330_v23, %v329_v39  ;;  %v240_v49 = vsel %vm801_vm13, %v602_v12, %v237_v34 }
  0xcf   :  { %v335_v20 = vor.u32 4788187, %v334_v22  ;;  %v136_v17 = vsel %vm811_vm14, %v591_v6, %v133_v16  ;;  %534 = vcosq.f32 %v240_v49  ;;  %v241_v47 = vsel %vm801_vm13, 0, %v239_v33 }
  0xd0   :  { %v794_v26 = vshrl.u32 %v421_v24, 30  ;;  %v338_v29 = vcvt.s32.f32 %v331_v27  ;;  %536 = vsinq.f32 %v240_v49  ;;  %v416_v52 = vadd.s32 %v772_v50, %v781_v40 }
  0xd1   :  { %v336_v11 = vand.u32 2147483647, %v335_v20  ;;  %538 = vcosq.f32 %v136_v17  ;;  %v137_v13 = vsel %vm811_vm14, 0, %v135_v46  ;;  %vm837_vm1 = vcmp.le.f32.partialorder %v256_v5, 0.7853982 }
  0xd2   :  { %v423_v28 = vshll.u32 %v794_v26, 30  ;;  %540 = vsinq.f32 %v136_v17  ;;  %v245_v10 = vadd.s32 3, %v241_v47  ;;  %v141_v32 = vadd.s32 3, %v137_v13 }
  0xd3   :  { %v339_v30 = vmul.f32 %v338_v29, %v336_v11  ;;  %v342_v18 = vsub.s32 4, %v735_v36  ;;  %vm362_vm4 = vcmp.lt.s32.totalorder %v701_v43, 0  ;;  %v446_v16 = vsub.s32 4, %v794_v26 }
  0xd4   :  { %v424_v48 = vsub.s32 %v420_v1, %v423_v28  ;;  %v246_v62 = vand.u32 3, %v245_v10  ;;  %v142_v2 = vand.u32 3, %v141_v32  ;;  %vm852_vm8 = vcmp.le.f32.partialorder %v360_v38, 0.7853982  ;;  %v17_v38 = vld [vmem:[%s889_s1 + $0x8] sm:$0xff] }
  0xd5   :  { %v340_v35 = vxor.u32 2147483648, %v339_v30  ;;  %v343_v24 = vsel %vm258_vm0, %v342_v18, %v735_v36  ;;  %vm244_vm10 = vweird.f32 %v602_v12  ;;  %vm140_vm11 = vweird.f32 %v591_v6 }
  0xd6   :  { %v426_v25 = vsub.s32 0, %v424_v48  ;;  %vm248_vm2 = vcmp.eq.s32.totalorder %v246_v62, 0  ;;  %vm251_vm3 = vcmp.eq.s32.totalorder %v246_v62, 2  ;;  %vm144_vm5 = vcmp.eq.s32.totalorder %v142_v2, 0 }
  0xd7   :  { %v341_v51 = vsel %vm258_vm0, %v340_v35, %v339_v30  ;;  %vm147_vm6 = vcmp.eq.s32.totalorder %v142_v2, 2  ;;  %vm247_vm7 = vcmp.lt.s32.totalorder %v246_v62, 2  ;;  %vm143_vm9 = vcmp.lt.s32.totalorder %v142_v2, 2 }
  0xd8   :  { %v507_v41 = vmin.u32 %v426_v25, %v424_v48  ;;  %v344_v50 = vsel %vm837_vm1, %v594_v7, %v341_v51  ;;  %v345_v36 = vsel %vm837_vm1, 0, %v343_v24  ;;  %v16_v25 = vld [vmem:[%s889_s1] sm:$0xff]  ;;  %vm348_vm0 = vweird.f32 %v594_v7 }
  0xd9   :  { %542 = vcosq.f32 %v344_v50  ;;  %v349_v17 = vadd.s32 3, %v345_v36 }
  0xda   :  { %v428_v31 = vclz %v507_v41  ;;  %544 = vsinq.f32 %v344_v50 }
  0xdb   :  { %v350_v8 = vand.u32 3, %v349_v17 }
  0xdc   :  { %v508_v45 = vadd.s32 4294967294, %v428_v31  ;;  %v535_v56 = vpop.eup %534 }
  0xdd   :  { %v537_v14 = vpop.eup %536  ;;  %v252_v61 = vxor.u32 2147483648, %v535_v56  ;;  %vm352_vm12 = vcmp.eq.s32.totalorder %v350_v8, 0  ;;  %vm355_vm13 = vcmp.eq.s32.totalorder %v350_v8, 2  ;;  %vm351_vm14 = vcmp.lt.s32.totalorder %v350_v8, 2 }
  0xde   :  { %vm509_vm15 = vcmp.lt.s32.totalorder %v508_v45, 0  ;;  %v539_v57 = vpop.eup %538  ;;  %v249_v0 = vxor.u32 2147483648, %v537_v14 }
  0xdf   :  { %v431_v42 = vsel %vm509_vm15, 0, %v508_v45  ;;  %v541_v60 = vpop.eup %540  ;;  %v148_v22 = vxor.u32 2147483648, %v539_v57  ;;  %v253_v23 = vsel %vm251_vm3, %v252_v61, %v537_v14  ;;  %vm452_vm3 = vweird.f32 %v701_v43 }
  0xe0   :  { %v432_v44 = vsub.s32 32, %v431_v42  ;;  %v436_v19 = vsub.s32 4294967266, %v431_v42  ;;  %v433_v53 = vshll.u32 %v424_v48, %v431_v42  ;;  %v145_v21 = vxor.u32 2147483648, %v541_v60 }
  0xe1   :  { %v250_v63 = vsel %vm248_vm2, %v535_v56, %v249_v0  ;;  %v149_v20 = vsel %vm147_vm6, %v148_v22, %v541_v60  ;;  %v447_v48 = vsel %vm362_vm4, %v446_v16, %v794_v26 }
  0xe2   :  { %v434_v54 = vshrl.u32 %v416_v52, %v432_v44  ;;  %v437_v55 = vadd.s32 127, %v436_v19  ;;  %v146_v39 = vsel %vm144_vm5, %v539_v57, %v145_v21  ;;  %v254_v58 = vsel %vm247_vm7, %v250_v63, %v253_v23 }
  0xe3   :  { %v150_v37 = vsel %vm143_vm9, %v146_v39, %v149_v20  ;;  %v255_v11 = vsel %vm244_vm10, nan, %v254_v58  ;;  %v449_v30 = vsel %vm852_vm8, 0, %v447_v48 }
  0xe4   :  { %v435_v40 = vor.u32 %v434_v54, %v433_v53  ;;  %v438_v15 = vshll.u32 %v437_v55, 23  ;;  %v151_v12 = vsel %vm140_vm11, nan, %v150_v37  ;;  %v465_v41 = vmul.f32 %v255_v11, %v17_v38  ;;  %v18_v53 = vld [vmem:[%s889_s1 + $0x10] sm:$0xff]  ;;  %v19_v54 = vld [vmem:[%s889_s1 + $0x18] sm:$0xff] }
  0xe5   :  { %v464_v31 = vmul.f32 %v151_v12, %v16_v25  ;;  %v453_v26 = vadd.s32 3, %v449_v30 }
  0xe6   :  { %v439_v5 = vor.u32 4788187, %v438_v15  ;;  %v442_v9 = vcvt.s32.f32 %v435_v40  ;;  %v543_v29 = vpop.eup %542 }
  0xe7   :  { %v545_v4 = vpop.eup %544  ;;  %v356_v35 = vxor.u32 2147483648, %v543_v29  ;;  %v468_v45 = vadd.f32 %v465_v41, %v464_v31  ;;  %v454_v47 = vand.u32 3, %v453_v26 }
  0xe8   :  { %v440_v3 = vand.u32 2147483647, %v439_v5  ;;  %v353_v33 = vxor.u32 2147483648, %v545_v4 }
  0xe9   :  { %v357_v46 = vsel %vm355_vm13, %v356_v35, %v545_v4  ;;  %v469_v42 = vrot.slane %v468_v45, 4  ;;  %vm459_vm15 = vcmp.eq.s32.totalorder %v454_v47, 2  ;;  %vm456_vm1 = vcmp.eq.s32.totalorder %v454_v47, 0 }
  0xea   :  { %v443_v1 = vmul.f32 %v442_v9, %v440_v3  ;;  %v354_v6 = vsel %vm352_vm12, %v543_v29, %v353_v33  ;;  %vm455_vm2 = vcmp.lt.s32.totalorder %v454_v47, 2 }
  0xeb   :  { %v358_v44 = vsel %vm351_vm14, %v354_v6, %v357_v46  ;;  %v470_v10 = vadd.f32 %v469_v42, %v468_v45 }
  0xec   :  { %v444_v34 = vxor.u32 2147483648, %v443_v1  ;;  %v359_v55 = vsel %vm348_vm0, nan, %v358_v44 }
  0xed   :  { %v466_v32 = vmul.f32 %v359_v55, %v18_v53  ;;  %v471_v40 = vrot.slane %v470_v10, 2 }
  0xee   :  { %v445_v28 = vsel %vm362_vm4, %v444_v34, %v443_v1  ;;  %vm484_vm4 = vcmask 1041409  }
  0xef   :  { %v448_v49 = vsel %vm852_vm8, %v701_v43, %v445_v28  ;;  %v472_v57 = vadd.f32 %v471_v40, %v470_v10 }
  0xf0   :  { %546 = vcosq.f32 %v448_v49 }
  0xf1   :  { %548 = vsinq.f32 %v448_v49  ;;  %v473_v5 = vrot.slane %v472_v57, 1 }
  0xf3   :  { %v474_v2 = vadd.f32 %v473_v5, %v472_v57 }
  0xfd   :  { %v547_v51 = vpop.eup %546 }
  0xfe   :  { %v549_v52 = vpop.eup %548  ;;  %v460_v19 = vxor.u32 2147483648, %v547_v51 }
  0xff   :  { %v457_v13 = vxor.u32 2147483648, %v549_v52 }
 0x100   :  { %v461_v59 = vsel %vm459_vm15, %v460_v19, %v549_v52 }
 0x101   :  { %v458_v56 = vsel %vm456_vm1, %v547_v51, %v457_v13 }
 0x102   :  { %v462_v50 = vsel %vm455_vm2, %v458_v56, %v461_v59 }
 0x103   :  { %v463_v14 = vsel %vm452_vm3, nan, %v462_v50 }
 0x104   :  { %v467_v7 = vmul.f32 %v463_v14, %v19_v54 }
 0x106   :  { %v475_v15 = vadd.f32 %v467_v7, %v466_v32 }
 0x108   :  { %v476_v60 = vrot.slane %v475_v15, 4 }
 0x10a   :  { %v477_v62 = vadd.f32 %v476_v60, %v475_v15 }
 0x10c   :  { %v478_v0 = vrot.slane %v477_v62, 2 }
 0x10e   :  { %v479_v61 = vadd.f32 %v478_v0, %v477_v62 }
 0x110   :  { %v480_v18 = vrot.slane %v479_v61, 1 }
 0x112   :  { %v481_v3 = vadd.f32 %v480_v18, %v479_v61 }
 0x114   :  { %v485_v9 = vsel %vm484_vm4, %v481_v3, %v474_v2 }
 0x115   :  { %487 = vst [vmem:[%s890_s3] sm:$0x3] %v485_v9 }

// kernel: reverse.2
= control target key start
LH: loop header
LB: loop body
LE: loop exit
PB: predicated region body
PF: predicated region fallthrough
CT: control target
= control target key end

     0   :  { %v2_v0 = vlaneseq  ;;  %s112_s0 = inlined_call_operand.vmem [shape: f32[2,127], index: 0, kind: input, shape index: {}]   ;;  %s113_s1 = inlined_call_operand.vmem [shape: f32[2,127], index: 1, kind: output, shape index: {}]  }
   0x2   :  { %v3_v1 = vsub.s32 126, %v2_v0 }
   0x4   :  { %4 = vset.pattern.permute.xlu0 %v3_v1 }
   0x5   :  { %v21_v2 = vld [vmem:[%s112_s0] sm:$0x3] }
   0x6   :  { %22 = vst [vmem:[#allocation1] sm:$0x3] %v21_v2 }
   0xd   :  { %v41_v3 = vld [vmem:[#allocation1] sm:$0x3] }
   0xe   :  { %42 = vst [vmem:[#allocation0] sm:$0x3] %v41_v3 }
  0x15   :  { %v43_v4 = vld [vmem:[#allocation0] sm:$0xff] }
  0x16   :  { %44 = vperm.xlu0 %4, %v43_v4  }
  0x91   :  { %v45_v5 = vpop.permute.xlu0 %44 }
  0x92   :  { %46 = vst [vmem:[#allocation2] sm:$0xff] %v45_v5 }
  0x99   :  { %v51_v6 = vld [vmem:[#allocation2] sm:$0x3] }
  0x9a   :  { %54 = vst [vmem:[#allocation3] sm:$0x3] %v51_v6 }
  0xa1   :  { %v71_v7 = vld [vmem:[#allocation3] sm:$0x3] }
  0xa2   :  { %72 = vst [vmem:[%s113_s1] sm:$0x3] %v71_v7 }

</bundles_post_ra>
